<compile_context>
chip_gen: v7x
topology: tpu7x:2x2x1
jax: 0.10.0
libtpu: 0.0.40
codegen_flags: <defaults>
</compile_context>

<pallas_src>
import functools

import jax
import jax.numpy as jnp
from jax.experimental import pallas as pl
from jax.experimental.pallas import tpu as pltpu


def _round_up(x, m):
    return ((x + m - 1) // m) * m


@functools.lru_cache(maxsize=None)
def _vmem_limit_bytes():
    """Scoped-VMEM limit: ~75% of physical VMEM (48 MiB on v7x's 64 MiB/TC,
    96 MiB on v5e/v6e's 128 MiB), with a conservative fallback."""
    try:
        phys = int(pltpu.get_tpu_info().vmem_capacity_bytes)
    except Exception:
        phys = 64 * 1024 * 1024
    return max(32 * 1024 * 1024, min((phys * 3) // 4, 96 * 1024 * 1024))


def _vmem_estimate(tm, k_pad, co_pad, out_itemsize, a_buffers=3):
    a = a_buffers * tm * k_pad * 2          # bf16 A tiles (multi-buffered)
    b = 2 * k_pad * co_pad * 2              # resident bf16 weights (worst case 2 bufs)
    o = 2 * tm * co_pad * out_itemsize      # output tiles
    sb = 2 * 2 * co_pad * 4                 # f32 scale / bias rows
    return a + b + o + sb


def _choose_tm(m16, k_pad, co_pad, out_itemsize, budget):
    """Largest M tile that fits the VMEM budget (>=512 rows is ~85% of the HBM
    roofline); keep >= 2 row blocks when there is enough work so v7x's two
    TensorCores both get a share of the (parallel) M axis."""
    tm = 16
    for cand in (2048, 1024, 512, 256, 128, 64, 32, 16):
        if cand <= m16 and _vmem_estimate(cand, k_pad, co_pad, out_itemsize) <= budget:
            tm = cand
            break
    if m16 >= 256 and -(-m16 // tm) < 2:
        tm = max(128, tm // 2)
    return tm


# ----------------------------- Pallas kernel ------------------------------ #

def _fused_matmul_kernel(a_ref, b_ref, scale_ref, bias_ref, o_ref, *, epilogue):
    """One grid step: o_tile = epilogue(A_tile @ B, scale, bias).

    The whole (pre-padded, bf16) weight matrix plus the folded-BN scale/bias
    rows are VMEM-resident (their block index never changes, so Pallas copies
    them exactly once); the grid is 1-D over M row tiles of the im2col matrix,
    so there is no reduction grid axis, no scratch accumulator and no
    pl.when init/finalize -- each step is one MXU matmul + fused epilogue.
    """
    acc = jnp.dot(a_ref[...], b_ref[...], preferred_element_type=jnp.float32)
    o_ref[...] = epilogue(acc, scale_ref[...], bias_ref[...]).astype(o_ref.dtype)


# ------------------------------ epilogues --------------------------------- #

def _leaky(x, slope):
    return jnp.where(x >= 0, x, slope * x)


def ep_lrelu(y, s, b):                       # Conv -> LeakyReLU(0.2)
    return _leaky(y, 0.2)


def ep_lrelu_bn_lrelu(y, s, b):              # Conv -> LReLU(0.2) -> BN -> LReLU(0.02)
    return _leaky(s * _leaky(y, 0.2) + b, 0.02)


def ep_bn_lrelu(y, s, b):                    # Conv -> BN -> LeakyReLU(0.2)
    return _leaky(s * y + b, 0.2)


def ep_sigmoid(y, s, b):                     # Conv -> Sigmoid (stable, EUP tanh)
    return 0.5 * (jnp.tanh(0.5 * y) + 1.0)


# ------------------------------- glue (JAX) -------------------------------- #

def _im2col(x, kh, kw, stride, pad):
    """x: [N, H, W, C] -> ([N*OH*OW, KH*KW*C], (N, OH, OW))."""
    n, h, w, c = x.shape
    xp = jnp.pad(x, ((0, 0), (pad, pad), (pad, pad), (0, 0)))
    oh = (h + 2 * pad - kh) // stride + 1
    ow = (w + 2 * pad - kw) // stride + 1
    cols = []
    for i in range(kh):
        for j in range(kw):
            cols.append(xp[:, i:i + stride * oh:stride, j:j + stride * ow:stride, :])
    a = jnp.concatenate(cols, axis=-1)              # [N, OH, OW, KH*KW*C]
    return a.reshape(n * oh * ow, kh * kw * c), (n, oh, ow)


def _fused_matmul(a, b, scale, bias, epilogue, out_dtype, tm, multibuffer_a):
    m_pad, k_pad = a.shape
    _, co_pad = b.shape
    grid = (m_pad // tm,)

    if multibuffer_a:
        a_spec = pl.BlockSpec((tm, k_pad), lambda i: (i, 0),
                              pipeline_mode=pl.Buffered(3))
    else:
        a_spec = pl.BlockSpec((tm, k_pad), lambda i: (i, 0))

    return pl.pallas_call(
        functools.partial(_fused_matmul_kernel, epilogue=epilogue),
        out_shape=jax.ShapeDtypeStruct((m_pad, co_pad), out_dtype),
        grid_spec=pltpu.PrefetchScalarGridSpec(
            num_scalar_prefetch=0,
            grid=grid,
            in_specs=[
                a_spec,                                          # A row tiles
                pl.BlockSpec((k_pad, co_pad), lambda i: (0, 0)),  # resident weights
                pl.BlockSpec((1, co_pad), lambda i: (0, 0)),      # resident scale
                pl.BlockSpec((1, co_pad), lambda i: (0, 0)),      # resident bias
            ],
            out_specs=pl.BlockSpec((tm, co_pad), lambda i: (i, 0)),
        ),
        compiler_params=pltpu.CompilerParams(
            dimension_semantics=("parallel",),
            vmem_limit_bytes=_vmem_limit_bytes(),
        ),
    )(a, b, scale, bias)


def conv2d_fused(x_nhwc, layer):
    """Conv2d(k=4, bias=False) + fused per-channel affine + activation.

    The incoming activation already carries the padded channel count of the
    previous layer (or the pre-padded input channels for layer 0), so the
    im2col K dimension matches the prepared weight exactly -- no per-layer
    K-pad / CO-slice passes through HBM.
    """
    kh, kw, stride, pad = layer["kh"], layer["kw"], layer["stride"], layer["pad"]

    a, (n, oh, ow) = _im2col(x_nhwc, kh, kw, stride, pad)
    m = a.shape[0]
    k_pad, co_pad = layer["w"].shape
    assert a.shape[1] == k_pad, (a.shape, layer["w"].shape)

    out_itemsize = jnp.dtype(layer["out_dtype"]).itemsize
    budget = (_vmem_limit_bytes() * 4) // 5
    tm = _choose_tm(_round_up(m, 16), k_pad, co_pad, out_itemsize, budget)
    m_pad = _round_up(m, tm)
    if m_pad != m:
        a = jnp.pad(a, ((0, m_pad - m), (0, 0)))

    # Deeper A multi-buffering only where each grid step is DMA-thin (small K)
    # and the grid is long enough to matter (early stride-2 layers).
    multibuffer_a = (k_pad <= 1024) and (m_pad // tm >= 4)

    out = _fused_matmul(a, layer["w"], layer["scale"], layer["bias"],
                        layer["epilogue"], layer["out_dtype"], tm, multibuffer_a)
    # Keep the padded channel dimension for the next layer (padded channels are
    # exactly zero for all intermediate epilogues); only drop padded M rows.
    if m_pad != m:
        out = out[:m]
    return out.reshape(n, oh, ow, co_pad)


def _bn_fold(gamma, beta, mean, var, eps=1e-5):
    scale = gamma / jnp.sqrt(var + eps)
    bias = beta - mean * scale
    return scale, bias


# ------------------------------ parameters --------------------------------- #

def init_params(key, input_nc, nf, num_layers=3):
    """Deterministic synthetic weights matching patchGAN(input_nc, nf, num_layers)."""
    ks = iter(jax.random.split(key, 64))
    p = {}

    def conv_w(co, ci):
        return jax.random.normal(next(ks), (co, ci, 4, 4), jnp.float32) * 0.05

    def bn(c):
        gamma = 0.8 + 0.4 * jax.random.uniform(next(ks), (c,), jnp.float32)
        beta = 0.1 * jax.random.normal(next(ks), (c,), jnp.float32)
        mean = 0.1 * jax.random.normal(next(ks), (c,), jnp.float32)
        var = 0.5 + jax.random.uniform(next(ks), (c,), jnp.float32)
        return _bn_fold(gamma, beta, mean, var)

    # layer 0: Conv(input_nc -> nf, s=2) + LReLU(0.2)          (bias=False)
    p["w0"] = conv_w(nf, input_nc)
    # layers 1..num_layers-1: Conv(s=2) + LReLU(0.2) + BN + LReLU(0.02)
    nf_mult = 1
    for i in range(1, num_layers):
        nf_prev, nf_mult = nf_mult, min(2 ** i, 8)
        p[f"w{i}"] = conv_w(nf * nf_mult, nf * nf_prev)
        p[f"bn{i}"] = bn(nf * nf_mult)
    # penultimate: Conv(s=1) + BN + LReLU(0.2)
    nf_prev, nf_mult = nf_mult, min(2 ** num_layers, 8)
    p["w_pen"] = conv_w(nf * nf_mult, nf * nf_prev)
    p["bn_pen"] = bn(nf * nf_mult)
    # final: Conv(-> 1, s=1) + Sigmoid
    p["w_out"] = conv_w(1, nf * nf_mult)
    p["num_layers"] = num_layers
    return p


def _prep_conv(w_oihw, scale, bias, stride, pad, epilogue, out_dtype, ci_pad):
    """Fold a Conv2d weight into a kernel-ready bf16 [KH*KW*CI_pad, CO_pad]
    matrix (zero rows/cols for padded channels) plus f32 scale/bias rows."""
    co, ci, kh, kw = w_oihw.shape
    co_pad = _round_up(co, 128)
    # [CO, CI, KH, KW] -> [KH, KW, CI, CO] -> pad CI/CO -> [KH*KW*CI_pad, CO_pad]
    w_t = jnp.transpose(w_oihw, (2, 3, 1, 0))
    w_t = jnp.pad(w_t, ((0, 0), (0, 0), (0, ci_pad - ci), (0, co_pad - co)))
    w_mat = w_t.reshape(kh * kw * ci_pad, co_pad).astype(jnp.bfloat16)
    scale_p = jnp.pad(scale.astype(jnp.float32).reshape(1, co),
                      ((0, 0), (0, co_pad - co)))
    bias_p = jnp.pad(bias.astype(jnp.float32).reshape(1, co),
                     ((0, 0), (0, co_pad - co)))
    return dict(w=w_mat, scale=scale_p, bias=bias_p, co=co, co_pad=co_pad,
                ci_pad=ci_pad, kh=kh, kw=kw, stride=stride, pad=pad,
                epilogue=epilogue, out_dtype=out_dtype)


def prepare_params(raw):
    """One-time prep: fold BN, transpose/pad/cast weights to kernel-ready form.

    Channel padding is carried between layers: each layer's CI is padded to the
    previous layer's CO_pad (layer 0's input channels are padded on the small
    input tensor, not on the 16x-expanded im2col matrix)."""
    layers = []
    nl = raw["num_layers"]
    ones = lambda c: jnp.ones((c,), jnp.float32)
    zeros = lambda c: jnp.zeros((c,), jnp.float32)

    ci0_pad = _round_up(raw["w0"].shape[1], 8)
    co0 = raw["w0"].shape[0]
    # Conv + LeakyReLU(0.2)
    layers.append(_prep_conv(raw["w0"], ones(co0), zeros(co0), 2, 1,
                             ep_lrelu, jnp.bfloat16, ci0_pad))
    # Conv + LeakyReLU(0.2) + BN + LeakyReLU(0.02)
    for i in range(1, nl):
        s, b = raw[f"bn{i}"]
        layers.append(_prep_conv(raw[f"w{i}"], s, b, 2, 1,
                                 ep_lrelu_bn_lrelu, jnp.bfloat16,
                                 layers[-1]["co_pad"]))
    # Conv(s=1) + BN + LeakyReLU(0.2)
    s, b = raw["bn_pen"]
    layers.append(_prep_conv(raw["w_pen"], s, b, 1, 1,
                             ep_bn_lrelu, jnp.bfloat16, layers[-1]["co_pad"]))
    # Conv(s=1, -> 1ch) + Sigmoid (keep final activation in f32)
    layers.append(_prep_conv(raw["w_out"], ones(1), zeros(1), 1, 1,
                             ep_sigmoid, jnp.float32, layers[-1]["co_pad"]))
    return layers


# ------------------------------ forward pass ------------------------------- #

def patchgan_forward(x_nchw, layers):
    x = jnp.transpose(x_nchw, (0, 2, 3, 1)).astype(jnp.bfloat16)   # NCHW -> NHWC
    ci0_pad = layers[0]["ci_pad"]
    if ci0_pad != x.shape[-1]:
        x = jnp.pad(x, ((0, 0), (0, 0), (0, 0), (0, ci0_pad - x.shape[-1])))
    for layer in layers:
        x = conv2d_fused(x, layer)
    x = x[..., :layers[-1]["co"]]              # drop padded output channels once
    return jnp.transpose(x, (0, 3, 1, 2))      # NHWC -> NCHW


# --------------------------------- main ------------------------------------ #

if __name__ == "__main__":
    key = jax.random.PRNGKey(0)
    k_x, k_p = jax.random.split(key)

    input_nc, nf, num_layers = 4, 8, 3           # small synthetic config
    x = jax.random.normal(k_x, (2, input_nc, 32, 32), jnp.float32)  # NCHW like PyTorch
    raw_params = init_params(k_p, input_nc, nf, num_layers)
    layers = prepare_params(raw_params)

    fwd = jax.jit(lambda inp: patchgan_forward(inp, layers))
    out = jax.block_until_ready(fwd(x))

    # 32 -> 16 -> 8 -> 4 (three s=2 convs) -> 3 -> 2 (two s=1, k=4, p=1 convs)
    assert out.shape == (2, 1, 2, 2), out.shape
    assert bool(jnp.all(jnp.isfinite(out)))
    assert bool(jnp.all((out > 0.0) & (out < 1.0)))  # sigmoid output range

    print("KERNEL_OK")
</pallas_src>

<mosaic_0001>
module attributes {stable_mosaic.version = 11 : i64} {
  func.func @_fused_matmul_kernel(%arg0: i32, %arg1: memref<256x128xbf16, #tpu.memory_space<vmem>>, %arg2: memref<128x128xbf16, #tpu.memory_space<vmem>>, %arg3: memref<1x128xf32, #tpu.memory_space<vmem>>, %arg4: memref<1x128xf32, #tpu.memory_space<vmem>>, %arg5: memref<256x128xbf16, #tpu.memory_space<vmem>>) attributes {dimension_semantics = [#tpu.dimension_semantics<parallel>], iteration_bounds = array<i64: 2>, scalar_prefetch = 0 : i64, scratch_operands = 0 : i64, tpu.core_type = #tpu.core_type<tc>, window_params = [{transform_indices = @transform_0, window_bounds = array<i64: 256, 128>}, {pipeline_mode = #tpu.pipeline_mode<synchronous>, transform_indices = @transform_1, window_bounds = array<i64: 128, 128>}, {pipeline_mode = #tpu.pipeline_mode<synchronous>, transform_indices = @transform_2, window_bounds = array<i64: 1, 128>}, {pipeline_mode = #tpu.pipeline_mode<synchronous>, transform_indices = @transform_3, window_bounds = array<i64: 1, 128>}, {transform_indices = @transform_4, window_bounds = array<i64: 256, 128>}]} {
    %c0 = arith.constant 0 : index
    %c0_0 = arith.constant 0 : index
    %0 = vector.load %arg1[%c0, %c0_0] : memref<256x128xbf16, #tpu.memory_space<vmem>>, vector<256x128xbf16>
    %c0_1 = arith.constant 0 : index
    %c0_2 = arith.constant 0 : index
    %1 = vector.load %arg2[%c0_1, %c0_2] : memref<128x128xbf16, #tpu.memory_space<vmem>>, vector<128x128xbf16>
    %cst = arith.constant dense<0.000000e+00> : vector<256x128xf32>
    %2 = tpu.matmul %0, %1, %cst {dimension_numbers = #tpu.dot_dimension_numbers<[1], [0], [0], [1], [0, 0, 1, 1], [], []>} : vector<256x128xbf16>, vector<128x128xbf16>, vector<256x128xf32> -> vector<256x128xf32>
    %cst_3 = arith.constant 0.000000e+00 : f32
    %3 = vector.broadcast %cst_3 : f32 to vector<256x128xf32>
    %4 = arith.cmpf oge, %2, %3 : vector<256x128xf32>
    %cst_4 = arith.constant 2.000000e-01 : f32
    %5 = vector.broadcast %cst_4 : f32 to vector<256x128xf32>
    %6 = arith.mulf %5, %2 : vector<256x128xf32>
    %7 = arith.select %4, %2, %6 : vector<256x128xi1>, vector<256x128xf32>
    %8 = arith.truncf %7 : vector<256x128xf32> to vector<256x128xbf16>
    %c0_5 = arith.constant 0 : index
    %c0_6 = arith.constant 0 : index
    %9 = vector.load %arg5[%c0_5, %c0_6] : memref<256x128xbf16, #tpu.memory_space<vmem>>, vector<256x128xbf16>
    tpu.vector_store %arg5[%c0_5, %c0_6], %8 {strides = array<i32>} : memref<256x128xbf16, #tpu.memory_space<vmem>>, vector<256x128xbf16>,
    return
  }
  func.func @transform_0(%arg0: i32) -> (i32, i32) {
    %c0_i32 = arith.constant 0 : i32
    %c0_i32_0 = arith.constant 0 : i32
    return %arg0, %c0_i32 : i32, i32
  }
  func.func @transform_1(%arg0: i32) -> (i32, i32) {
    %c0_i32 = arith.constant 0 : i32
    %c0_i32_0 = arith.constant 0 : i32
    %c0_i32_1 = arith.constant 0 : i32
    return %c0_i32, %c0_i32_0 : i32, i32
  }
  func.func @transform_2(%arg0: i32) -> (i32, i32) {
    %c0_i32 = arith.constant 0 : i32
    %c0_i32_0 = arith.constant 0 : i32
    %c0_i32_1 = arith.constant 0 : i32
    return %c0_i32, %c0_i32_0 : i32, i32
  }
  func.func @transform_3(%arg0: i32) -> (i32, i32) {
    %c0_i32 = arith.constant 0 : i32
    %c0_i32_0 = arith.constant 0 : i32
    %c0_i32_1 = arith.constant 0 : i32
    return %c0_i32, %c0_i32_0 : i32, i32
  }
  func.func @transform_4(%arg0: i32) -> (i32, i32) {
    %c0_i32 = arith.constant 0 : i32
    %c0_i32_0 = arith.constant 0 : i32
    return %arg0, %c0_i32 : i32, i32
  }
}

module attributes {stable_mosaic.version = 11 : i64} {
  func.func @_fused_matmul_kernel(%arg0: i32, %arg1: memref<128x2048xbf16, #tpu.memory_space<vmem>>, %arg2: memref<2048x128xbf16, #tpu.memory_space<vmem>>, %arg3: memref<1x128xf32, #tpu.memory_space<vmem>>, %arg4: memref<1x128xf32, #tpu.memory_space<vmem>>, %arg5: memref<128x128xbf16, #tpu.memory_space<vmem>>) attributes {dimension_semantics = [#tpu.dimension_semantics<parallel>], iteration_bounds = array<i64: 1>, scalar_prefetch = 0 : i64, scratch_operands = 0 : i64, tpu.core_type = #tpu.core_type<tc>, window_params = [{transform_indices = @transform_0, window_bounds = array<i64: 128, 2048>}, {pipeline_mode = #tpu.pipeline_mode<synchronous>, transform_indices = @transform_1, window_bounds = array<i64: 2048, 128>}, {pipeline_mode = #tpu.pipeline_mode<synchronous>, transform_indices = @transform_2, window_bounds = array<i64: 1, 128>}, {pipeline_mode = #tpu.pipeline_mode<synchronous>, transform_indices = @transform_3, window_bounds = array<i64: 1, 128>}, {transform_indices = @transform_4, window_bounds = array<i64: 128, 128>}]} {
    %c0 = arith.constant 0 : index
    %c0_0 = arith.constant 0 : index
    %0 = vector.load %arg1[%c0, %c0_0] : memref<128x2048xbf16, #tpu.memory_space<vmem>>, vector<128x2048xbf16>
    %c0_1 = arith.constant 0 : index
    %c0_2 = arith.constant 0 : index
    %1 = vector.load %arg2[%c0_1, %c0_2] : memref<2048x128xbf16, #tpu.memory_space<vmem>>, vector<2048x128xbf16>
    %cst = arith.constant dense<0.000000e+00> : vector<128x128xf32>
    %2 = tpu.matmul %0, %1, %cst {dimension_numbers = #tpu.dot_dimension_numbers<[1], [0], [0], [1], [0, 0, 1, 1], [], []>} : vector<128x2048xbf16>, vector<2048x128xbf16>, vector<128x128xf32> -> vector<128x128xf32>
    %c0_3 = arith.constant 0 : index
    %c0_4 = arith.constant 0 : index
    %3 = vector.load %arg3[%c0_3, %c0_4] : memref<1x128xf32, #tpu.memory_space<vmem>>, vector<1x128xf32>
    %c0_5 = arith.constant 0 : index
    %c0_6 = arith.constant 0 : index
    %4 = vector.load %arg4[%c0_5, %c0_6] : memref<1x128xf32, #tpu.memory_space<vmem>>, vector<1x128xf32>
    %cst_7 = arith.constant 0.000000e+00 : f32
    %5 = vector.broadcast %cst_7 : f32 to vector<128x128xf32>
    %6 = arith.cmpf oge, %2, %5 : vector<128x128xf32>
    %cst_8 = arith.constant 2.000000e-01 : f32
    %7 = vector.broadcast %cst_8 : f32 to vector<128x128xf32>
    %8 = arith.mulf %7, %2 : vector<128x128xf32>
    %9 = arith.select %6, %2, %8 : vector<128x128xi1>, vector<128x128xf32>
    %10 = vector.broadcast %3 : vector<1x128xf32> to vector<128x128xf32>
    %11 = arith.mulf %10, %9 : vector<128x128xf32>
    %12 = vector.broadcast %4 : vector<1x128xf32> to vector<128x128xf32>
    %13 = arith.addf %11, %12 : vector<128x128xf32>
    %cst_9 = arith.constant 0.000000e+00 : f32
    %14 = vector.broadcast %cst_9 : f32 to vector<128x128xf32>
    %15 = arith.cmpf oge, %13, %14 : vector<128x128xf32>
    %cst_10 = arith.constant 2.000000e-02 : f32
    %16 = vector.broadcast %cst_10 : f32 to vector<128x128xf32>
    %17 = arith.mulf %16, %13 : vector<128x128xf32>
    %18 = arith.select %15, %13, %17 : vector<128x128xi1>, vector<128x128xf32>
    %19 = arith.truncf %18 : vector<128x128xf32> to vector<128x128xbf16>
    %c0_11 = arith.constant 0 : index
    %c0_12 = arith.constant 0 : index
    %20 = vector.load %arg5[%c0_11, %c0_12] : memref<128x128xbf16, #tpu.memory_space<vmem>>, vector<128x128xbf16>
    tpu.vector_store %arg5[%c0_11, %c0_12], %19 {strides = array<i32>} : memref<128x128xbf16, #tpu.memory_space<vmem>>, vector<128x128xbf16>,
    return
  }
  func.func @transform_0(%arg0: i32) -> (i32, i32) {
    %c0_i32 = arith.constant 0 : i32
    %c0_i32_0 = arith.constant 0 : i32
    return %arg0, %c0_i32 : i32, i32
  }
  func.func @transform_1(%arg0: i32) -> (i32, i32) {
    %c0_i32 = arith.constant 0 : i32
    %c0_i32_0 = arith.constant 0 : i32
    %c0_i32_1 = arith.constant 0 : i32
    return %c0_i32, %c0_i32_0 : i32, i32
  }
  func.func @transform_2(%arg0: i32) -> (i32, i32) {
    %c0_i32 = arith.constant 0 : i32
    %c0_i32_0 = arith.constant 0 : i32
    %c0_i32_1 = arith.constant 0 : i32
    return %c0_i32, %c0_i32_0 : i32, i32
  }
  func.func @transform_3(%arg0: i32) -> (i32, i32) {
    %c0_i32 = arith.constant 0 : i32
    %c0_i32_0 = arith.constant 0 : i32
    %c0_i32_1 = arith.constant 0 : i32
    return %c0_i32, %c0_i32_0 : i32, i32
  }
  func.func @transform_4(%arg0: i32) -> (i32, i32) {
    %c0_i32 = arith.constant 0 : i32
    %c0_i32_0 = arith.constant 0 : i32
    return %arg0, %c0_i32 : i32, i32
  }
}

module attributes {stable_mosaic.version = 11 : i64} {
  func.func @_fused_matmul_kernel(%arg0: i32, %arg1: memref<32x2048xbf16, #tpu.memory_space<vmem>>, %arg2: memref<2048x128xbf16, #tpu.memory_space<vmem>>, %arg3: memref<1x128xf32, #tpu.memory_space<vmem>>, %arg4: memref<1x128xf32, #tpu.memory_space<vmem>>, %arg5: memref<32x128xbf16, #tpu.memory_space<vmem>>) attributes {dimension_semantics = [#tpu.dimension_semantics<parallel>], iteration_bounds = array<i64: 1>, scalar_prefetch = 0 : i64, scratch_operands = 0 : i64, tpu.core_type = #tpu.core_type<tc>, window_params = [{transform_indices = @transform_0, window_bounds = array<i64: 32, 2048>}, {pipeline_mode = #tpu.pipeline_mode<synchronous>, transform_indices = @transform_1, window_bounds = array<i64: 2048, 128>}, {pipeline_mode = #tpu.pipeline_mode<synchronous>, transform_indices = @transform_2, window_bounds = array<i64: 1, 128>}, {pipeline_mode = #tpu.pipeline_mode<synchronous>, transform_indices = @transform_3, window_bounds = array<i64: 1, 128>}, {transform_indices = @transform_4, window_bounds = array<i64: 32, 128>}]} {
    %c0 = arith.constant 0 : index
    %c0_0 = arith.constant 0 : index
    %0 = vector.load %arg1[%c0, %c0_0] : memref<32x2048xbf16, #tpu.memory_space<vmem>>, vector<32x2048xbf16>
    %c0_1 = arith.constant 0 : index
    %c0_2 = arith.constant 0 : index
    %1 = vector.load %arg2[%c0_1, %c0_2] : memref<2048x128xbf16, #tpu.memory_space<vmem>>, vector<2048x128xbf16>
    %cst = arith.constant dense<0.000000e+00> : vector<32x128xf32>
    %2 = tpu.matmul %0, %1, %cst {dimension_numbers = #tpu.dot_dimension_numbers<[1], [0], [0], [1], [0, 0, 1, 1], [], []>} : vector<32x2048xbf16>, vector<2048x128xbf16>, vector<32x128xf32> -> vector<32x128xf32>
    %c0_3 = arith.constant 0 : index
    %c0_4 = arith.constant 0 : index
    %3 = vector.load %arg3[%c0_3, %c0_4] : memref<1x128xf32, #tpu.memory_space<vmem>>, vector<1x128xf32>
    %c0_5 = arith.constant 0 : index
    %c0_6 = arith.constant 0 : index
    %4 = vector.load %arg4[%c0_5, %c0_6] : memref<1x128xf32, #tpu.memory_space<vmem>>, vector<1x128xf32>
    %cst_7 = arith.constant 0.000000e+00 : f32
    %5 = vector.broadcast %cst_7 : f32 to vector<32x128xf32>
    %6 = arith.cmpf oge, %2, %5 : vector<32x128xf32>
    %cst_8 = arith.constant 2.000000e-01 : f32
    %7 = vector.broadcast %cst_8 : f32 to vector<32x128xf32>
    %8 = arith.mulf %7, %2 : vector<32x128xf32>
    %9 = arith.select %6, %2, %8 : vector<32x128xi1>, vector<32x128xf32>
    %10 = vector.broadcast %3 : vector<1x128xf32> to vector<32x128xf32>
    %11 = arith.mulf %10, %9 : vector<32x128xf32>
    %12 = vector.broadcast %4 : vector<1x128xf32> to vector<32x128xf32>
    %13 = arith.addf %11, %12 : vector<32x128xf32>
    %cst_9 = arith.constant 0.000000e+00 : f32
    %14 = vector.broadcast %cst_9 : f32 to vector<32x128xf32>
    %15 = arith.cmpf oge, %13, %14 : vector<32x128xf32>
    %cst_10 = arith.constant 2.000000e-02 : f32
    %16 = vector.broadcast %cst_10 : f32 to vector<32x128xf32>
    %17 = arith.mulf %16, %13 : vector<32x128xf32>
    %18 = arith.select %15, %13, %17 : vector<32x128xi1>, vector<32x128xf32>
    %19 = arith.truncf %18 : vector<32x128xf32> to vector<32x128xbf16>
    %c0_11 = arith.constant 0 : index
    %c0_12 = arith.constant 0 : index
    %20 = vector.load %arg5[%c0_11, %c0_12] : memref<32x128xbf16, #tpu.memory_space<vmem>>, vector<32x128xbf16>
    tpu.vector_store %arg5[%c0_11, %c0_12], %19 {strides = array<i32>} : memref<32x128xbf16, #tpu.memory_space<vmem>>, vector<32x128xbf16>,
    return
  }
  func.func @transform_0(%arg0: i32) -> (i32, i32) {
    %c0_i32 = arith.constant 0 : i32
    %c0_i32_0 = arith.constant 0 : i32
    return %arg0, %c0_i32 : i32, i32
  }
  func.func @transform_1(%arg0: i32) -> (i32, i32) {
    %c0_i32 = arith.constant 0 : i32
    %c0_i32_0 = arith.constant 0 : i32
    %c0_i32_1 = arith.constant 0 : i32
    return %c0_i32, %c0_i32_0 : i32, i32
  }
  func.func @transform_2(%arg0: i32) -> (i32, i32) {
    %c0_i32 = arith.constant 0 : i32
    %c0_i32_0 = arith.constant 0 : i32
    %c0_i32_1 = arith.constant 0 : i32
    return %c0_i32, %c0_i32_0 : i32, i32
  }
  func.func @transform_3(%arg0: i32) -> (i32, i32) {
    %c0_i32 = arith.constant 0 : i32
    %c0_i32_0 = arith.constant 0 : i32
    %c0_i32_1 = arith.constant 0 : i32
    return %c0_i32, %c0_i32_0 : i32, i32
  }
  func.func @transform_4(%arg0: i32) -> (i32, i32) {
    %c0_i32 = arith.constant 0 : i32
    %c0_i32_0 = arith.constant 0 : i32
    return %arg0, %c0_i32 : i32, i32
  }
}

module attributes {stable_mosaic.version = 11 : i64} {
  func.func @_fused_matmul_kernel(%arg0: i32, %arg1: memref<32x2048xbf16, #tpu.memory_space<vmem>>, %arg2: memref<2048x128xbf16, #tpu.memory_space<vmem>>, %arg3: memref<1x128xf32, #tpu.memory_space<vmem>>, %arg4: memref<1x128xf32, #tpu.memory_space<vmem>>, %arg5: memref<32x128xbf16, #tpu.memory_space<vmem>>) attributes {dimension_semantics = [#tpu.dimension_semantics<parallel>], iteration_bounds = array<i64: 1>, scalar_prefetch = 0 : i64, scratch_operands = 0 : i64, tpu.core_type = #tpu.core_type<tc>, window_params = [{transform_indices = @transform_0, window_bounds = array<i64: 32, 2048>}, {pipeline_mode = #tpu.pipeline_mode<synchronous>, transform_indices = @transform_1, window_bounds = array<i64: 2048, 128>}, {pipeline_mode = #tpu.pipeline_mode<synchronous>, transform_indices = @transform_2, window_bounds = array<i64: 1, 128>}, {pipeline_mode = #tpu.pipeline_mode<synchronous>, transform_indices = @transform_3, window_bounds = array<i64: 1, 128>}, {transform_indices = @transform_4, window_bounds = array<i64: 32, 128>}]} {
    %c0 = arith.constant 0 : index
    %c0_0 = arith.constant 0 : index
    %0 = vector.load %arg1[%c0, %c0_0] : memref<32x2048xbf16, #tpu.memory_space<vmem>>, vector<32x2048xbf16>
    %c0_1 = arith.constant 0 : index
    %c0_2 = arith.constant 0 : index
    %1 = vector.load %arg2[%c0_1, %c0_2] : memref<2048x128xbf16, #tpu.memory_space<vmem>>, vector<2048x128xbf16>
    %cst = arith.constant dense<0.000000e+00> : vector<32x128xf32>
    %2 = tpu.matmul %0, %1, %cst {dimension_numbers = #tpu.dot_dimension_numbers<[1], [0], [0], [1], [0, 0, 1, 1], [], []>} : vector<32x2048xbf16>, vector<2048x128xbf16>, vector<32x128xf32> -> vector<32x128xf32>
    %c0_3 = arith.constant 0 : index
    %c0_4 = arith.constant 0 : index
    %3 = vector.load %arg3[%c0_3, %c0_4] : memref<1x128xf32, #tpu.memory_space<vmem>>, vector<1x128xf32>
    %c0_5 = arith.constant 0 : index
    %c0_6 = arith.constant 0 : index
    %4 = vector.load %arg4[%c0_5, %c0_6] : memref<1x128xf32, #tpu.memory_space<vmem>>, vector<1x128xf32>
    %5 = vector.broadcast %3 : vector<1x128xf32> to vector<32x128xf32>
    %6 = arith.mulf %5, %2 : vector<32x128xf32>
    %7 = vector.broadcast %4 : vector<1x128xf32> to vector<32x128xf32>
    %8 = arith.addf %6, %7 : vector<32x128xf32>
    %cst_7 = arith.constant 0.000000e+00 : f32
    %9 = vector.broadcast %cst_7 : f32 to vector<32x128xf32>
    %10 = arith.cmpf oge, %8, %9 : vector<32x128xf32>
    %cst_8 = arith.constant 2.000000e-01 : f32
    %11 = vector.broadcast %cst_8 : f32 to vector<32x128xf32>
    %12 = arith.mulf %11, %8 : vector<32x128xf32>
    %13 = arith.select %10, %8, %12 : vector<32x128xi1>, vector<32x128xf32>
    %14 = arith.truncf %13 : vector<32x128xf32> to vector<32x128xbf16>
    %c0_9 = arith.constant 0 : index
    %c0_10 = arith.constant 0 : index
    %15 = vector.load %arg5[%c0_9, %c0_10] : memref<32x128xbf16, #tpu.memory_space<vmem>>, vector<32x128xbf16>
    tpu.vector_store %arg5[%c0_9, %c0_10], %14 {strides = array<i32>} : memref<32x128xbf16, #tpu.memory_space<vmem>>, vector<32x128xbf16>,
    return
  }
  func.func @transform_0(%arg0: i32) -> (i32, i32) {
    %c0_i32 = arith.constant 0 : i32
    %c0_i32_0 = arith.constant 0 : i32
    return %arg0, %c0_i32 : i32, i32
  }
  func.func @transform_1(%arg0: i32) -> (i32, i32) {
    %c0_i32 = arith.constant 0 : i32
    %c0_i32_0 = arith.constant 0 : i32
    %c0_i32_1 = arith.constant 0 : i32
    return %c0_i32, %c0_i32_0 : i32, i32
  }
  func.func @transform_2(%arg0: i32) -> (i32, i32) {
    %c0_i32 = arith.constant 0 : i32
    %c0_i32_0 = arith.constant 0 : i32
    %c0_i32_1 = arith.constant 0 : i32
    return %c0_i32, %c0_i32_0 : i32, i32
  }
  func.func @transform_3(%arg0: i32) -> (i32, i32) {
    %c0_i32 = arith.constant 0 : i32
    %c0_i32_0 = arith.constant 0 : i32
    %c0_i32_1 = arith.constant 0 : i32
    return %c0_i32, %c0_i32_0 : i32, i32
  }
  func.func @transform_4(%arg0: i32) -> (i32, i32) {
    %c0_i32 = arith.constant 0 : i32
    %c0_i32_0 = arith.constant 0 : i32
    return %arg0, %c0_i32 : i32, i32
  }
}

module attributes {stable_mosaic.version = 11 : i64} {
  func.func @_fused_matmul_kernel(%arg0: i32, %arg1: memref<16x2048xbf16, #tpu.memory_space<vmem>>, %arg2: memref<2048x128xbf16, #tpu.memory_space<vmem>>, %arg3: memref<1x128xf32, #tpu.memory_space<vmem>>, %arg4: memref<1x128xf32, #tpu.memory_space<vmem>>, %arg5: memref<16x128xf32, #tpu.memory_space<vmem>>) attributes {dimension_semantics = [#tpu.dimension_semantics<parallel>], iteration_bounds = array<i64: 1>, scalar_prefetch = 0 : i64, scratch_operands = 0 : i64, tpu.core_type = #tpu.core_type<tc>, window_params = [{transform_indices = @transform_0, window_bounds = array<i64: 16, 2048>}, {pipeline_mode = #tpu.pipeline_mode<synchronous>, transform_indices = @transform_1, window_bounds = array<i64: 2048, 128>}, {pipeline_mode = #tpu.pipeline_mode<synchronous>, transform_indices = @transform_2, window_bounds = array<i64: 1, 128>}, {pipeline_mode = #tpu.pipeline_mode<synchronous>, transform_indices = @transform_3, window_bounds = array<i64: 1, 128>}, {transform_indices = @transform_4, window_bounds = array<i64: 16, 128>}]} {
    %c0 = arith.constant 0 : index
    %c0_0 = arith.constant 0 : index
    %0 = vector.load %arg1[%c0, %c0_0] : memref<16x2048xbf16, #tpu.memory_space<vmem>>, vector<16x2048xbf16>
    %c0_1 = arith.constant 0 : index
    %c0_2 = arith.constant 0 : index
    %1 = vector.load %arg2[%c0_1, %c0_2] : memref<2048x128xbf16, #tpu.memory_space<vmem>>, vector<2048x128xbf16>
    %cst = arith.constant dense<0.000000e+00> : vector<16x128xf32>
    %2 = tpu.matmul %0, %1, %cst {dimension_numbers = #tpu.dot_dimension_numbers<[1], [0], [0], [1], [0, 0, 1, 1], [], []>} : vector<16x2048xbf16>, vector<2048x128xbf16>, vector<16x128xf32> -> vector<16x128xf32>
    %cst_3 = arith.constant 5.000000e-01 : f32
    %3 = vector.broadcast %cst_3 : f32 to vector<16x128xf32>
    %4 = arith.mulf %3, %2 : vector<16x128xf32>
    %5 = math.tanh %4 : vector<16x128xf32>
    %cst_4 = arith.constant 1.000000e+00 : f32
    %6 = vector.broadcast %cst_4 : f32 to vector<16x128xf32>
    %7 = arith.addf %5, %6 : vector<16x128xf32>
    %cst_5 = arith.constant 5.000000e-01 : f32
    %8 = vector.broadcast %cst_5 : f32 to vector<16x128xf32>
    %9 = arith.mulf %8, %7 : vector<16x128xf32>
    %c0_6 = arith.constant 0 : index
    %c0_7 = arith.constant 0 : index
    %10 = vector.load %arg5[%c0_6, %c0_7] : memref<16x128xf32, #tpu.memory_space<vmem>>, vector<16x128xf32>
    tpu.vector_store %arg5[%c0_6, %c0_7], %9 {strides = array<i32>} : memref<16x128xf32, #tpu.memory_space<vmem>>, vector<16x128xf32>,
    return
  }
  func.func @transform_0(%arg0: i32) -> (i32, i32) {
    %c0_i32 = arith.constant 0 : i32
    %c0_i32_0 = arith.constant 0 : i32
    return %arg0, %c0_i32 : i32, i32
  }
  func.func @transform_1(%arg0: i32) -> (i32, i32) {
    %c0_i32 = arith.constant 0 : i32
    %c0_i32_0 = arith.constant 0 : i32
    %c0_i32_1 = arith.constant 0 : i32
    return %c0_i32, %c0_i32_0 : i32, i32
  }
  func.func @transform_2(%arg0: i32) -> (i32, i32) {
    %c0_i32 = arith.constant 0 : i32
    %c0_i32_0 = arith.constant 0 : i32
    %c0_i32_1 = arith.constant 0 : i32
    return %c0_i32, %c0_i32_0 : i32, i32
  }
  func.func @transform_3(%arg0: i32) -> (i32, i32) {
    %c0_i32 = arith.constant 0 : i32
    %c0_i32_0 = arith.constant 0 : i32
    %c0_i32_1 = arith.constant 0 : i32
    return %c0_i32, %c0_i32_0 : i32, i32
  }
  func.func @transform_4(%arg0: i32) -> (i32, i32) {
    %c0_i32 = arith.constant 0 : i32
    %c0_i32_0 = arith.constant 0 : i32
    return %arg0, %c0_i32 : i32, i32
  }
}

</mosaic_0001>

<bundles_post_ra>
// kernel: _lambda_.5
= control target key start
LH: loop header
LB: loop body
LE: loop exit
PB: predicated region body
PF: predicated region fallthrough
CT: control target
= control target key end

     0   :  { %s1214_s15 = smov 0   ;;  %s1301_s0 = inlined_call_operand.vmem [shape: bf16[512,128], index: 0, kind: input, shape index: {}]   ;;  %s1302_s1 = inlined_call_operand.vmem [shape: bf16[128,128], index: 1, kind: input, shape index: {}]   ;;  %s1303_s2 = inlined_call_operand.vmem [shape: f32[1,128], index: 2, kind: input, shape index: {}]   ;;  %s1304_s3 = inlined_call_operand.vmem [shape: f32[1,128], index: 3, kind: input, shape index: {}]   ;;  %s1305_s4 = inlined_call_operand.vmem [shape: bf16[512,128], index: 4, kind: output, shape index: {}]  }
   0x1 LB: > { %s867_s16 = sadd.s32 4294967295, %s1187_s15   ;;  %p871_p0 = scmp.ge.s32.totalorder %s1187_s15, 1  ;;  %s1187_s15 = sphi %s1214_s15, %s14_s15  }
   0x2   : > { %p163_p1 = scmp.lt.s32.totalorder %s1187_s15, 3 }
   0x4   : > { %p164_p2 = pnand %p871_p0, %p163_p1 }
   0x5   : > { %v1157_v0 = vld [vmem:[%s1302_s1] sm:$0xff] (!%p164_p2)   ;;  %s872_s17 = sshll.u32 (!%p164_p2), %s867_s16, 5  ;;  %v1158_v1 = vld [vmem:[%s1302_s1 + $0x8] sm:$0xff] (!%p164_p2)   ;;  %v1159_v2 = vld [vmem:[%s1302_s1 + $0x10] sm:$0xff] (!%p164_p2)  }
   0x6   : > { %167 = sbr.rel (%p164_p2) target bundleno = 285 (0x11d), region = 36  ;;  %p190_p3 = scmp.lt.s32.totalorder (!%p164_p2), %s872_s17, 63  ;;  %1085 = vmatprep.subr.bf16.mxu0 (!%p164_p2), %v1157_v0  ;;  %1133 = vmatprep.subr.bf16.mxu1 (!%p164_p2), %v1157_v0  ;;  %v1160_v3 = vld [vmem:[%s1302_s1 + $0x18] sm:$0xff] (!%p164_p2)   ;;  %v1161_v6 = vld [vmem:[%s1302_s1 + $0x20] sm:$0xff] (!%p164_p2)   ;;  %v1162_v7 = vld [vmem:[%s1302_s1 + $0x28] sm:$0xff] (!%p164_p2)  }
   0x7   : > { %1086 = vmatpush3.bf16.msra.mxu0 (!%p164_p2), %v1157_v0  ;;  %1141 = vmatpush3.bf16.msra.mxu1 (!%p164_p2), %v1157_v0  ;;  %v1163_v8 = vld [vmem:[%s1302_s1 + $0x30] sm:$0xff] (!%p164_p2)   ;;  %v1164_v9 = vld [vmem:[%s1302_s1 + $0x38] sm:$0xff] (!%p164_p2)  }
   0x8   : > { %1087 = vmatprep.subr.bf16.mxu0 (!%p164_p2), %v1158_v1  ;;  %1134 = vmatprep.subr.bf16.mxu1 (!%p164_p2), %v1158_v1 }
   0xb   : > { %1088 = vmatpush3.bf16.msra.mxu0 (!%p164_p2), %v1158_v1  ;;  %1142 = vmatpush3.bf16.msra.mxu1 (!%p164_p2), %v1158_v1 }
   0xc   : > { %1089 = vmatprep.subr.bf16.mxu0 (!%p164_p2), %v1159_v2  ;;  %1135 = vmatprep.subr.bf16.mxu1 (!%p164_p2), %v1159_v2 }
   0xd   : > { %s1307_s17 = smov (!%p190_p3, %s872_s17), 63 }
   0xe   : > { %s873_s22 = sshll.u32 %s1307_s17, 2 }
   0xf   : > { %s1239_s25 = scalar_lea.vmem %s1301_s0, %s873_s22  ;;  %1090 = vmatpush3.bf16.msra.mxu0 %v1159_v2  ;;  %1143 = vmatpush3.bf16.msra.mxu1 %v1159_v2  ;;  %s1277_s12 = scalar_lea.vmem %s1305_s4, %s873_s22 }
  0x10   : > { %v1165_v4 = vld [vmem:[%s1239_s25] sm:$0xff]   ;;  %1091 = vmatprep.subr.bf16.mxu0 %v1160_v3  ;;  %1136 = vmatprep.subr.bf16.mxu1 %v1160_v3  ;;  %v1167_v10 = vld [vmem:[%s1239_s25 + $0x8] sm:$0xff]   ;;  %v1169_v12 = vld [vmem:[%s1239_s25 + $0x10] sm:$0xff]  }
  0x11   : > { %v1166_v5 = vld [vmem:[%s1239_s25 + $0x40] sm:$0xff]   ;;  %1101 = vmatprep.mubr.bf16.mxu0 %v1165_v4  ;;  %v1168_v11 = vld [vmem:[%s1239_s25 + $0x48] sm:$0xff]   ;;  %v1170_v13 = vld [vmem:[%s1239_s25 + $0x50] sm:$0xff]  }
  0x12   : > { %1117 = vmatprep.mubr.bf16.mxu1 %v1166_v5  ;;  %v1171_v14 = vld [vmem:[%s1239_s25 + $0x18] sm:$0xff]   ;;  %v1173_v16 = vld [vmem:[%s1239_s25 + $0x20] sm:$0xff]   ;;  %v1175_v18 = vld [vmem:[%s1239_s25 + $0x28] sm:$0xff]  }
  0x13   : > { %1092 = vmatpush3.bf16.msra.mxu0 %v1160_v3  ;;  %1144 = vmatpush3.bf16.msra.mxu1 %v1160_v3  ;;  %v1172_v15 = vld [vmem:[%s1239_s25 + $0x58] sm:$0xff]   ;;  %v1174_v17 = vld [vmem:[%s1239_s25 + $0x60] sm:$0xff]   ;;  %v1176_v19 = vld [vmem:[%s1239_s25 + $0x68] sm:$0xff]  }
  0x14   : > { %1093 = vmatprep.subr.bf16.mxu0 %v1161_v6  ;;  %1137 = vmatprep.subr.bf16.mxu1 %v1161_v6  ;;  %v1177_v20 = vld [vmem:[%s1239_s25 + $0x30] sm:$0xff]   ;;  %v1179_v22 = vld [vmem:[%s1239_s25 + $0x38] sm:$0xff]  }
  0x15   : > { %v1178_v21 = vld [vmem:[%s1239_s25 + $0x70] sm:$0xff]   ;;  %v1180_v23 = vld [vmem:[%s1239_s25 + $0x78] sm:$0xff]  }
  0x17   : > { %1094 = vmatpush3.bf16.msra.mxu0 %v1161_v6  ;;  %1145 = vmatpush3.bf16.msra.mxu1 %v1161_v6 }
  0x18   : > { %1095 = vmatprep.subr.bf16.mxu0 %v1162_v7  ;;  %1138 = vmatprep.subr.bf16.mxu1 %v1162_v7 }
  0x1b   : > { %1096 = vmatpush3.bf16.msra.mxu0 %v1162_v7  ;;  %1146 = vmatpush3.bf16.msra.mxu1 %v1162_v7 }
  0x1c   : > { %1097 = vmatprep.subr.bf16.mxu0 %v1163_v8  ;;  %1139 = vmatprep.subr.bf16.mxu1 %v1163_v8 }
  0x1f   : > { %1098 = vmatpush3.bf16.msra.mxu0 %v1163_v8  ;;  %1147 = vmatpush3.bf16.msra.mxu1 %v1163_v8 }
  0x20   : > { %1099 = vmatprep.subr.bf16.mxu0 %v1164_v9  ;;  %1140 = vmatprep.subr.bf16.mxu1 %v1164_v9 }
  0x23   : > { %1100 = vmatpush3.bf16.msra.mxu0 %v1164_v9  ;;  %1148 = vmatpush3.bf16.msra.mxu1 %v1164_v9 }
  0x26   : > { %1102 = vmatmul.mubr.bf16.vlgmr.msra.gmra.mrb[0].mxu0 %v1167_v10  ;;  %1118 = vmatmul.mubr.bf16.vlgmr.msra.gmra.mrb[0].mxu1 %v1168_v11 }
  0x27   : > { %1105 = vmatprep.mubr.bf16.mxu0 %v1169_v12  ;;  %1121 = vmatprep.mubr.bf16.mxu1 %v1170_v13 }
  0x2e   : > { %1106 = vmatmul.mubr.bf16.gmra.mrb[4].mxu0 %v1171_v14  ;;  %1122 = vmatmul.mubr.bf16.gmra.mrb[4].mxu1 %v1172_v15 }
  0x2f   : > { %1109 = vmatprep.mubr.bf16.mxu0 %v1173_v16  ;;  %1125 = vmatprep.mubr.bf16.mxu1 %v1174_v17 }
  0x36   : > { %1110 = vmatmul.mubr.bf16.gmra.mrb[8].mxu0 %v1175_v18  ;;  %1126 = vmatmul.mubr.bf16.gmra.mrb[8].mxu1 %v1176_v19 }
  0x37   : > { %1113 = vmatprep.mubr.bf16.mxu0 %v1177_v20  ;;  %1129 = vmatprep.mubr.bf16.mxu1 %v1178_v21 }
  0x3e   : > { %1114 = vmatmul.mubr.bf16.gmra.mrb[12].mxu0 %v1179_v22  ;;  %1130 = vmatmul.mubr.bf16.gmra.mrb[12].mxu1 %v1180_v23 }
  0xf9   : > { %v1103_v24 = vpop.f32.mrb[0].mxu0  ;;  %v1119_v25 = vpop.f32.mrb[0].mxu1 }
  0xfa   : > { %vm557_vm0 = vcmp.ge.f32.partialorder %v1103_v24, 0.0  ;;  %v589_v26 = vmul.f32 0.2, %v1103_v24  ;;  %v605_v27 = vmul.f32 0.2, %v1119_v25  ;;  %vm573_vm1 = vcmp.ge.f32.partialorder %v1119_v25, 0.0 }
  0xfb   : > { %v428_v28 = vpop.f32.mrb[1].mxu0  ;;  %v492_v29 = vpop.f32.mrb[1].mxu1 }
  0xfc   : > { %v587_v30 = vmul.f32 0.2, %v428_v28  ;;  %v1104_v31 = vpop.f32.mrb[2].mxu0  ;;  %v1120_v32 = vpop.f32.mrb[2].mxu1  ;;  %v621_v33 = vsel %vm557_vm0, %v1103_v24, %v589_v26  ;;  %v603_v34 = vmul.f32 0.2, %v492_v29  ;;  %v637_v36 = vsel %vm573_vm1, %v1119_v25, %v605_v27 }
  0xfd   : > { %vm558_vm2 = vcmp.ge.f32.partialorder %v1104_v31, 0.0  ;;  %v590_v35 = vmul.f32 0.2, %v1104_v31  ;;  %vm555_vm3 = vcmp.ge.f32.partialorder %v428_v28, 0.0  ;;  %vm574_vm4 = vcmp.ge.f32.partialorder %v1120_v32, 0.0  ;;  %v431_v38 = vpop.f32.mrb[3].mxu0 }
  0xfe   : > { %v606_v37 = vmul.f32 0.2, %v1120_v32  ;;  %v495_v39 = vpop.f32.mrb[3].mxu1  ;;  %vm571_vm5 = vcmp.ge.f32.partialorder %v492_v29, 0.0  ;;  %vm556_vm6 = vcmp.ge.f32.partialorder %v431_v38, 0.0  ;;  %v619_v45 = vsel %vm555_vm3, %v428_v28, %v587_v30 }
  0xff   : > { %v622_v40 = vsel %vm558_vm2, %v1104_v31, %v590_v35  ;;  %v588_v41 = vmul.f32 0.2, %v431_v38  ;;  %vm572_vm7 = vcmp.ge.f32.partialorder %v495_v39, 0.0  ;;  %v604_v44 = vmul.f32 0.2, %v495_v39 }
 0x100   : > { %v974_v42 = vpack.c.bf16 %v622_v40, %v621_v33  ;;  %v638_v43 = vsel %vm574_vm4, %v1120_v32, %v606_v37  ;;  %v635_v50 = vsel %vm571_vm5, %v492_v29, %v603_v34 }
 0x101   : > { %v1014_v46 = vpack.c.bf16 %v638_v43, %v637_v36  ;;  %v620_v47 = vsel %vm556_vm6, %v431_v38, %v588_v41  ;;  %v1107_v48 = vpop.f32.mrb[4].mxu0  ;;  %v1123_v49 = vpop.f32.mrb[4].mxu1  ;;  %v636_v52 = vsel %vm572_vm7, %v495_v39, %v604_v44 }
 0x102   : > { %1046 = vst [vmem:[%s1277_s12 + $0x8] sm:$0xff] %v974_v42   ;;  %v969_v51 = vpack.c.bf16 %v620_v47, %v619_v45  ;;  %v593_v53 = vmul.f32 0.2, %v1107_v48  ;;  %v444_v54 = vpop.f32.mrb[5].mxu0  ;;  %v508_v55 = vpop.f32.mrb[5].mxu1  ;;  %v1009_v56 = vpack.c.bf16 %v636_v52, %v635_v50  ;;  %vm561_vm8 = vcmp.ge.f32.partialorder %v1107_v48, 0.0 }
 0x103   : > { %1054 = vst [vmem:[%s1277_s12 + $0x48] sm:$0xff] %v1014_v46   ;;  %v609_v57 = vmul.f32 0.2, %v1123_v49  ;;  %v1108_v58 = vpop.f32.mrb[6].mxu0  ;;  %v1124_v59 = vpop.f32.mrb[6].mxu1  ;;  %vm577_vm9 = vcmp.ge.f32.partialorder %v1123_v49, 0.0 }
 0x104   : > { %970 = vst [vmem:[%s1277_s12] sm:$0xff] %v969_v51   ;;  %v591_v60 = vmul.f32 0.2, %v444_v54  ;;  %v607_v61 = vmul.f32 0.2, %v508_v55  ;;  %v447_v62 = vpop.f32.mrb[7].mxu0  ;;  %1053 = vst [vmem:[%s1277_s12 + $0x40] sm:$0xff] %v1009_v56   ;;  %v625_v1 = vsel %vm561_vm8, %v1107_v48, %v593_v53 }
 0x105   : > { %vm559_vm10 = vcmp.ge.f32.partialorder %v444_v54, 0.0  ;;  %vm562_vm11 = vcmp.ge.f32.partialorder %v1108_v58, 0.0  ;;  %v594_v63 = vmul.f32 0.2, %v1108_v58  ;;  %vm578_vm12 = vcmp.ge.f32.partialorder %v1124_v59, 0.0  ;;  %v511_v0 = vpop.f32.mrb[7].mxu1 }
 0x106   : > { %vm575_vm13 = vcmp.ge.f32.partialorder %v508_v55, 0.0  ;;  %v610_v2 = vmul.f32 0.2, %v1124_v59  ;;  %vm560_vm14 = vcmp.ge.f32.partialorder %v447_v62, 0.0  ;;  %v592_v4 = vmul.f32 0.2, %v447_v62 }
 0x107   : > { %v626_v3 = vsel %vm562_vm11, %v1108_v58, %v594_v63  ;;  %vm576_vm15 = vcmp.ge.f32.partialorder %v511_v0, 0.0  ;;  %v608_v5 = vmul.f32 0.2, %v511_v0  ;;  %v641_v6 = vsel %vm577_vm9, %v1123_v49, %v609_v57 }
 0x108   : > { %v623_v7 = vsel %vm559_vm10, %v444_v54, %v591_v60  ;;  %v984_v8 = vpack.c.bf16 %v626_v3, %v625_v1  ;;  %v642_v9 = vsel %vm578_vm12, %v1124_v59, %v610_v2  ;;  %v639_v10 = vsel %vm575_vm13, %v508_v55, %v607_v61 }
 0x109   : > { %v1024_v11 = vpack.c.bf16 %v642_v9, %v641_v6  ;;  %v624_v12 = vsel %vm560_vm14, %v447_v62, %v592_v4  ;;  %v640_v13 = vsel %vm576_vm15, %v511_v0, %v608_v5  ;;  %v1111_v14 = vpop.f32.mrb[8].mxu0  ;;  %v1127_v15 = vpop.f32.mrb[8].mxu1 }
 0x10a   : > { %1048 = vst [vmem:[%s1277_s12 + $0x18] sm:$0xff] %v984_v8   ;;  %v979_v16 = vpack.c.bf16 %v624_v12, %v623_v7  ;;  %v1019_v17 = vpack.c.bf16 %v640_v13, %v639_v10  ;;  %vm565_vm0 = vcmp.ge.f32.partialorder %v1111_v14, 0.0  ;;  %v597_v18 = vmul.f32 0.2, %v1111_v14  ;;  %v460_v19 = vpop.f32.mrb[9].mxu0  ;;  %v524_v20 = vpop.f32.mrb[9].mxu1 }
 0x10b   : > { %1056 = vst [vmem:[%s1277_s12 + $0x58] sm:$0xff] %v1024_v11   ;;  %vm581_vm1 = vcmp.ge.f32.partialorder %v1127_v15, 0.0  ;;  %v613_v21 = vmul.f32 0.2, %v1127_v15  ;;  %v595_v22 = vmul.f32 0.2, %v460_v19 }
 0x10c   : > { %1047 = vst [vmem:[%s1277_s12 + $0x10] sm:$0xff] %v979_v16   ;;  %1055 = vst [vmem:[%s1277_s12 + $0x50] sm:$0xff] %v1019_v17   ;;  %v611_v23 = vmul.f32 0.2, %v524_v20  ;;  %v1112_v24 = vpop.f32.mrb[10].mxu0  ;;  %v1128_v25 = vpop.f32.mrb[10].mxu1  ;;  %v629_v26 = vsel %vm565_vm0, %v1111_v14, %v597_v18 }
 0x10d   : > { %vm563_vm2 = vcmp.ge.f32.partialorder %v460_v19, 0.0  ;;  %vm566_vm3 = vcmp.ge.f32.partialorder %v1112_v24, 0.0  ;;  %v598_v27 = vmul.f32 0.2, %v1112_v24  ;;  %v463_v28 = vpop.f32.mrb[11].mxu0  ;;  %v527_v29 = vpop.f32.mrb[11].mxu1  ;;  %v645_v34 = vsel %vm581_vm1, %v1127_v15, %v613_v21 }
 0x10e   : > { %vm579_vm4 = vcmp.ge.f32.partialorder %v524_v20, 0.0  ;;  %vm582_vm5 = vcmp.ge.f32.partialorder %v1128_v25, 0.0  ;;  %v614_v30 = vmul.f32 0.2, %v1128_v25  ;;  %vm564_vm6 = vcmp.ge.f32.partialorder %v463_v28, 0.0 }
 0x10f   : > { %v630_v31 = vsel %vm566_vm3, %v1112_v24, %v598_v27  ;;  %v596_v32 = vmul.f32 0.2, %v463_v28  ;;  %vm580_vm7 = vcmp.ge.f32.partialorder %v527_v29, 0.0  ;;  %v612_v33 = vmul.f32 0.2, %v527_v29 }
 0x110   : > { %v627_v35 = vsel %vm563_vm2, %v460_v19, %v595_v22  ;;  %v994_v36 = vpack.c.bf16 %v630_v31, %v629_v26  ;;  %v646_v37 = vsel %vm582_vm5, %v1128_v25, %v614_v30  ;;  %v643_v38 = vsel %vm579_vm4, %v524_v20, %v611_v23 }
 0x111   : > { %v1034_v39 = vpack.c.bf16 %v646_v37, %v645_v34  ;;  %v628_v40 = vsel %vm564_vm6, %v463_v28, %v596_v32  ;;  %v644_v41 = vsel %vm580_vm7, %v527_v29, %v612_v33  ;;  %v1115_v42 = vpop.f32.mrb[12].mxu0  ;;  %v1131_v43 = vpop.f32.mrb[12].mxu1 }
 0x112   : > { %1050 = vst [vmem:[%s1277_s12 + $0x28] sm:$0xff] %v994_v36   ;;  %v989_v44 = vpack.c.bf16 %v628_v40, %v627_v35  ;;  %v1029_v45 = vpack.c.bf16 %v644_v41, %v643_v38  ;;  %vm569_vm8 = vcmp.ge.f32.partialorder %v1115_v42, 0.0  ;;  %v601_v46 = vmul.f32 0.2, %v1115_v42  ;;  %v476_v47 = vpop.f32.mrb[13].mxu0  ;;  %v540_v48 = vpop.f32.mrb[13].mxu1 }
 0x113   : > { %1058 = vst [vmem:[%s1277_s12 + $0x68] sm:$0xff] %v1034_v39   ;;  %vm585_vm9 = vcmp.ge.f32.partialorder %v1131_v43, 0.0  ;;  %v617_v49 = vmul.f32 0.2, %v1131_v43  ;;  %v599_v50 = vmul.f32 0.2, %v476_v47 }
 0x114   : > { %1049 = vst [vmem:[%s1277_s12 + $0x20] sm:$0xff] %v989_v44   ;;  %1057 = vst [vmem:[%s1277_s12 + $0x60] sm:$0xff] %v1029_v45   ;;  %v615_v51 = vmul.f32 0.2, %v540_v48  ;;  %v1116_v52 = vpop.f32.mrb[14].mxu0  ;;  %v1132_v53 = vpop.f32.mrb[14].mxu1  ;;  %v633_v54 = vsel %vm569_vm8, %v1115_v42, %v601_v46 }
 0x115   : > { %vm567_vm10 = vcmp.ge.f32.partialorder %v476_v47, 0.0  ;;  %vm570_vm11 = vcmp.ge.f32.partialorder %v1116_v52, 0.0  ;;  %v602_v55 = vmul.f32 0.2, %v1116_v52  ;;  %v479_v56 = vpop.f32.mrb[15].mxu0  ;;  %v543_v57 = vpop.f32.mrb[15].mxu1  ;;  %v649_v62 = vsel %vm585_vm9, %v1131_v43, %v617_v49 }
 0x116   : > { %vm583_vm12 = vcmp.ge.f32.partialorder %v540_v48, 0.0  ;;  %vm586_vm13 = vcmp.ge.f32.partialorder %v1132_v53, 0.0  ;;  %v618_v58 = vmul.f32 0.2, %v1132_v53  ;;  %vm568_vm14 = vcmp.ge.f32.partialorder %v479_v56, 0.0 }
 0x117   : > { %v634_v59 = vsel %vm570_vm11, %v1116_v52, %v602_v55  ;;  %v600_v60 = vmul.f32 0.2, %v479_v56  ;;  %vm584_vm15 = vcmp.ge.f32.partialorder %v543_v57, 0.0  ;;  %v616_v61 = vmul.f32 0.2, %v543_v57 }
 0x118   : > { %v631_v63 = vsel %vm567_vm10, %v476_v47, %v599_v50  ;;  %v1004_v0 = vpack.c.bf16 %v634_v59, %v633_v54  ;;  %v650_v1 = vsel %vm586_vm13, %v1132_v53, %v618_v58  ;;  %v647_v2 = vsel %vm583_vm12, %v540_v48, %v615_v51 }
 0x119   : > { %v1044_v3 = vpack.c.bf16 %v650_v1, %v649_v62  ;;  %v632_v4 = vsel %vm568_vm14, %v479_v56, %v600_v60  ;;  %v648_v5 = vsel %vm584_vm15, %v543_v57, %v616_v61 }
 0x11a   : > { %1052 = vst [vmem:[%s1277_s12 + $0x38] sm:$0xff] %v1004_v0   ;;  %v999_v6 = vpack.c.bf16 %v632_v4, %v631_v63  ;;  %v1039_v7 = vpack.c.bf16 %v648_v5, %v647_v2 }
 0x11b   : > { %1060 = vst [vmem:[%s1277_s12 + $0x78] sm:$0xff] %v1044_v3  }
 0x11c   : > { %1051 = vst [vmem:[%s1277_s12 + $0x30] sm:$0xff] %v999_v6   ;;  %1059 = vst [vmem:[%s1277_s12 + $0x70] sm:$0xff] %v1039_v7  }
 0x11d PF: > { %s14_s15 = sadd.s32 1, %s1187_s15  }
 0x11e   : > { %p11_p4 = scmp.ge.s32.totalorder %s14_s15, 4  }
 0x120   :  { %13 = sbr.rel (!%p11_p4) target bundleno = 1 (0x1), region = 66 }

// kernel: _lambda_.6
= control target key start
LH: loop header
LB: loop body
LE: loop exit
PB: predicated region body
PF: predicated region fallthrough
CT: control target
= control target key end

     0   :  { %s4792_s1 = inlined_call_operand.vmem [shape: bf16[2048,128], index: 1, kind: input, shape index: {}]   ;;  %s4793_s0 = inlined_call_operand.vmem [shape: bf16[128,2048], index: 0, kind: input, shape index: {}]   ;;  %s4794_s2 = inlined_call_operand.vmem [shape: f32[1,128], index: 2, kind: input, shape index: {}]   ;;  %s4795_s3 = inlined_call_operand.vmem [shape: f32[1,128], index: 3, kind: input, shape index: {}]   ;;  %s4796_s4 = inlined_call_operand.vmem [shape: bf16[128,128], index: 4, kind: output, shape index: {}]  }
   0x1   :  { %v3661_v0 = vld [vmem:[%s4792_s1 + $0x40] sm:$0xff]   ;;  %v3665_v4 = vld [vmem:[%s4792_s1 + $0x48] sm:$0xff]   ;;  %v3669_v8 = vld [vmem:[%s4792_s1 + $0x50] sm:$0xff]  }
   0x2   :  { %v3662_v1 = vld [vmem:[%s4792_s1 + $0xc0] sm:$0xff]   ;;  %3149 = vmatprep.subr.bf16.mxu0 %v3661_v0  ;;  %v3666_v5 = vld [vmem:[%s4792_s1 + $0xc8] sm:$0xff]   ;;  %v3670_v9 = vld [vmem:[%s4792_s1 + $0xd0] sm:$0xff]  }
   0x3   :  { %v3663_v2 = vld [vmem:[%s4792_s1] sm:$0xff]   ;;  %3213 = vmatprep.subr.bf16.mxu1 %v3662_v1  ;;  %v3667_v6 = vld [vmem:[%s4792_s1 + $0x8] sm:$0xff]   ;;  %v3671_v10 = vld [vmem:[%s4792_s1 + $0x10] sm:$0xff]  }
   0x4   :  { %v3664_v3 = vld [vmem:[%s4792_s1 + $0x80] sm:$0xff]   ;;  %3150 = vmatpush3.bf16.msra.mxu0 %v3663_v2  ;;  %v3668_v7 = vld [vmem:[%s4792_s1 + $0x88] sm:$0xff]   ;;  %v3672_v11 = vld [vmem:[%s4792_s1 + $0x90] sm:$0xff]  }
   0x5   :  { %3214 = vmatpush3.bf16.msra.mxu1 %v3664_v3  ;;  %3151 = vmatprep.subr.bf16.mxu0 %v3665_v4  ;;  %v3673_v12 = vld [vmem:[%s4792_s1 + $0x58] sm:$0xff]   ;;  %v3677_v16 = vld [vmem:[%s4792_s1 + $0x60] sm:$0xff]   ;;  %v3681_v20 = vld [vmem:[%s4792_s1 + $0x68] sm:$0xff]  }
   0x6   :  { %3215 = vmatprep.subr.bf16.mxu1 %v3666_v5  ;;  %v3674_v13 = vld [vmem:[%s4792_s1 + $0xd8] sm:$0xff]   ;;  %v3678_v17 = vld [vmem:[%s4792_s1 + $0xe0] sm:$0xff]   ;;  %v3682_v21 = vld [vmem:[%s4792_s1 + $0xe8] sm:$0xff]  }
   0x7   :  { %v3675_v14 = vld [vmem:[%s4792_s1 + $0x18] sm:$0xff]   ;;  %v3679_v18 = vld [vmem:[%s4792_s1 + $0x20] sm:$0xff]   ;;  %v3683_v22 = vld [vmem:[%s4792_s1 + $0x28] sm:$0xff]  }
   0x8   :  { %3152 = vmatpush3.bf16.msra.mxu0 %v3667_v6  ;;  %v3676_v15 = vld [vmem:[%s4792_s1 + $0x98] sm:$0xff]   ;;  %v3680_v19 = vld [vmem:[%s4792_s1 + $0xa0] sm:$0xff]   ;;  %v3684_v23 = vld [vmem:[%s4792_s1 + $0xa8] sm:$0xff]  }
   0x9   :  { %3216 = vmatpush3.bf16.msra.mxu1 %v3668_v7  ;;  %3153 = vmatprep.subr.bf16.mxu0 %v3669_v8  ;;  %v3685_v24 = vld [vmem:[%s4792_s1 + $0x70] sm:$0xff]   ;;  %v3689_v28 = vld [vmem:[%s4792_s1 + $0x78] sm:$0xff]   ;;  %v18_v32 = vld [vmem:[%s4793_s0] sm:$0xff] }
   0xa   :  { %3217 = vmatprep.subr.bf16.mxu1 %v3670_v9  ;;  %v3686_v25 = vld [vmem:[%s4792_s1 + $0xf0] sm:$0xff]   ;;  %v3690_v29 = vld [vmem:[%s4792_s1 + $0xf8] sm:$0xff]   ;;  %v26_v33 = vld [vmem:[%s4793_s0 + $0x40] sm:$0xff] }
   0xb   :  { %v3687_v26 = vld [vmem:[%s4792_s1 + $0x30] sm:$0xff]   ;;  %v3691_v30 = vld [vmem:[%s4792_s1 + $0x38] sm:$0xff]   ;;  %v19_v34 = vld [vmem:[%s4793_s0 + $0x8] sm:$0xff]  ;;  %v2812_v35 = vcombine.low %v18_v32, %v26_v33  ;;  %v2813_v36 = vcombine.high %v18_v32, %v26_v33 }
   0xc   :  { %3154 = vmatpush3.bf16.msra.mxu0 %v3671_v10  ;;  %v3688_v27 = vld [vmem:[%s4792_s1 + $0xb0] sm:$0xff]   ;;  %v3692_v31 = vld [vmem:[%s4792_s1 + $0xb8] sm:$0xff]   ;;  %v27_v37 = vld [vmem:[%s4793_s0 + $0x48] sm:$0xff] }
   0xd   :  { %3218 = vmatpush3.bf16.msra.mxu1 %v3672_v11  ;;  %3155 = vmatprep.subr.bf16.mxu0 %v3673_v12  ;;  %v2814_v38 = vcombine.low %v19_v34, %v27_v37  ;;  %v2815_v39 = vcombine.high %v19_v34, %v27_v37  ;;  %v3693_v40 = vld [vmem:[%s4792_s1 + $0x140] sm:$0xff]   ;;  %v35_v47 = vld [vmem:[%s4793_s0 + $0x88] sm:$0xff]  ;;  %v3701_v62 = vld [vmem:[%s4792_s1 + $0x150] sm:$0xff]  }
   0xe   :  { %3219 = vmatprep.subr.bf16.mxu1 %v3674_v13  ;;  %1842 = vmatprep.mubr.bf16.mxu0 %v2813_v36  ;;  %v3694_v41 = vld [vmem:[%s4792_s1 + $0x100] sm:$0xff]   ;;  %v43_v48 = vld [vmem:[%s4793_s0 + $0xc8] sm:$0xff]  ;;  %v3702_v63 = vld [vmem:[%s4792_s1 + $0x110] sm:$0xff]  }
   0xf   :  { %1939 = vmatprep.mubr.bf16.mxu1 %v2815_v39  ;;  %v3695_v42 = vld [vmem:[%s4792_s1 + $0x1c0] sm:$0xff]   ;;  %v2831_v49 = vcombine.high %v35_v47, %v43_v48  ;;  %v3697_v50 = vld [vmem:[%s4792_s1 + $0x148] sm:$0xff]   ;;  %v2830_v53 = vcombine.low %v35_v47, %v43_v48  ;;  %v3703_v0 = vld [vmem:[%s4792_s1 + $0x1d0] sm:$0xff]  }
  0x10   :  { %3156 = vmatpush3.bf16.msra.mxu0 %v3675_v14  ;;  %v3696_v43 = vld [vmem:[%s4792_s1 + $0x180] sm:$0xff]   ;;  %v3698_v52 = vld [vmem:[%s4792_s1 + $0x108] sm:$0xff]   ;;  %v3704_v1 = vld [vmem:[%s4792_s1 + $0x190] sm:$0xff]  }
  0x11   :  { %3220 = vmatpush3.bf16.msra.mxu1 %v3676_v15  ;;  %3157 = vmatprep.subr.bf16.mxu0 %v3677_v16  ;;  %v34_v44 = vld [vmem:[%s4793_s0 + $0x80] sm:$0xff]  ;;  %v3699_v54 = vld [vmem:[%s4792_s1 + $0x1c8] sm:$0xff]   ;;  %v3705_v10 = vld [vmem:[%s4792_s1 + $0x158] sm:$0xff]  }
  0x12   :  { %3221 = vmatprep.subr.bf16.mxu1 %v3678_v17  ;;  %v42_v45 = vld [vmem:[%s4793_s0 + $0xc0] sm:$0xff]  ;;  %v3700_v55 = vld [vmem:[%s4792_s1 + $0x188] sm:$0xff]   ;;  %v3706_v11 = vld [vmem:[%s4792_s1 + $0x118] sm:$0xff]  }
  0x13   :  { %v2829_v46 = vcombine.high %v34_v44, %v42_v45  ;;  %v2828_v51 = vcombine.low %v34_v44, %v42_v45  ;;  %v50_v56 = vld [vmem:[%s4793_s0 + $0x100] sm:$0xff]  ;;  %v51_v58 = vld [vmem:[%s4793_s0 + $0x108] sm:$0xff]  ;;  %v3707_v12 = vld [vmem:[%s4792_s1 + $0x1d8] sm:$0xff]  }
  0x14   :  { %3158 = vmatpush3.bf16.msra.mxu0 %v3679_v18  ;;  %v58_v57 = vld [vmem:[%s4793_s0 + $0x140] sm:$0xff]  ;;  %v59_v59 = vld [vmem:[%s4793_s0 + $0x148] sm:$0xff]  ;;  %v3708_v13 = vld [vmem:[%s4792_s1 + $0x198] sm:$0xff]  }
  0x15   :  { %3222 = vmatpush3.bf16.msra.mxu1 %v3680_v19  ;;  %3159 = vmatprep.subr.bf16.mxu0 %v3681_v20  ;;  %v2845_v60 = vcombine.high %v50_v56, %v58_v57  ;;  %v2847_v61 = vcombine.high %v51_v58, %v59_v59  ;;  %v2844_v2 = vcombine.low %v50_v56, %v58_v57  ;;  %v66_v3 = vld [vmem:[%s4793_s0 + $0x180] sm:$0xff]  ;;  %v67_v5 = vld [vmem:[%s4793_s0 + $0x188] sm:$0xff]  ;;  %v3718_v39 = vld [vmem:[%s4792_s1 + $0x130] sm:$0xff]  }
  0x16   :  { %3223 = vmatprep.subr.bf16.mxu1 %v3682_v21  ;;  %v74_v4 = vld [vmem:[%s4793_s0 + $0x1c0] sm:$0xff]  ;;  %v2846_v6 = vcombine.low %v51_v58, %v59_v59  ;;  %v75_v8 = vld [vmem:[%s4793_s0 + $0x1c8] sm:$0xff]  ;;  %v3722_v48 = vld [vmem:[%s4792_s1 + $0x138] sm:$0xff]  }
  0x17   :  { %v2861_v7 = vcombine.high %v66_v3, %v74_v4  ;;  %v2863_v9 = vcombine.high %v67_v5, %v75_v8  ;;  %v82_v14 = vld [vmem:[%s4793_s0 + $0x200] sm:$0xff]  ;;  %v83_v16 = vld [vmem:[%s4793_s0 + $0x208] sm:$0xff]  ;;  %v2860_v19 = vcombine.low %v66_v3, %v74_v4  ;;  %v2862_v21 = vcombine.low %v67_v5, %v75_v8  ;;  %v29_v3 = vld [vmem:[%s4793_s0 + $0x58] sm:$0xff] }
  0x18   :  { %3160 = vmatpush3.bf16.msra.mxu0 %v3683_v22  ;;  %v90_v15 = vld [vmem:[%s4793_s0 + $0x240] sm:$0xff]  ;;  %v91_v17 = vld [vmem:[%s4793_s0 + $0x248] sm:$0xff]  ;;  %v36_v8 = vld [vmem:[%s4793_s0 + $0x90] sm:$0xff] }
  0x19   :  { %3224 = vmatpush3.bf16.msra.mxu1 %v3684_v23  ;;  %3161 = vmatprep.subr.bf16.mxu0 %v3685_v24  ;;  %v3709_v18 = vld [vmem:[%s4792_s1 + $0x160] sm:$0xff]   ;;  %v2877_v22 = vcombine.high %v82_v14, %v90_v15  ;;  %v2879_v24 = vcombine.high %v83_v16, %v91_v17  ;;  %v3715_v32 = vld [vmem:[%s4792_s1 + $0x1e8] sm:$0xff]   ;;  %v2876_v34 = vcombine.low %v82_v14, %v90_v15 }
  0x1a   :  { %3225 = vmatprep.subr.bf16.mxu1 %v3686_v25  ;;  %v3710_v20 = vld [vmem:[%s4792_s1 + $0x120] sm:$0xff]   ;;  %v3716_v33 = vld [vmem:[%s4792_s1 + $0x1a8] sm:$0xff]  }
  0x1b   :  { %v3711_v23 = vld [vmem:[%s4792_s1 + $0x1e0] sm:$0xff]   ;;  %v115_v44 = vld [vmem:[%s4793_s0 + $0x308] sm:$0xff] }
  0x1c   :  { %3162 = vmatpush3.bf16.msra.mxu0 %v3687_v26  ;;  %v3712_v25 = vld [vmem:[%s4792_s1 + $0x1a0] sm:$0xff]   ;;  %v123_v45 = vld [vmem:[%s4793_s0 + $0x348] sm:$0xff] }
  0x1d   :  { %3226 = vmatpush3.bf16.msra.mxu1 %v3688_v27  ;;  %3163 = vmatprep.subr.bf16.mxu0 %v3689_v28  ;;  %v98_v26 = vld [vmem:[%s4793_s0 + $0x280] sm:$0xff]  ;;  %v3713_v28 = vld [vmem:[%s4792_s1 + $0x168] sm:$0xff]  }
  0x1e   :  { %3227 = vmatprep.subr.bf16.mxu1 %v3690_v29  ;;  %v106_v27 = vld [vmem:[%s4793_s0 + $0x2c0] sm:$0xff]  ;;  %v99_v29 = vld [vmem:[%s4793_s0 + $0x288] sm:$0xff] }
  0x1f   :  { %v2893_v36 = vcombine.high %v98_v26, %v106_v27  ;;  %v2892_v47 = vcombine.low %v98_v26, %v106_v27  ;;  %v3725_v56 = vld [vmem:[%s4792_s1 + $0x240] sm:$0xff]   ;;  %v131_v57 = vld [vmem:[%s4793_s0 + $0x388] sm:$0xff]  ;;  %v3733_v26 = vld [vmem:[%s4792_s1 + $0x250] sm:$0xff]  }
  0x20   :  { %3164 = vmatpush3.bf16.msra.mxu0 %v3691_v30  ;;  %v107_v30 = vld [vmem:[%s4793_s0 + $0x2c8] sm:$0xff]  ;;  %v3727_v58 = vld [vmem:[%s4792_s1 + $0x2c0] sm:$0xff]   ;;  %v3735_v27 = vld [vmem:[%s4792_s1 + $0x2d0] sm:$0xff]  }
  0x21   :  { %3228 = vmatpush3.bf16.msra.mxu1 %v3692_v31  ;;  %3277 = vmatprep.subr.bf16.mxu0 %v3693_v40  ;;  %v3714_v31 = vld [vmem:[%s4792_s1 + $0x128] sm:$0xff]   ;;  %v2895_v37 = vcombine.high %v99_v29, %v107_v30  ;;  %v3719_v40 = vld [vmem:[%s4792_s1 + $0x1f0] sm:$0xff]   ;;  %v3728_v15 = vld [vmem:[%s4792_s1 + $0x280] sm:$0xff]  }
  0x22   :  { %3341 = vmatprep.subr.bf16.mxu1 %v3695_v42  ;;  %v122_v42 = vld [vmem:[%s4793_s0 + $0x340] sm:$0xff]  ;;  %v139_v59 = vld [vmem:[%s4793_s0 + $0x3c8] sm:$0xff] }
  0x23   :  { %1843 = vmatmul.mubr.bf16.vlgmr.msra.gmra.mrb[0].mxu0 %v2812_v35  ;;  %v2878_v35 = vcombine.low %v83_v16, %v91_v17  ;;  %v2926_v5 = vcombine.low %v131_v57, %v139_v59  ;;  %v3729_v17 = vld [vmem:[%s4792_s1 + $0x248] sm:$0xff]  }
  0x24   :  { %1940 = vmatmul.mubr.bf16.vlgmr.msra.gmra.mrb[0].mxu1 %v2814_v38  ;;  %3278 = vmatpush3.bf16.msra.mxu0 %v3694_v41  ;;  %v3717_v38 = vld [vmem:[%s4792_s1 + $0x170] sm:$0xff]   ;;  %v114_v41 = vld [vmem:[%s4793_s0 + $0x300] sm:$0xff] }
  0x25   :  { %3342 = vmatpush3.bf16.msra.mxu1 %v3696_v43  ;;  %1850 = vmatprep.mubr.bf16.mxu0 %v2829_v46  ;;  %v3720_v43 = vld [vmem:[%s4792_s1 + $0x1b0] sm:$0xff]   ;;  %v3721_v46 = vld [vmem:[%s4792_s1 + $0x178] sm:$0xff]  }
  0x26   :  { %1947 = vmatprep.mubr.bf16.mxu1 %v2831_v49  ;;  %3279 = vmatprep.subr.bf16.mxu0 %v3697_v50  ;;  %v2894_v49 = vcombine.low %v99_v29, %v107_v30  ;;  %v2909_v50 = vcombine.high %v114_v41, %v122_v42 }
  0x27   :  { %3343 = vmatprep.subr.bf16.mxu1 %v3699_v54  ;;  %v130_v54 = vld [vmem:[%s4793_s0 + $0x380] sm:$0xff] }
  0x28   :  { %3280 = vmatpush3.bf16.msra.mxu0 %v3698_v52  ;;  %v2911_v52 = vcombine.high %v115_v44, %v123_v45 }
  0x29   :  { %3344 = vmatpush3.bf16.msra.mxu1 %v3700_v55  ;;  %3281 = vmatprep.subr.bf16.mxu0 %v3701_v62  ;;  %v138_v55 = vld [vmem:[%s4793_s0 + $0x3c0] sm:$0xff] }
  0x2a   :  { %3345 = vmatprep.subr.bf16.mxu1 %v3703_v0  ;;  %v2925_v62 = vcombine.high %v130_v54, %v138_v55  ;;  %v20_v0 = vld [vmem:[%s4793_s0 + $0x10] sm:$0xff]  ;;  %v2924_v4 = vcombine.low %v130_v54, %v138_v55  ;;  %v85_v54 = vld [vmem:[%s4793_s0 + $0x218] sm:$0xff] }
  0x2b   :  { %1851 = vmatmul.mubr.bf16.gmra.mrb[4].mxu0 %v2828_v51  ;;  %v3723_v51 = vld [vmem:[%s4792_s1 + $0x1f8] sm:$0xff]  }
  0x2c   :  { %1948 = vmatmul.mubr.bf16.gmra.mrb[4].mxu1 %v2830_v53  ;;  %1858 = vmatprep.mubr.bf16.mxu0 %v2845_v60  ;;  %v3724_v53 = vld [vmem:[%s4792_s1 + $0x1b8] sm:$0xff]   ;;  %v2908_v60 = vcombine.low %v114_v41, %v122_v42  ;;  %v3741_v42 = vld [vmem:[%s4792_s1 + $0x260] sm:$0xff]  }
  0x2d   :  { %1955 = vmatprep.mubr.bf16.mxu1 %v2847_v61  ;;  %3282 = vmatpush3.bf16.msra.mxu0 %v3702_v63  ;;  %v2910_v61 = vcombine.low %v115_v44, %v123_v45  ;;  %v2927_v63 = vcombine.high %v131_v57, %v139_v59  ;;  %v3740_v41 = vld [vmem:[%s4792_s1 + $0x298] sm:$0xff]   ;;  %v3743_v44 = vld [vmem:[%s4792_s1 + $0x2e0] sm:$0xff]   ;;  %v3748_v57 = vld [vmem:[%s4792_s1 + $0x2a8] sm:$0xff]  }
  0x2e   :  { %3346 = vmatpush3.bf16.msra.mxu1 %v3704_v1  ;;  %3283 = vmatprep.subr.bf16.mxu0 %v3705_v10  ;;  %v28_v1 = vld [vmem:[%s4793_s0 + $0x50] sm:$0xff]  ;;  %v93_v55 = vld [vmem:[%s4793_s0 + $0x258] sm:$0xff] }
  0x2f   :  { %3347 = vmatprep.subr.bf16.mxu1 %v3707_v12  ;;  %v2816_v10 = vcombine.low %v20_v0, %v28_v1  ;;  %v37_v12 = vld [vmem:[%s4793_s0 + $0x98] sm:$0xff] }
  0x31   :  { %3284 = vmatpush3.bf16.msra.mxu0 %v3706_v11  ;;  %v3726_v11 = vld [vmem:[%s4792_s1 + $0x200] sm:$0xff]  }
  0x32   :  { %3348 = vmatpush3.bf16.msra.mxu1 %v3708_v13  ;;  %3285 = vmatprep.subr.bf16.mxu0 %v3709_v18  ;;  %v45_v13 = vld [vmem:[%s4793_s0 + $0xd8] sm:$0xff] }
  0x33   :  { %1859 = vmatmul.mubr.bf16.gmra.mrb[8].mxu0 %v2844_v2  ;;  %3349 = vmatprep.subr.bf16.mxu1 %v3711_v23  ;;  %v21_v2 = vld [vmem:[%s4793_s0 + $0x18] sm:$0xff]  ;;  %v2835_v18 = vcombine.high %v37_v12, %v45_v13  ;;  %v60_v23 = vld [vmem:[%s4793_s0 + $0x150] sm:$0xff]  ;;  %v2834_v29 = vcombine.low %v37_v12, %v45_v13  ;;  %v3759_v12 = vld [vmem:[%s4792_s1 + $0x3c0] sm:$0xff]   ;;  %v2882_v13 = vcombine.low %v85_v54, %v93_v55 }
  0x34   :  { %1956 = vmatmul.mubr.bf16.gmra.mrb[8].mxu1 %v2846_v6  ;;  %1866 = vmatprep.mubr.bf16.mxu0 %v2861_v7  ;;  %v2817_v6 = vcombine.high %v20_v0, %v28_v1  ;;  %v2819_v7 = vcombine.high %v21_v2, %v29_v3  ;;  %v2818_v14 = vcombine.low %v21_v2, %v29_v3  ;;  %v3750_v0 = vld [vmem:[%s4792_s1 + $0x230] sm:$0xff]   ;;  %v3753_v2 = vld [vmem:[%s4792_s1 + $0x278] sm:$0xff]  }
  0x35   :  { %1963 = vmatprep.mubr.bf16.mxu1 %v2863_v9  ;;  %3286 = vmatpush3.bf16.msra.mxu0 %v3710_v20  ;;  %v44_v9 = vld [vmem:[%s4793_s0 + $0xd0] sm:$0xff]  ;;  %v3731_v20 = vld [vmem:[%s4792_s1 + $0x2c8] sm:$0xff]  }
  0x36   :  { %3350 = vmatpush3.bf16.msra.mxu1 %v3712_v25  ;;  %3287 = vmatprep.subr.bf16.mxu0 %v3713_v28  ;;  %v2833_v16 = vcombine.high %v36_v8, %v44_v9  ;;  %v61_v25 = vld [vmem:[%s4793_s0 + $0x158] sm:$0xff]  ;;  %v2832_v28 = vcombine.low %v36_v8, %v44_v9  ;;  %v3752_v1 = vld [vmem:[%s4792_s1 + $0x2b0] sm:$0xff]  }
  0x37   :  { %3351 = vmatprep.subr.bf16.mxu1 %v3715_v32  ;;  %v3734_v32 = vld [vmem:[%s4792_s1 + $0x210] sm:$0xff]   ;;  %v3754_v8 = vld [vmem:[%s4792_s1 + $0x238] sm:$0xff]  }
  0x38   :  { %v100_v3 = vld [vmem:[%s4793_s0 + $0x290] sm:$0xff]  ;;  %v3756_v9 = vld [vmem:[%s4792_s1 + $0x2b8] sm:$0xff]  }
  0x39   :  { %3288 = vmatpush3.bf16.msra.mxu0 %v3714_v31 }
  0x3a   :  { %3352 = vmatpush3.bf16.msra.mxu1 %v3716_v33  ;;  %3289 = vmatprep.subr.bf16.mxu0 %v3717_v38  ;;  %v3736_v33 = vld [vmem:[%s4792_s1 + $0x290] sm:$0xff]   ;;  %v69_v38 = vld [vmem:[%s4793_s0 + $0x198] sm:$0xff] }
  0x3b   :  { %1867 = vmatmul.mubr.bf16.gmra.mrb[12].mxu0 %v2860_v19  ;;  %3353 = vmatprep.subr.bf16.mxu1 %v3719_v40  ;;  %v3730_v19 = vld [vmem:[%s4792_s1 + $0x208] sm:$0xff]   ;;  %v3738_v40 = vld [vmem:[%s4792_s1 + $0x218] sm:$0xff]  }
  0x3c   :  { %1964 = vmatmul.mubr.bf16.gmra.mrb[12].mxu1 %v2862_v21  ;;  %1874 = vmatprep.mubr.bf16.mxu0 %v2877_v22  ;;  %v3732_v21 = vld [vmem:[%s4792_s1 + $0x288] sm:$0xff]   ;;  %v52_v22 = vld [vmem:[%s4793_s0 + $0x110] sm:$0xff] }
  0x3d   :  { %1971 = vmatprep.mubr.bf16.mxu1 %v2879_v24  ;;  %3290 = vmatpush3.bf16.msra.mxu0 %v3718_v39  ;;  %v53_v24 = vld [vmem:[%s4793_s0 + $0x118] sm:$0xff]  ;;  %v2849_v30 = vcombine.high %v52_v22, %v60_v23 }
  0x3e   :  { %3354 = vmatpush3.bf16.msra.mxu1 %v3720_v43  ;;  %3291 = vmatprep.subr.bf16.mxu0 %v3721_v46  ;;  %v2851_v31 = vcombine.high %v53_v24, %v61_v25  ;;  %v77_v39 = vld [vmem:[%s4793_s0 + $0x1d8] sm:$0xff]  ;;  %v2848_v43 = vcombine.low %v52_v22, %v60_v23  ;;  %v2850_v45 = vcombine.low %v53_v24, %v61_v25  ;;  %v132_v24 = vld [vmem:[%s4793_s0 + $0x390] sm:$0xff] }
  0x3f   :  { %3355 = vmatprep.subr.bf16.mxu1 %v3723_v51  ;;  %v84_v51 = vld [vmem:[%s4793_s0 + $0x210] sm:$0xff] }
  0x40   :  { %v140_v25 = vld [vmem:[%s4793_s0 + $0x3d0] sm:$0xff] }
  0x41   :  { %3292 = vmatpush3.bf16.msra.mxu0 %v3722_v48  ;;  %v2867_v48 = vcombine.high %v69_v38, %v77_v39 }
  0x42   :  { %3356 = vmatpush3.bf16.msra.mxu1 %v3724_v53  ;;  %3405 = vmatprep.subr.bf16.mxu0 %v3725_v56  ;;  %v92_v53 = vld [vmem:[%s4793_s0 + $0x250] sm:$0xff]  ;;  %v3746_v56 = vld [vmem:[%s4792_s1 + $0x228] sm:$0xff]  }
  0x43   :  { %1875 = vmatmul.mubr.bf16.gmra.mrb[16].mxu0 %v2876_v34  ;;  %3469 = vmatprep.subr.bf16.mxu1 %v3727_v58  ;;  %v3737_v34 = vld [vmem:[%s4792_s1 + $0x258] sm:$0xff]   ;;  %v3749_v58 = vld [vmem:[%s4792_s1 + $0x270] sm:$0xff]  }
  0x44   :  { %1972 = vmatmul.mubr.bf16.gmra.mrb[16].mxu1 %v2878_v35  ;;  %1882 = vmatprep.mubr.bf16.mxu0 %v2893_v36  ;;  %v68_v35 = vld [vmem:[%s4793_s0 + $0x190] sm:$0xff] }
  0x45   :  { %1979 = vmatprep.mubr.bf16.mxu1 %v2895_v37  ;;  %v76_v36 = vld [vmem:[%s4793_s0 + $0x1d0] sm:$0xff]  ;;  %v3739_v37 = vld [vmem:[%s4792_s1 + $0x2d8] sm:$0xff]  }
  0x46   :  { %v2865_v46 = vcombine.high %v68_v35, %v76_v36  ;;  %v2864_v59 = vcombine.low %v68_v35, %v76_v36  ;;  %v31_v35 = vld [vmem:[%s4793_s0 + $0x68] sm:$0xff]  ;;  %v2928_v36 = vcombine.low %v132_v24, %v140_v25 }
  0x4b   :  { %1883 = vmatmul.mubr.bf16.gmra.mrb[20].mxu0 %v2892_v47  ;;  %v3742_v47 = vld [vmem:[%s4792_s1 + $0x220] sm:$0xff]  }
  0x4c   :  { %1980 = vmatmul.mubr.bf16.gmra.mrb[20].mxu1 %v2894_v49  ;;  %1890 = vmatprep.mubr.bf16.mxu0 %v2909_v50  ;;  %v3744_v49 = vld [vmem:[%s4792_s1 + $0x2a0] sm:$0xff]   ;;  %v3745_v50 = vld [vmem:[%s4792_s1 + $0x268] sm:$0xff]  }
  0x4d   :  { %1987 = vmatprep.mubr.bf16.mxu1 %v2911_v52  ;;  %v3747_v52 = vld [vmem:[%s4792_s1 + $0x2e8] sm:$0xff]  }
  0x53   :  { %1891 = vmatmul.mubr.bf16.gmra.mrb[24].mxu0 %v2908_v60  ;;  %v3751_v60 = vld [vmem:[%s4792_s1 + $0x2f0] sm:$0xff]  }
  0x54   :  { %1988 = vmatmul.mubr.bf16.gmra.mrb[24].mxu1 %v2910_v61  ;;  %1898 = vmatprep.mubr.bf16.mxu0 %v2925_v62  ;;  %v2866_v61 = vcombine.low %v69_v38, %v77_v39  ;;  %v2881_v62 = vcombine.high %v84_v51, %v92_v53 }
  0x55   :  { %1995 = vmatprep.mubr.bf16.mxu1 %v2927_v63  ;;  %v2883_v63 = vcombine.high %v85_v54, %v93_v55  ;;  %v54_v54 = vld [vmem:[%s4793_s0 + $0x120] sm:$0xff] }
  0x56   :  { %v62_v55 = vld [vmem:[%s4793_s0 + $0x160] sm:$0xff] }
  0x5b   :  { %1899 = vmatmul.mubr.bf16.gmra.mrb[28].mxu0 %v2924_v4  ;;  %v108_v4 = vld [vmem:[%s4793_s0 + $0x2d0] sm:$0xff] }
  0x5c   :  { %1996 = vmatmul.mubr.bf16.gmra.mrb[28].mxu1 %v2926_v5  ;;  %2036 = vmatprep.mubr.bf16.mxu0 %v2817_v6  ;;  %v3755_v5 = vld [vmem:[%s4792_s1 + $0x2f8] sm:$0xff]  }
  0x5d   :  { %2133 = vmatprep.mubr.bf16.mxu1 %v2819_v7  ;;  %v101_v6 = vld [vmem:[%s4793_s0 + $0x298] sm:$0xff] }
  0x5e   :  { %v109_v7 = vld [vmem:[%s4793_s0 + $0x2d8] sm:$0xff] }
  0x63   :  { %2037 = vmatmul.mubr.bf16.vlgmr.msra.gmra.mrb[32].mxu0 %v2816_v10  ;;  %v3757_v10 = vld [vmem:[%s4792_s1 + $0x340] sm:$0xff]  }
  0x64   :  { %2134 = vmatmul.mubr.bf16.vlgmr.msra.gmra.mrb[32].mxu1 %v2818_v14  ;;  %3406 = vmatpush3.bf16.msra.mxu0 %v3726_v11  ;;  %v2880_v11 = vcombine.low %v84_v51, %v92_v53  ;;  %v2897_v14 = vcombine.high %v100_v3, %v108_v4  ;;  %v3763_v51 = vld [vmem:[%s4792_s1 + $0x3c8] sm:$0xff]  }
  0x65   :  { %3470 = vmatpush3.bf16.msra.mxu1 %v3728_v15  ;;  %2044 = vmatprep.mubr.bf16.mxu0 %v2833_v16  ;;  %v2899_v15 = vcombine.high %v101_v6, %v109_v7  ;;  %v116_v16 = vld [vmem:[%s4793_s0 + $0x310] sm:$0xff]  ;;  %v3764_v53 = vld [vmem:[%s4792_s1 + $0x388] sm:$0xff]  }
  0x66   :  { %2141 = vmatprep.mubr.bf16.mxu1 %v2835_v18  ;;  %3407 = vmatprep.subr.bf16.mxu0 %v3729_v17  ;;  %v124_v17 = vld [vmem:[%s4793_s0 + $0x350] sm:$0xff]  ;;  %v117_v18 = vld [vmem:[%s4793_s0 + $0x318] sm:$0xff] }
  0x67   :  { %3471 = vmatprep.subr.bf16.mxu1 %v3731_v20  ;;  %v2896_v20 = vcombine.low %v100_v3, %v108_v4  ;;  %v2913_v22 = vcombine.high %v116_v16, %v124_v17  ;;  %v3771_v3 = vld [vmem:[%s4792_s1 + $0x3d8] sm:$0xff]   ;;  %v70_v4 = vld [vmem:[%s4793_s0 + $0x1a0] sm:$0xff] }
  0x68   :  { %3408 = vmatpush3.bf16.msra.mxu0 %v3730_v19  ;;  %v125_v19 = vld [vmem:[%s4793_s0 + $0x358] sm:$0xff] }
  0x69   :  { %3472 = vmatpush3.bf16.msra.mxu1 %v3732_v21  ;;  %3409 = vmatprep.subr.bf16.mxu0 %v3733_v26  ;;  %v2898_v21 = vcombine.low %v101_v6, %v109_v7  ;;  %v2915_v23 = vcombine.high %v117_v18, %v125_v19  ;;  %v133_v26 = vld [vmem:[%s4793_s0 + $0x398] sm:$0xff]  ;;  %v71_v6 = vld [vmem:[%s4793_s0 + $0x1a8] sm:$0xff] }
  0x6a   :  { %3473 = vmatprep.subr.bf16.mxu1 %v3735_v27  ;;  %v141_v27 = vld [vmem:[%s4793_s0 + $0x3d8] sm:$0xff] }
  0x6b   :  { %2045 = vmatmul.mubr.bf16.gmra.mrb[36].mxu0 %v2832_v28  ;;  %v2912_v28 = vcombine.low %v116_v16, %v124_v17  ;;  %v3770_v7 = vld [vmem:[%s4792_s1 + $0x318] sm:$0xff]   ;;  %v3774_v16 = vld [vmem:[%s4792_s1 + $0x320] sm:$0xff]  }
  0x6c   :  { %2142 = vmatmul.mubr.bf16.gmra.mrb[36].mxu1 %v2834_v29  ;;  %2052 = vmatprep.mubr.bf16.mxu0 %v2849_v30  ;;  %v2914_v29 = vcombine.low %v117_v18, %v125_v19  ;;  %v2929_v30 = vcombine.high %v132_v24, %v140_v25  ;;  %v3776_v17 = vld [vmem:[%s4792_s1 + $0x3a0] sm:$0xff]   ;;  %v3777_v18 = vld [vmem:[%s4792_s1 + $0x368] sm:$0xff]  }
  0x6d   :  { %2149 = vmatprep.mubr.bf16.mxu1 %v2851_v31  ;;  %3410 = vmatpush3.bf16.msra.mxu0 %v3734_v32  ;;  %v2931_v31 = vcombine.high %v133_v26, %v141_v27  ;;  %v22_v32 = vld [vmem:[%s4793_s0 + $0x20] sm:$0xff]  ;;  %v3779_v19 = vld [vmem:[%s4792_s1 + $0x3e8] sm:$0xff]  }
  0x6e   :  { %3474 = vmatpush3.bf16.msra.mxu1 %v3736_v33  ;;  %3411 = vmatprep.subr.bf16.mxu0 %v3737_v34  ;;  %v30_v33 = vld [vmem:[%s4793_s0 + $0x60] sm:$0xff]  ;;  %v23_v34 = vld [vmem:[%s4793_s0 + $0x28] sm:$0xff] }
  0x6f   :  { %3475 = vmatprep.subr.bf16.mxu1 %v3739_v37  ;;  %v2930_v37 = vcombine.low %v133_v26, %v141_v27  ;;  %v2821_v38 = vcombine.high %v22_v32, %v30_v33  ;;  %v2823_v39 = vcombine.high %v23_v34, %v31_v35  ;;  %v95_v24 = vld [vmem:[%s4793_s0 + $0x268] sm:$0xff]  ;;  %v3781_v26 = vld [vmem:[%s4792_s1 + $0x370] sm:$0xff]  }
  0x70   :  { %v3780_v25 = vld [vmem:[%s4792_s1 + $0x3a8] sm:$0xff]  }
  0x71   :  { %3412 = vmatpush3.bf16.msra.mxu0 %v3738_v40  ;;  %v38_v40 = vld [vmem:[%s4793_s0 + $0xa0] sm:$0xff] }
  0x72   :  { %3476 = vmatpush3.bf16.msra.mxu1 %v3740_v41  ;;  %3413 = vmatprep.subr.bf16.mxu0 %v3741_v42  ;;  %v46_v41 = vld [vmem:[%s4793_s0 + $0xe0] sm:$0xff]  ;;  %v2820_v42 = vcombine.low %v22_v32, %v30_v33  ;;  %v3782_v32 = vld [vmem:[%s4792_s1 + $0x330] sm:$0xff]  }
  0x73   :  { %2053 = vmatmul.mubr.bf16.gmra.mrb[40].mxu0 %v2848_v43  ;;  %3477 = vmatprep.subr.bf16.mxu1 %v3743_v44  ;;  %v39_v43 = vld [vmem:[%s4793_s0 + $0xa8] sm:$0xff]  ;;  %v3784_v33 = vld [vmem:[%s4792_s1 + $0x3b0] sm:$0xff]  }
  0x74   :  { %2150 = vmatmul.mubr.bf16.gmra.mrb[40].mxu1 %v2850_v45  ;;  %2060 = vmatprep.mubr.bf16.mxu0 %v2865_v46  ;;  %v47_v44 = vld [vmem:[%s4793_s0 + $0xe8] sm:$0xff]  ;;  %v2822_v45 = vcombine.low %v23_v34, %v31_v35  ;;  %v3758_v46 = vld [vmem:[%s4792_s1 + $0x300] sm:$0xff]   ;;  %v3785_v34 = vld [vmem:[%s4792_s1 + $0x378] sm:$0xff]  }
  0x75   :  { %2157 = vmatprep.mubr.bf16.mxu1 %v2867_v48  ;;  %3414 = vmatpush3.bf16.msra.mxu0 %v3742_v47  ;;  %v3760_v47 = vld [vmem:[%s4792_s1 + $0x380] sm:$0xff]   ;;  %v2837_v48 = vcombine.high %v38_v40, %v46_v41  ;;  %v3787_v35 = vld [vmem:[%s4792_s1 + $0x3f8] sm:$0xff]  }
  0x76   :  { %3478 = vmatpush3.bf16.msra.mxu1 %v3744_v49  ;;  %3415 = vmatprep.subr.bf16.mxu0 %v3745_v50  ;;  %v2839_v49 = vcombine.high %v39_v43, %v47_v44  ;;  %v3761_v50 = vld [vmem:[%s4792_s1 + $0x348] sm:$0xff]  }
  0x77   :  { %3479 = vmatprep.subr.bf16.mxu1 %v3747_v52  ;;  %v3762_v52 = vld [vmem:[%s4792_s1 + $0x308] sm:$0xff]  }
  0x79   :  { %3416 = vmatpush3.bf16.msra.mxu0 %v3746_v56  ;;  %v3765_v56 = vld [vmem:[%s4792_s1 + $0x350] sm:$0xff]  }
  0x7a   :  { %3480 = vmatpush3.bf16.msra.mxu1 %v3748_v57  ;;  %3417 = vmatprep.subr.bf16.mxu0 %v3749_v58  ;;  %v55_v57 = vld [vmem:[%s4793_s0 + $0x128] sm:$0xff] }
  0x7b   :  { %2061 = vmatmul.mubr.bf16.gmra.mrb[44].mxu0 %v2864_v59  ;;  %3481 = vmatprep.subr.bf16.mxu1 %v3751_v60  ;;  %v63_v58 = vld [vmem:[%s4793_s0 + $0x168] sm:$0xff]  ;;  %v3767_v59 = vld [vmem:[%s4792_s1 + $0x3d0] sm:$0xff]   ;;  %v2836_v60 = vcombine.low %v38_v40, %v46_v41  ;;  %v3788_v41 = vld [vmem:[%s4792_s1 + $0x3b8] sm:$0xff]  }
  0x7c   :  { %2158 = vmatmul.mubr.bf16.gmra.mrb[44].mxu1 %v2866_v61  ;;  %2068 = vmatprep.mubr.bf16.mxu0 %v2881_v62  ;;  %v2838_v61 = vcombine.low %v39_v43, %v47_v44  ;;  %v2853_v62 = vcombine.high %v54_v54, %v62_v55  ;;  %v111_v40 = vld [vmem:[%s4793_s0 + $0x2e8] sm:$0xff] }
  0x7d   :  { %2165 = vmatprep.mubr.bf16.mxu1 %v2883_v63  ;;  %3418 = vmatpush3.bf16.msra.mxu0 %v3750_v0  ;;  %v2855_v63 = vcombine.high %v55_v57, %v63_v58  ;;  %v3766_v0 = vld [vmem:[%s4792_s1 + $0x310] sm:$0xff]  }
  0x7e   :  { %3482 = vmatpush3.bf16.msra.mxu1 %v3752_v1  ;;  %3419 = vmatprep.subr.bf16.mxu0 %v3753_v2  ;;  %v3768_v1 = vld [vmem:[%s4792_s1 + $0x390] sm:$0xff]   ;;  %v3769_v2 = vld [vmem:[%s4792_s1 + $0x358] sm:$0xff]  }
  0x7f   :  { %3483 = vmatprep.subr.bf16.mxu1 %v3755_v5  ;;  %v78_v5 = vld [vmem:[%s4793_s0 + $0x1e0] sm:$0xff] }
  0x80   :  { %v2868_v27 = vcombine.low %v70_v4, %v78_v5 }
  0x81   :  { %3420 = vmatpush3.bf16.msra.mxu0 %v3754_v8  ;;  %v79_v8 = vld [vmem:[%s4793_s0 + $0x1e8] sm:$0xff] }
  0x82   :  { %3484 = vmatpush3.bf16.msra.mxu1 %v3756_v9  ;;  %3533 = vmatprep.subr.bf16.mxu0 %v3757_v10  ;;  %v3772_v9 = vld [vmem:[%s4792_s1 + $0x398] sm:$0xff]   ;;  %v3773_v10 = vld [vmem:[%s4792_s1 + $0x360] sm:$0xff]  }
  0x83   :  { %2069 = vmatmul.mubr.bf16.gmra.mrb[48].mxu0 %v2880_v11  ;;  %3597 = vmatprep.subr.bf16.mxu1 %v3759_v12  ;;  %v2852_v11 = vcombine.low %v54_v54, %v62_v55  ;;  %v3775_v12 = vld [vmem:[%s4792_s1 + $0x3e0] sm:$0xff]  }
  0x84   :  { %2166 = vmatmul.mubr.bf16.gmra.mrb[48].mxu1 %v2882_v13  ;;  %2076 = vmatprep.mubr.bf16.mxu0 %v2897_v14  ;;  %v2854_v13 = vcombine.low %v55_v57, %v63_v58  ;;  %v2869_v14 = vcombine.high %v70_v4, %v78_v5  ;;  %v134_v54 = vld [vmem:[%s4793_s0 + $0x3a0] sm:$0xff]  ;;  %v143_v57 = vld [vmem:[%s4793_s0 + $0x3e8] sm:$0xff] }
  0x85   :  { %2173 = vmatprep.mubr.bf16.mxu1 %v2899_v15  ;;  %v2871_v15 = vcombine.high %v71_v6, %v79_v8  ;;  %v142_v55 = vld [vmem:[%s4793_s0 + $0x3e0] sm:$0xff] }
  0x8b   :  { %2077 = vmatmul.mubr.bf16.gmra.mrb[52].mxu0 %v2896_v20  ;;  %v86_v20 = vld [vmem:[%s4793_s0 + $0x220] sm:$0xff] }
  0x8c   :  { %2174 = vmatmul.mubr.bf16.gmra.mrb[52].mxu1 %v2898_v21  ;;  %2084 = vmatprep.mubr.bf16.mxu0 %v2913_v22  ;;  %v94_v21 = vld [vmem:[%s4793_s0 + $0x260] sm:$0xff]  ;;  %v87_v22 = vld [vmem:[%s4793_s0 + $0x228] sm:$0xff] }
  0x8d   :  { %2181 = vmatprep.mubr.bf16.mxu1 %v2915_v23  ;;  %v3778_v23 = vld [vmem:[%s4792_s1 + $0x328] sm:$0xff]   ;;  %v2886_v43 = vcombine.low %v87_v22, %v95_v24 }
  0x93   :  { %2085 = vmatmul.mubr.bf16.gmra.mrb[56].mxu0 %v2912_v28  ;;  %v3783_v28 = vld [vmem:[%s4792_s1 + $0x3f0] sm:$0xff]  }
  0x94   :  { %2182 = vmatmul.mubr.bf16.gmra.mrb[56].mxu1 %v2914_v29  ;;  %2092 = vmatprep.mubr.bf16.mxu0 %v2929_v30  ;;  %v2870_v29 = vcombine.low %v71_v6, %v79_v8  ;;  %v2885_v30 = vcombine.high %v86_v20, %v94_v21  ;;  %v40_v6 = vld [vmem:[%s4793_s0 + $0xb0] sm:$0xff]  ;;  %v41_v8 = vld [vmem:[%s4793_s0 + $0xb8] sm:$0xff] }
  0x95   :  { %2189 = vmatprep.mubr.bf16.mxu1 %v2931_v31  ;;  %v2887_v31 = vcombine.high %v87_v22, %v95_v24  ;;  %v72_v22 = vld [vmem:[%s4793_s0 + $0x1b0] sm:$0xff]  ;;  %v73_v24 = vld [vmem:[%s4793_s0 + $0x1b8] sm:$0xff] }
  0x9b   :  { %2093 = vmatmul.mubr.bf16.gmra.mrb[60].mxu0 %v2928_v36  ;;  %v102_v36 = vld [vmem:[%s4793_s0 + $0x2a0] sm:$0xff] }
  0x9c   :  { %2190 = vmatmul.mubr.bf16.gmra.mrb[60].mxu1 %v2930_v37  ;;  %2230 = vmatprep.mubr.bf16.mxu0 %v2821_v38  ;;  %v110_v37 = vld [vmem:[%s4793_s0 + $0x2e0] sm:$0xff]  ;;  %v3786_v38 = vld [vmem:[%s4792_s1 + $0x338] sm:$0xff]  }
  0x9d   :  { %2327 = vmatprep.mubr.bf16.mxu1 %v2823_v39  ;;  %v103_v39 = vld [vmem:[%s4793_s0 + $0x2a8] sm:$0xff]  ;;  %v2901_v44 = vcombine.high %v102_v36, %v110_v37 }
  0xa3   :  { %2231 = vmatmul.mubr.bf16.vlgmr.msra.gmra.mrb[64].mxu0 %v2820_v42  ;;  %v2884_v42 = vcombine.low %v86_v20, %v94_v21 }
  0xa4   :  { %2328 = vmatmul.mubr.bf16.vlgmr.msra.gmra.mrb[64].mxu1 %v2822_v45  ;;  %3534 = vmatpush3.bf16.msra.mxu0 %v3758_v46  ;;  %v2903_v45 = vcombine.high %v103_v39, %v111_v40  ;;  %v118_v46 = vld [vmem:[%s4793_s0 + $0x320] sm:$0xff] }
  0xa5   :  { %3598 = vmatpush3.bf16.msra.mxu1 %v3760_v47  ;;  %2238 = vmatprep.mubr.bf16.mxu0 %v2837_v48  ;;  %v126_v47 = vld [vmem:[%s4793_s0 + $0x360] sm:$0xff]  ;;  %v119_v48 = vld [vmem:[%s4793_s0 + $0x328] sm:$0xff] }
  0xa6   :  { %2335 = vmatprep.mubr.bf16.mxu1 %v2839_v49  ;;  %3535 = vmatprep.subr.bf16.mxu0 %v3761_v50  ;;  %v127_v49 = vld [vmem:[%s4793_s0 + $0x368] sm:$0xff]  ;;  %v2900_v50 = vcombine.low %v102_v36, %v110_v37  ;;  %v2916_v58 = vcombine.low %v118_v46, %v126_v47 }
  0xa7   :  { %3599 = vmatprep.subr.bf16.mxu1 %v3763_v51  ;;  %v2902_v51 = vcombine.low %v103_v39, %v111_v40 }
  0xa8   :  { %3536 = vmatpush3.bf16.msra.mxu0 %v3762_v52  ;;  %v2917_v52 = vcombine.high %v118_v46, %v126_v47 }
  0xa9   :  { %3600 = vmatpush3.bf16.msra.mxu1 %v3764_v53  ;;  %3537 = vmatprep.subr.bf16.mxu0 %v3765_v56  ;;  %v2919_v53 = vcombine.high %v119_v48, %v127_v49  ;;  %v135_v56 = vld [vmem:[%s4793_s0 + $0x3a8] sm:$0xff] }
  0xaa   :  { %3601 = vmatprep.subr.bf16.mxu1 %v3767_v59  ;;  %v2918_v59 = vcombine.low %v119_v48, %v127_v49 }
  0xab   :  { %2239 = vmatmul.mubr.bf16.gmra.mrb[68].mxu0 %v2836_v60  ;;  %v2933_v60 = vcombine.high %v134_v54, %v142_v55 }
  0xac   :  { %2336 = vmatmul.mubr.bf16.gmra.mrb[68].mxu1 %v2838_v61  ;;  %2246 = vmatprep.mubr.bf16.mxu0 %v2853_v62  ;;  %v2935_v61 = vcombine.high %v135_v56, %v143_v57  ;;  %v24_v62 = vld [vmem:[%s4793_s0 + $0x30] sm:$0xff] }
  0xad   :  { %2343 = vmatprep.mubr.bf16.mxu1 %v2855_v63  ;;  %3538 = vmatpush3.bf16.msra.mxu0 %v3766_v0  ;;  %v32_v63 = vld [vmem:[%s4793_s0 + $0x70] sm:$0xff]  ;;  %v25_v0 = vld [vmem:[%s4793_s0 + $0x38] sm:$0xff] }
  0xae   :  { %3602 = vmatpush3.bf16.msra.mxu1 %v3768_v1  ;;  %3539 = vmatprep.subr.bf16.mxu0 %v3769_v2  ;;  %v33_v1 = vld [vmem:[%s4793_s0 + $0x78] sm:$0xff]  ;;  %v2932_v2 = vcombine.low %v134_v54, %v142_v55  ;;  %v2825_v4 = vcombine.high %v24_v62, %v32_v63 }
  0xaf   :  { %3603 = vmatprep.subr.bf16.mxu1 %v3771_v3  ;;  %v2934_v3 = vcombine.low %v135_v56, %v143_v57  ;;  %v2827_v5 = vcombine.high %v25_v0, %v33_v1  ;;  %v105_v55 = vld [vmem:[%s4793_s0 + $0x2b8] sm:$0xff] }
  0xb0   :  { %v113_v56 = vld [vmem:[%s4793_s0 + $0x2f8] sm:$0xff] }
  0xb1   :  { %3540 = vmatpush3.bf16.msra.mxu0 %v3770_v7  ;;  %v48_v7 = vld [vmem:[%s4793_s0 + $0xf0] sm:$0xff] }
  0xb2   :  { %3604 = vmatpush3.bf16.msra.mxu1 %v3772_v9  ;;  %3541 = vmatprep.subr.bf16.mxu0 %v3773_v10  ;;  %v49_v9 = vld [vmem:[%s4793_s0 + $0xf8] sm:$0xff]  ;;  %v2824_v10 = vcombine.low %v24_v62, %v32_v63 }
  0xb3   :  { %2247 = vmatmul.mubr.bf16.gmra.mrb[72].mxu0 %v2852_v11  ;;  %3605 = vmatprep.subr.bf16.mxu1 %v3775_v12  ;;  %v2826_v11 = vcombine.low %v25_v0, %v33_v1  ;;  %v2841_v12 = vcombine.high %v40_v6, %v48_v7 }
  0xb4   :  { %2344 = vmatmul.mubr.bf16.gmra.mrb[72].mxu1 %v2854_v13  ;;  %2254 = vmatprep.mubr.bf16.mxu0 %v2869_v14  ;;  %v2843_v13 = vcombine.high %v41_v8, %v49_v9  ;;  %v56_v14 = vld [vmem:[%s4793_s0 + $0x130] sm:$0xff] }
  0xb5   :  { %2351 = vmatprep.mubr.bf16.mxu1 %v2871_v15  ;;  %3542 = vmatpush3.bf16.msra.mxu0 %v3774_v16  ;;  %v64_v15 = vld [vmem:[%s4793_s0 + $0x170] sm:$0xff]  ;;  %v57_v16 = vld [vmem:[%s4793_s0 + $0x138] sm:$0xff] }
  0xb6   :  { %3606 = vmatpush3.bf16.msra.mxu1 %v3776_v17  ;;  %3543 = vmatprep.subr.bf16.mxu0 %v3777_v18  ;;  %v65_v17 = vld [vmem:[%s4793_s0 + $0x178] sm:$0xff]  ;;  %v2840_v18 = vcombine.low %v40_v6, %v48_v7  ;;  %v2857_v20 = vcombine.high %v56_v14, %v64_v15 }
  0xb7   :  { %3607 = vmatprep.subr.bf16.mxu1 %v3779_v19  ;;  %v2842_v19 = vcombine.low %v41_v8, %v49_v9  ;;  %v2859_v21 = vcombine.high %v57_v16, %v65_v17 }
  0xb9   :  { %3544 = vmatpush3.bf16.msra.mxu0 %v3778_v23  ;;  %v80_v23 = vld [vmem:[%s4793_s0 + $0x1f0] sm:$0xff] }
  0xba   :  { %3608 = vmatpush3.bf16.msra.mxu1 %v3780_v25  ;;  %3545 = vmatprep.subr.bf16.mxu0 %v3781_v26  ;;  %v81_v25 = vld [vmem:[%s4793_s0 + $0x1f8] sm:$0xff]  ;;  %v2856_v26 = vcombine.low %v56_v14, %v64_v15  ;;  %v2872_v37 = vcombine.low %v72_v22, %v80_v23 }
  0xbb   :  { %2255 = vmatmul.mubr.bf16.gmra.mrb[76].mxu0 %v2868_v27  ;;  %3609 = vmatprep.subr.bf16.mxu1 %v3783_v28  ;;  %v2858_v27 = vcombine.low %v57_v16, %v65_v17  ;;  %v2873_v28 = vcombine.high %v72_v22, %v80_v23  ;;  %v129_v14 = vld [vmem:[%s4793_s0 + $0x378] sm:$0xff] }
  0xbc   :  { %2352 = vmatmul.mubr.bf16.gmra.mrb[76].mxu1 %v2870_v29  ;;  %2262 = vmatprep.mubr.bf16.mxu0 %v2885_v30  ;;  %v2875_v29 = vcombine.high %v73_v24, %v81_v25  ;;  %v88_v30 = vld [vmem:[%s4793_s0 + $0x230] sm:$0xff] }
  0xbd   :  { %2359 = vmatprep.mubr.bf16.mxu1 %v2887_v31  ;;  %3546 = vmatpush3.bf16.msra.mxu0 %v3782_v32  ;;  %v96_v31 = vld [vmem:[%s4793_s0 + $0x270] sm:$0xff] }
  0xbe   :  { %3610 = vmatpush3.bf16.msra.mxu1 %v3784_v33  ;;  %3547 = vmatprep.subr.bf16.mxu0 %v3785_v34  ;;  %v89_v33 = vld [vmem:[%s4793_s0 + $0x238] sm:$0xff] }
  0xbf   :  { %3611 = vmatprep.subr.bf16.mxu1 %v3787_v35  ;;  %v97_v34 = vld [vmem:[%s4793_s0 + $0x278] sm:$0xff] }
  0xc0   :  { %v2891_v46 = vcombine.high %v89_v33, %v97_v34  ;;  %v2890_v63 = vcombine.low %v89_v33, %v97_v34  ;;  %v144_v33 = vld [vmem:[%s4793_s0 + $0x3f0] sm:$0xff] }
  0xc1   :  { %3548 = vmatpush3.bf16.msra.mxu0 %v3786_v38 }
  0xc2   :  { %3612 = vmatpush3.bf16.msra.mxu1 %v3788_v41  ;;  %v2874_v41 = vcombine.low %v73_v24, %v81_v25 }
  0xc3   :  { %2263 = vmatmul.mubr.bf16.gmra.mrb[80].mxu0 %v2884_v42  ;;  %v2889_v42 = vcombine.high %v88_v30, %v96_v31 }
  0xc4   :  { %2360 = vmatmul.mubr.bf16.gmra.mrb[80].mxu1 %v2886_v43  ;;  %2270 = vmatprep.mubr.bf16.mxu0 %v2901_v44 }
  0xc5   :  { %2367 = vmatprep.mubr.bf16.mxu1 %v2903_v45 }
  0xcb   :  { %2271 = vmatmul.mubr.bf16.gmra.mrb[84].mxu0 %v2900_v50 }
  0xcc   :  { %2368 = vmatmul.mubr.bf16.gmra.mrb[84].mxu1 %v2902_v51  ;;  %2278 = vmatprep.mubr.bf16.mxu0 %v2917_v52  ;;  %v104_v52 = vld [vmem:[%s4793_s0 + $0x2b0] sm:$0xff] }
  0xcd   :  { %2375 = vmatprep.mubr.bf16.mxu1 %v2919_v53  ;;  %v112_v53 = vld [vmem:[%s4793_s0 + $0x2f0] sm:$0xff] }
  0xce   :  { %v2905_v0 = vcombine.high %v104_v52, %v112_v53  ;;  %v2904_v17 = vcombine.low %v104_v52, %v112_v53 }
  0xd3   :  { %2279 = vmatmul.mubr.bf16.gmra.mrb[88].mxu0 %v2916_v58 }
  0xd4   :  { %2376 = vmatmul.mubr.bf16.gmra.mrb[88].mxu1 %v2918_v59  ;;  %2286 = vmatprep.mubr.bf16.mxu0 %v2933_v60  ;;  %v2888_v59 = vcombine.low %v88_v30, %v96_v31 }
  0xd5   :  { %2383 = vmatprep.mubr.bf16.mxu1 %v2935_v61 }
  0xdb   :  { %2287 = vmatmul.mubr.bf16.gmra.mrb[92].mxu0 %v2932_v2 }
  0xdc   :  { %2384 = vmatmul.mubr.bf16.gmra.mrb[92].mxu1 %v2934_v3  ;;  %2424 = vmatprep.mubr.bf16.mxu0 %v2825_v4  ;;  %v2907_v4 = vcombine.high %v105_v55, %v113_v56 }
  0xdd   :  { %2521 = vmatprep.mubr.bf16.mxu1 %v2827_v5 }
  0xe3   :  { %2425 = vmatmul.mubr.bf16.vlgmr.msra.gmra.mrb[96].mxu0 %v2824_v10  ;;  %v120_v10 = vld [vmem:[%s4793_s0 + $0x330] sm:$0xff] }
  0xe4   :  { %2522 = vmatmul.mubr.bf16.vlgmr.msra.gmra.mrb[96].mxu1 %v2826_v11  ;;  %2432 = vmatprep.mubr.bf16.mxu0 %v2841_v12  ;;  %v128_v11 = vld [vmem:[%s4793_s0 + $0x370] sm:$0xff] }
  0xe5   :  { %2529 = vmatprep.mubr.bf16.mxu1 %v2843_v13  ;;  %v121_v13 = vld [vmem:[%s4793_s0 + $0x338] sm:$0xff]  ;;  %v2921_v22 = vcombine.high %v120_v10, %v128_v11 }
  0xeb   :  { %2433 = vmatmul.mubr.bf16.gmra.mrb[100].mxu0 %v2840_v18 }
  0xec   :  { %2530 = vmatmul.mubr.bf16.gmra.mrb[100].mxu1 %v2842_v19  ;;  %2440 = vmatprep.mubr.bf16.mxu0 %v2857_v20 }
  0xed   :  { %2537 = vmatprep.mubr.bf16.mxu1 %v2859_v21  ;;  %v2906_v21 = vcombine.low %v105_v55, %v113_v56 }
  0xf3   :  { %2441 = vmatmul.mubr.bf16.gmra.mrb[104].mxu0 %v2856_v26  ;;  %v2923_v26 = vcombine.high %v121_v13, %v129_v14 }
  0xf4   :  { %2538 = vmatmul.mubr.bf16.gmra.mrb[104].mxu1 %v2858_v27  ;;  %2448 = vmatprep.mubr.bf16.mxu0 %v2873_v28 }
  0xf5   :  { %2545 = vmatprep.mubr.bf16.mxu1 %v2875_v29 }
  0xf6   :  { %v3165_v32 = vpop.f32.mrb[0].mxu0 }
  0xf7   :  { %v3229_v35 = vpop.f32.mrb[0].mxu1  ;;  %v3166_v36 = vpop.f32.mrb[1].mxu0 }
  0xf8   :  { %v3167_v38 = vadd.f32 %v3166_v36, %v3165_v32  ;;  %v3230_v39 = vpop.f32.mrb[1].mxu1  ;;  %v3168_v40 = vpop.f32.mrb[2].mxu0  ;;  %v136_v32 = vld [vmem:[%s4793_s0 + $0x3b0] sm:$0xff]  ;;  %v145_v36 = vld [vmem:[%s4793_s0 + $0x3f8] sm:$0xff] }
  0xf9   :  { %v3231_v43 = vadd.f32 %v3230_v39, %v3229_v35  ;;  %v3232_v44 = vpop.f32.mrb[2].mxu1  ;;  %v3169_v45 = vpop.f32.mrb[3].mxu0  ;;  %v137_v35 = vld [vmem:[%s4793_s0 + $0x3b8] sm:$0xff]  ;;  %v2920_v39 = vcombine.low %v120_v10, %v128_v11 }
  0xfa   :  { %v3170_v47 = vadd.f32 %v3169_v45, %v3168_v40  ;;  %v3233_v48 = vpop.f32.mrb[3].mxu1 }
  0xfb   :  { %v4546_v49 = vadd.f32 %v3231_v43, %v3167_v38  ;;  %v3234_v50 = vadd.f32 %v3233_v48, %v3232_v44  ;;  %2449 = vmatmul.mubr.bf16.gmra.mrb[108].mxu0 %v2872_v37  ;;  %v2922_v43 = vcombine.low %v121_v13, %v129_v14  ;;  %v2937_v44 = vcombine.high %v136_v32, %v144_v33 }
  0xfc   :  { %2546 = vmatmul.mubr.bf16.gmra.mrb[108].mxu1 %v2874_v41  ;;  %2456 = vmatprep.mubr.bf16.mxu0 %v2889_v42  ;;  %v2939_v48 = vcombine.high %v137_v35, %v145_v36 }
  0xfd   :  { %v4548_v51 = vadd.f32 %v3234_v50, %v3170_v47  ;;  %2553 = vmatprep.mubr.bf16.mxu1 %v2891_v46 }
  0xfe   :  { %v3171_v54 = vpop.f32.mrb[4].mxu0 }
  0xff   :  { %v3235_v57 = vpop.f32.mrb[4].mxu1  ;;  %v3172_v58 = vpop.f32.mrb[5].mxu0 }
 0x100   :  { %v3173_v60 = vadd.f32 %v3172_v58, %v3171_v54  ;;  %v3236_v61 = vpop.f32.mrb[5].mxu1  ;;  %v3174_v62 = vpop.f32.mrb[6].mxu0 }
 0x101   :  { %v3237_v1 = vadd.f32 %v3236_v61, %v3235_v57  ;;  %v3238_v2 = vpop.f32.mrb[6].mxu1  ;;  %v3175_v3 = vpop.f32.mrb[7].mxu0 }
 0x102   :  { %v3176_v5 = vadd.f32 %v3175_v3, %v3174_v62  ;;  %v3239_v6 = vpop.f32.mrb[7].mxu1 }
 0x103   :  { %v4562_v7 = vadd.f32 %v3237_v1, %v3173_v60  ;;  %v3240_v8 = vadd.f32 %v3239_v6, %v3238_v2  ;;  %2457 = vmatmul.mubr.bf16.gmra.mrb[112].mxu0 %v2888_v59  ;;  %v2936_v59 = vcombine.low %v136_v32, %v144_v33 }
 0x104   :  { %2554 = vmatmul.mubr.bf16.gmra.mrb[112].mxu1 %v2890_v63  ;;  %2464 = vmatprep.mubr.bf16.mxu0 %v2905_v0  ;;  %v2938_v63 = vcombine.low %v137_v35, %v145_v36 }
 0x105   :  { %v4564_v9 = vadd.f32 %v3240_v8, %v3176_v5  ;;  %2561 = vmatprep.mubr.bf16.mxu1 %v2907_v4 }
 0x106   :  { %v3177_v12 = vpop.f32.mrb[8].mxu0 }
 0x107   :  { %v3241_v15 = vpop.f32.mrb[8].mxu1  ;;  %v3178_v16 = vpop.f32.mrb[9].mxu0 }
 0x108   :  { %v3179_v18 = vadd.f32 %v3178_v16, %v3177_v12  ;;  %v3242_v19 = vpop.f32.mrb[9].mxu1  ;;  %v3180_v20 = vpop.f32.mrb[10].mxu0 }
 0x109   :  { %v3243_v23 = vadd.f32 %v3242_v19, %v3241_v15  ;;  %v3244_v24 = vpop.f32.mrb[10].mxu1  ;;  %v3181_v25 = vpop.f32.mrb[11].mxu0 }
 0x10a   :  { %v3182_v27 = vadd.f32 %v3181_v25, %v3180_v20  ;;  %v3245_v28 = vpop.f32.mrb[11].mxu1 }
 0x10b   :  { %v4578_v29 = vadd.f32 %v3243_v23, %v3179_v18  ;;  %v3246_v30 = vadd.f32 %v3245_v28, %v3244_v24  ;;  %2465 = vmatmul.mubr.bf16.gmra.mrb[116].mxu0 %v2904_v17 }
 0x10c   :  { %2562 = vmatmul.mubr.bf16.gmra.mrb[116].mxu1 %v2906_v21  ;;  %2472 = vmatprep.mubr.bf16.mxu0 %v2921_v22 }
 0x10d   :  { %v4580_v31 = vadd.f32 %v3246_v30, %v3182_v27  ;;  %2569 = vmatprep.mubr.bf16.mxu1 %v2923_v26 }
 0x10e   :  { %v3183_v34 = vpop.f32.mrb[12].mxu0 }
 0x10f   :  { %v3247_v37 = vpop.f32.mrb[12].mxu1  ;;  %v3184_v38 = vpop.f32.mrb[13].mxu0 }
 0x110   :  { %v3185_v40 = vadd.f32 %v3184_v38, %v3183_v34  ;;  %v3248_v41 = vpop.f32.mrb[13].mxu1  ;;  %v3186_v42 = vpop.f32.mrb[14].mxu0 }
 0x111   :  { %v3249_v45 = vadd.f32 %v3248_v41, %v3247_v37  ;;  %v3250_v46 = vpop.f32.mrb[14].mxu1  ;;  %v3187_v47 = vpop.f32.mrb[15].mxu0 }
 0x112   :  { %v3188_v50 = vadd.f32 %v3187_v47, %v3186_v42  ;;  %v3251_v52 = vpop.f32.mrb[15].mxu1 }
 0x113   :  { %v4594_v53 = vadd.f32 %v3249_v45, %v3185_v40  ;;  %v3252_v54 = vadd.f32 %v3251_v52, %v3250_v46  ;;  %2473 = vmatmul.mubr.bf16.gmra.mrb[120].mxu0 %v2920_v39 }
 0x114   :  { %2570 = vmatmul.mubr.bf16.gmra.mrb[120].mxu1 %v2922_v43  ;;  %2480 = vmatprep.mubr.bf16.mxu0 %v2937_v44 }
 0x115   :  { %v4596_v55 = vadd.f32 %v3252_v54, %v3188_v50  ;;  %2577 = vmatprep.mubr.bf16.mxu1 %v2939_v48 }
 0x116   :  { %v3189_v56 = vpop.f32.mrb[16].mxu0 }
 0x117   :  { %v3253_v57 = vpop.f32.mrb[16].mxu1  ;;  %v3190_v58 = vpop.f32.mrb[17].mxu0 }
 0x118   :  { %v3191_v60 = vadd.f32 %v3190_v58, %v3189_v56  ;;  %v3254_v61 = vpop.f32.mrb[17].mxu1  ;;  %v3192_v62 = vpop.f32.mrb[18].mxu0 }
 0x119   :  { %v3255_v0 = vadd.f32 %v3254_v61, %v3253_v57  ;;  %v3256_v1 = vpop.f32.mrb[18].mxu1  ;;  %v3193_v2 = vpop.f32.mrb[19].mxu0 }
 0x11a   :  { %v3194_v3 = vadd.f32 %v3193_v2, %v3192_v62  ;;  %v3257_v4 = vpop.f32.mrb[19].mxu1 }
 0x11b   :  { %v4598_v5 = vadd.f32 %v3255_v0, %v3191_v60  ;;  %v3258_v6 = vadd.f32 %v3257_v4, %v3256_v1  ;;  %2481 = vmatmul.mubr.bf16.gmra.mrb[124].mxu0 %v2936_v59 }
 0x11c   :  { %2578 = vmatmul.mubr.bf16.gmra.mrb[124].mxu1 %v2938_v63 }
 0x11d   :  { %v4600_v8 = vadd.f32 %v3258_v6, %v3194_v3 }
 0x11e   :  { %v3195_v10 = vpop.f32.mrb[20].mxu0 }
 0x11f   :  { %v3259_v11 = vpop.f32.mrb[20].mxu1  ;;  %v3196_v12 = vpop.f32.mrb[21].mxu0 }
 0x120   :  { %v3197_v13 = vadd.f32 %v3196_v12, %v3195_v10  ;;  %v3260_v14 = vpop.f32.mrb[21].mxu1  ;;  %v3198_v15 = vpop.f32.mrb[22].mxu0 }
 0x121   :  { %v3261_v16 = vadd.f32 %v3260_v14, %v3259_v11  ;;  %v3262_v17 = vpop.f32.mrb[22].mxu1  ;;  %v3199_v18 = vpop.f32.mrb[23].mxu0 }
 0x122   :  { %v3200_v19 = vadd.f32 %v3199_v18, %v3198_v15  ;;  %v3263_v20 = vpop.f32.mrb[23].mxu1 }
 0x123   :  { %v4602_v21 = vadd.f32 %v3261_v16, %v3197_v13  ;;  %v3264_v22 = vadd.f32 %v3263_v20, %v3262_v17 }
 0x125   :  { %v4604_v23 = vadd.f32 %v3264_v22, %v3200_v19 }
 0x126   :  { %v3201_v24 = vpop.f32.mrb[24].mxu0 }
 0x127   :  { %v3265_v25 = vpop.f32.mrb[24].mxu1  ;;  %v3202_v26 = vpop.f32.mrb[25].mxu0 }
 0x128   :  { %v3203_v27 = vadd.f32 %v3202_v26, %v3201_v24  ;;  %v3266_v28 = vpop.f32.mrb[25].mxu1  ;;  %v3204_v30 = vpop.f32.mrb[26].mxu0 }
 0x129   :  { %v3267_v32 = vadd.f32 %v3266_v28, %v3265_v25  ;;  %v3268_v33 = vpop.f32.mrb[26].mxu1  ;;  %v3205_v34 = vpop.f32.mrb[27].mxu0 }
 0x12a   :  { %v3206_v35 = vadd.f32 %v3205_v34, %v3204_v30  ;;  %v3269_v36 = vpop.f32.mrb[27].mxu1 }
 0x12b   :  { %v4606_v37 = vadd.f32 %v3267_v32, %v3203_v27  ;;  %v3270_v38 = vadd.f32 %v3269_v36, %v3268_v33 }
 0x12d   :  { %v4608_v39 = vadd.f32 %v3270_v38, %v3206_v35 }
 0x12e   :  { %v3207_v40 = vpop.f32.mrb[28].mxu0 }
 0x12f   :  { %v3271_v41 = vpop.f32.mrb[28].mxu1  ;;  %v3208_v42 = vpop.f32.mrb[29].mxu0 }
 0x130   :  { %v3209_v43 = vadd.f32 %v3208_v42, %v3207_v40  ;;  %v3272_v44 = vpop.f32.mrb[29].mxu1  ;;  %v3210_v45 = vpop.f32.mrb[30].mxu0 }
 0x131   :  { %v3273_v46 = vadd.f32 %v3272_v44, %v3271_v41  ;;  %v3274_v47 = vpop.f32.mrb[30].mxu1  ;;  %v3211_v48 = vpop.f32.mrb[31].mxu0 }
 0x132   :  { %v3212_v50 = vadd.f32 %v3211_v48, %v3210_v45  ;;  %v3275_v52 = vpop.f32.mrb[31].mxu1 }
 0x133   :  { %v4610_v54 = vadd.f32 %v3273_v46, %v3209_v43  ;;  %v3276_v56 = vadd.f32 %v3275_v52, %v3274_v47 }
 0x135   :  { %v4612_v57 = vadd.f32 %v3276_v56, %v3212_v50 }
 0x136   :  { %v3293_v58 = vpop.f32.mrb[32].mxu0 }
 0x137   :  { %v3357_v59 = vpop.f32.mrb[32].mxu1  ;;  %v3294_v60 = vpop.f32.mrb[33].mxu0 }
 0x138   :  { %v3295_v61 = vadd.f32 %v3294_v60, %v3293_v58  ;;  %v3358_v62 = vpop.f32.mrb[33].mxu1  ;;  %v3296_v63 = vpop.f32.mrb[34].mxu0 }
 0x139   :  { %v3359_v0 = vadd.f32 %v3358_v62, %v3357_v59  ;;  %v3360_v1 = vpop.f32.mrb[34].mxu1  ;;  %v3297_v2 = vpop.f32.mrb[35].mxu0 }
 0x13a   :  { %v2039_v3 = vadd.f32 %v3295_v61, %v4546_v49  ;;  %v3298_v4 = vadd.f32 %v3297_v2, %v3296_v63  ;;  %v3361_v6 = vpop.f32.mrb[35].mxu1 }
 0x13b   :  { %v3362_v10 = vadd.f32 %v3361_v6, %v3360_v1 }
 0x13c   :  { %v4615_v11 = vadd.f32 %v3359_v0, %v2039_v3  ;;  %v2042_v12 = vadd.f32 %v3298_v4, %v4548_v51 }
 0x13e   :  { %v4618_v13 = vadd.f32 %v3362_v10, %v2042_v12  ;;  %v3299_v14 = vpop.f32.mrb[36].mxu0 }
 0x13f   :  { %v3363_v15 = vpop.f32.mrb[36].mxu1  ;;  %v3300_v16 = vpop.f32.mrb[37].mxu0 }
 0x140   :  { %v3301_v17 = vadd.f32 %v3300_v16, %v3299_v14  ;;  %v3364_v18 = vpop.f32.mrb[37].mxu1  ;;  %v3302_v19 = vpop.f32.mrb[38].mxu0 }
 0x141   :  { %v3365_v20 = vadd.f32 %v3364_v18, %v3363_v15  ;;  %v3366_v22 = vpop.f32.mrb[38].mxu1  ;;  %v3303_v24 = vpop.f32.mrb[39].mxu0 }
 0x142   :  { %v2047_v49 = vadd.f32 %v3301_v17, %v4562_v7  ;;  %v3304_v25 = vadd.f32 %v3303_v24, %v3302_v19  ;;  %v3367_v26 = vpop.f32.mrb[39].mxu1 }
 0x143   :  { %v3368_v27 = vadd.f32 %v3367_v26, %v3366_v22 }
 0x144   :  { %v4621_v28 = vadd.f32 %v3365_v20, %v2047_v49  ;;  %v2050_v51 = vadd.f32 %v3304_v25, %v4564_v9 }
 0x146   :  { %v4624_v30 = vadd.f32 %v3368_v27, %v2050_v51  ;;  %v3305_v32 = vpop.f32.mrb[40].mxu0 }
 0x147   :  { %v3369_v33 = vpop.f32.mrb[40].mxu1  ;;  %v3306_v34 = vpop.f32.mrb[41].mxu0 }
 0x148   :  { %v3307_v35 = vadd.f32 %v3306_v34, %v3305_v32  ;;  %v3370_v36 = vpop.f32.mrb[41].mxu1  ;;  %v3308_v38 = vpop.f32.mrb[42].mxu0 }
 0x149   :  { %v3371_v40 = vadd.f32 %v3370_v36, %v3369_v33  ;;  %v3372_v41 = vpop.f32.mrb[42].mxu1  ;;  %v3309_v42 = vpop.f32.mrb[43].mxu0 }
 0x14a   :  { %v2055_v7 = vadd.f32 %v3307_v35, %v4578_v29  ;;  %v3310_v43 = vadd.f32 %v3309_v42, %v3308_v38  ;;  %v3373_v44 = vpop.f32.mrb[43].mxu1 }
 0x14b   :  { %v3374_v45 = vadd.f32 %v3373_v44, %v3372_v41 }
 0x14c   :  { %v4627_v46 = vadd.f32 %v3371_v40, %v2055_v7  ;;  %v2058_v9 = vadd.f32 %v3310_v43, %v4580_v31 }
 0x14e   :  { %v4630_v47 = vadd.f32 %v3374_v45, %v2058_v9  ;;  %v3311_v48 = vpop.f32.mrb[44].mxu0 }
 0x14f   :  { %v3375_v50 = vpop.f32.mrb[44].mxu1  ;;  %v3312_v52 = vpop.f32.mrb[45].mxu0 }
 0x150   :  { %v3313_v56 = vadd.f32 %v3312_v52, %v3311_v48  ;;  %v3376_v58 = vpop.f32.mrb[45].mxu1  ;;  %v3314_v59 = vpop.f32.mrb[46].mxu0 }
 0x151   :  { %v3377_v60 = vadd.f32 %v3376_v58, %v3375_v50  ;;  %v3378_v61 = vpop.f32.mrb[46].mxu1  ;;  %v3315_v62 = vpop.f32.mrb[47].mxu0 }
 0x152   :  { %v2063_v29 = vadd.f32 %v3313_v56, %v4594_v53  ;;  %v3316_v63 = vadd.f32 %v3315_v62, %v3314_v59  ;;  %v3379_v0 = vpop.f32.mrb[47].mxu1 }
 0x153   :  { %v3380_v1 = vadd.f32 %v3379_v0, %v3378_v61 }
 0x154   :  { %v4633_v2 = vadd.f32 %v3377_v60, %v2063_v29  ;;  %v2066_v31 = vadd.f32 %v3316_v63, %v4596_v55 }
 0x156   :  { %v4636_v3 = vadd.f32 %v3380_v1, %v2066_v31  ;;  %v3317_v4 = vpop.f32.mrb[48].mxu0 }
 0x157   :  { %v3381_v6 = vpop.f32.mrb[48].mxu1  ;;  %v3318_v10 = vpop.f32.mrb[49].mxu0 }
 0x158   :  { %v3319_v12 = vadd.f32 %v3318_v10, %v3317_v4  ;;  %v3382_v14 = vpop.f32.mrb[49].mxu1  ;;  %v3320_v15 = vpop.f32.mrb[50].mxu0 }
 0x159   :  { %v3383_v16 = vadd.f32 %v3382_v14, %v3381_v6  ;;  %v3384_v17 = vpop.f32.mrb[50].mxu1  ;;  %v3321_v18 = vpop.f32.mrb[51].mxu0 }
 0x15a   :  { %v2071_v53 = vadd.f32 %v3319_v12, %v4598_v5  ;;  %v3322_v19 = vadd.f32 %v3321_v18, %v3320_v15  ;;  %v3385_v20 = vpop.f32.mrb[51].mxu1 }
 0x15b   :  { %v3386_v22 = vadd.f32 %v3385_v20, %v3384_v17 }
 0x15c   :  { %v4639_v24 = vadd.f32 %v3383_v16, %v2071_v53  ;;  %v2074_v55 = vadd.f32 %v3322_v19, %v4600_v8 }
 0x15e   :  { %v4642_v49 = vadd.f32 %v3386_v22, %v2074_v55  ;;  %v3323_v25 = vpop.f32.mrb[52].mxu0 }
 0x15f   :  { %v3387_v26 = vpop.f32.mrb[52].mxu1  ;;  %v3324_v27 = vpop.f32.mrb[53].mxu0 }
 0x160   :  { %v3325_v51 = vadd.f32 %v3324_v27, %v3323_v25  ;;  %v3388_v32 = vpop.f32.mrb[53].mxu1  ;;  %v3326_v33 = vpop.f32.mrb[54].mxu0 }
 0x161   :  { %v3389_v34 = vadd.f32 %v3388_v32, %v3387_v26  ;;  %v3390_v35 = vpop.f32.mrb[54].mxu1  ;;  %v3327_v36 = vpop.f32.mrb[55].mxu0 }
 0x162   :  { %v2079_v5 = vadd.f32 %v3325_v51, %v4602_v21  ;;  %v3328_v38 = vadd.f32 %v3327_v36, %v3326_v33  ;;  %v3391_v40 = vpop.f32.mrb[55].mxu1 }
 0x163   :  { %v3392_v41 = vadd.f32 %v3391_v40, %v3390_v35 }
 0x164   :  { %v4645_v42 = vadd.f32 %v3389_v34, %v2079_v5  ;;  %v2082_v8 = vadd.f32 %v3328_v38, %v4604_v23 }
 0x166   :  { %v4648_v7 = vadd.f32 %v3392_v41, %v2082_v8  ;;  %v3329_v43 = vpop.f32.mrb[56].mxu0 }
 0x167   :  { %v3393_v44 = vpop.f32.mrb[56].mxu1  ;;  %v3330_v45 = vpop.f32.mrb[57].mxu0 }
 0x168   :  { %v3331_v9 = vadd.f32 %v3330_v45, %v3329_v43  ;;  %v3394_v48 = vpop.f32.mrb[57].mxu1  ;;  %v3332_v50 = vpop.f32.mrb[58].mxu0 }
 0x169   :  { %v3395_v52 = vadd.f32 %v3394_v48, %v3393_v44  ;;  %v3396_v56 = vpop.f32.mrb[58].mxu1  ;;  %v3333_v58 = vpop.f32.mrb[59].mxu0 }
 0x16a   :  { %v2087_v21 = vadd.f32 %v3331_v9, %v4606_v37  ;;  %v3334_v59 = vadd.f32 %v3333_v58, %v3332_v50  ;;  %v3397_v60 = vpop.f32.mrb[59].mxu1 }
 0x16b   :  { %v3398_v61 = vadd.f32 %v3397_v60, %v3396_v56 }
 0x16c   :  { %v4651_v62 = vadd.f32 %v3395_v52, %v2087_v21  ;;  %v2090_v23 = vadd.f32 %v3334_v59, %v4608_v39 }
 0x16e   :  { %v4654_v29 = vadd.f32 %v3398_v61, %v2090_v23  ;;  %v3335_v63 = vpop.f32.mrb[60].mxu0 }
 0x16f   :  { %v3399_v0 = vpop.f32.mrb[60].mxu1  ;;  %v3336_v1 = vpop.f32.mrb[61].mxu0 }
 0x170   :  { %v3337_v31 = vadd.f32 %v3336_v1, %v3335_v63  ;;  %v3400_v4 = vpop.f32.mrb[61].mxu1  ;;  %v3338_v6 = vpop.f32.mrb[62].mxu0 }
 0x171   :  { %v3401_v10 = vadd.f32 %v3400_v4, %v3399_v0  ;;  %v3402_v12 = vpop.f32.mrb[62].mxu1  ;;  %v3339_v14 = vpop.f32.mrb[63].mxu0 }
 0x172   :  { %v2095_v37 = vadd.f32 %v3337_v31, %v4610_v54  ;;  %v3340_v15 = vadd.f32 %v3339_v14, %v3338_v6  ;;  %v3403_v16 = vpop.f32.mrb[63].mxu1 }
 0x173   :  { %v3404_v17 = vadd.f32 %v3403_v16, %v3402_v12 }
 0x174   :  { %v4657_v18 = vadd.f32 %v3401_v10, %v2095_v37  ;;  %v2098_v39 = vadd.f32 %v3340_v15, %v4612_v57 }
 0x176   :  { %v4660_v53 = vadd.f32 %v3404_v17, %v2098_v39  ;;  %v3421_v19 = vpop.f32.mrb[64].mxu0 }
 0x177   :  { %v3485_v20 = vpop.f32.mrb[64].mxu1  ;;  %v3422_v22 = vpop.f32.mrb[65].mxu0 }
 0x178   :  { %v3423_v55 = vadd.f32 %v3422_v22, %v3421_v19  ;;  %v3486_v25 = vpop.f32.mrb[65].mxu1  ;;  %v3424_v26 = vpop.f32.mrb[66].mxu0 }
 0x179   :  { %v3487_v27 = vadd.f32 %v3486_v25, %v3485_v20  ;;  %v3488_v51 = vpop.f32.mrb[66].mxu1  ;;  %v3425_v32 = vpop.f32.mrb[67].mxu0 }
 0x17a   :  { %v2233_v54 = vadd.f32 %v3423_v55, %v4615_v11  ;;  %v3426_v33 = vadd.f32 %v3425_v32, %v3424_v26  ;;  %v3489_v34 = vpop.f32.mrb[67].mxu1 }
 0x17b   :  { %v3490_v35 = vadd.f32 %v3489_v34, %v3488_v51 }
 0x17c   :  { %v4663_v36 = vadd.f32 %v3487_v27, %v2233_v54  ;;  %v2236_v57 = vadd.f32 %v3426_v33, %v4618_v13 }
 0x17e   :  { %v4666_v5 = vadd.f32 %v3490_v35, %v2236_v57  ;;  %v3427_v38 = vpop.f32.mrb[68].mxu0 }
 0x17f   :  { %v3491_v40 = vpop.f32.mrb[68].mxu1  ;;  %v3428_v41 = vpop.f32.mrb[69].mxu0 }
 0x180   :  { %v3429_v8 = vadd.f32 %v3428_v41, %v3427_v38  ;;  %v3492_v43 = vpop.f32.mrb[69].mxu1  ;;  %v3430_v44 = vpop.f32.mrb[70].mxu0 }
 0x181   :  { %v3493_v45 = vadd.f32 %v3492_v43, %v3491_v40  ;;  %v3494_v9 = vpop.f32.mrb[70].mxu1  ;;  %v3431_v48 = vpop.f32.mrb[71].mxu0 }
 0x182   :  { %v2241_v11 = vadd.f32 %v3429_v8, %v4621_v28  ;;  %v3432_v50 = vadd.f32 %v3431_v48, %v3430_v44  ;;  %v3495_v52 = vpop.f32.mrb[71].mxu1 }
 0x183   :  { %v3496_v56 = vadd.f32 %v3495_v52, %v3494_v9 }
 0x184   :  { %v4669_v58 = vadd.f32 %v3493_v45, %v2241_v11  ;;  %v2244_v13 = vadd.f32 %v3432_v50, %v4624_v30 }
 0x186   :  { %v4672_v21 = vadd.f32 %v3496_v56, %v2244_v13  ;;  %v3433_v59 = vpop.f32.mrb[72].mxu0 }
 0x187   :  { %v3497_v60 = vpop.f32.mrb[72].mxu1  ;;  %v3434_v61 = vpop.f32.mrb[73].mxu0 }
 0x188   :  { %v3435_v23 = vadd.f32 %v3434_v61, %v3433_v59  ;;  %v3498_v63 = vpop.f32.mrb[73].mxu1  ;;  %v3436_v0 = vpop.f32.mrb[74].mxu0 }
 0x189   :  { %v3499_v1 = vadd.f32 %v3498_v63, %v3497_v60  ;;  %v3500_v31 = vpop.f32.mrb[74].mxu1  ;;  %v3437_v4 = vpop.f32.mrb[75].mxu0 }
 0x18a   :  { %v2249_v28 = vadd.f32 %v3435_v23, %v4627_v46  ;;  %v3438_v6 = vadd.f32 %v3437_v4, %v3436_v0  ;;  %v3501_v10 = vpop.f32.mrb[75].mxu1 }
 0x18b   :  { %v3502_v12 = vadd.f32 %v3501_v10, %v3500_v31 }
 0x18c   :  { %v4675_v14 = vadd.f32 %v3499_v1, %v2249_v28  ;;  %v2252_v30 = vadd.f32 %v3438_v6, %v4630_v47 }
 0x18e   :  { %v4678_v37 = vadd.f32 %v3502_v12, %v2252_v30  ;;  %v3439_v15 = vpop.f32.mrb[76].mxu0 }
 0x18f   :  { %v3503_v16 = vpop.f32.mrb[76].mxu1  ;;  %v3440_v17 = vpop.f32.mrb[77].mxu0 }
 0x190   :  { %v3441_v39 = vadd.f32 %v3440_v17, %v3439_v15  ;;  %v3504_v19 = vpop.f32.mrb[77].mxu1  ;;  %v3442_v20 = vpop.f32.mrb[78].mxu0 }
 0x191   :  { %v3505_v22 = vadd.f32 %v3504_v19, %v3503_v16  ;;  %v3506_v55 = vpop.f32.mrb[78].mxu1  ;;  %v3443_v25 = vpop.f32.mrb[79].mxu0 }
 0x192   :  { %v2257_v46 = vadd.f32 %v3441_v39, %v4633_v2  ;;  %v3444_v26 = vadd.f32 %v3443_v25, %v3442_v20  ;;  %v3507_v27 = vpop.f32.mrb[79].mxu1 }
 0x193   :  { %v3508_v51 = vadd.f32 %v3507_v27, %v3506_v55 }
 0x194   :  { %v4681_v32 = vadd.f32 %v3505_v22, %v2257_v46  ;;  %v2260_v47 = vadd.f32 %v3444_v26, %v4636_v3 }
 0x196   :  { %v4684_v54 = vadd.f32 %v3508_v51, %v2260_v47  ;;  %v3445_v33 = vpop.f32.mrb[80].mxu0 }
 0x197   :  { %v3509_v34 = vpop.f32.mrb[80].mxu1  ;;  %v3446_v35 = vpop.f32.mrb[81].mxu0 }
 0x198   :  { %v3447_v57 = vadd.f32 %v3446_v35, %v3445_v33  ;;  %v3510_v38 = vpop.f32.mrb[81].mxu1  ;;  %v3448_v40 = vpop.f32.mrb[82].mxu0 }
 0x199   :  { %v3511_v41 = vadd.f32 %v3510_v38, %v3509_v34  ;;  %v3512_v8 = vpop.f32.mrb[82].mxu1  ;;  %v3449_v43 = vpop.f32.mrb[83].mxu0 }
 0x19a   :  { %v2265_v2 = vadd.f32 %v3447_v57, %v4639_v24  ;;  %v3450_v44 = vadd.f32 %v3449_v43, %v3448_v40  ;;  %v3513_v45 = vpop.f32.mrb[83].mxu1 }
 0x19b   :  { %v3514_v9 = vadd.f32 %v3513_v45, %v3512_v8 }
 0x19c   :  { %v4687_v48 = vadd.f32 %v3511_v41, %v2265_v2  ;;  %v2268_v3 = vadd.f32 %v3450_v44, %v4642_v49 }
 0x19e   :  { %v4690_v11 = vadd.f32 %v3514_v9, %v2268_v3  ;;  %v3451_v50 = vpop.f32.mrb[84].mxu0 }
 0x19f   :  { %v3515_v52 = vpop.f32.mrb[84].mxu1  ;;  %v3452_v56 = vpop.f32.mrb[85].mxu0 }
 0x1a0   :  { %v3453_v13 = vadd.f32 %v3452_v56, %v3451_v50  ;;  %v3516_v59 = vpop.f32.mrb[85].mxu1  ;;  %v3454_v60 = vpop.f32.mrb[86].mxu0 }
 0x1a1   :  { %v3517_v61 = vadd.f32 %v3516_v59, %v3515_v52  ;;  %v3518_v23 = vpop.f32.mrb[86].mxu1  ;;  %v3455_v63 = vpop.f32.mrb[87].mxu0 }
 0x1a2   :  { %v2273_v24 = vadd.f32 %v3453_v13, %v4645_v42  ;;  %v3456_v0 = vadd.f32 %v3455_v63, %v3454_v60  ;;  %v3519_v1 = vpop.f32.mrb[87].mxu1 }
 0x1a3   :  { %v3520_v31 = vadd.f32 %v3519_v1, %v3518_v23 }
 0x1a4   :  { %v4693_v4 = vadd.f32 %v3517_v61, %v2273_v24  ;;  %v2276_v49 = vadd.f32 %v3456_v0, %v4648_v7 }
 0x1a6   :  { %v4696_v28 = vadd.f32 %v3520_v31, %v2276_v49  ;;  %v3457_v6 = vpop.f32.mrb[88].mxu0  ;;  %v4720_v49 = vld [vmem:[%s4795_s3] ss:$0 sm:$0xff] }
 0x1a7   :  { %v3521_v10 = vpop.f32.mrb[88].mxu1  ;;  %v3458_v12 = vpop.f32.mrb[89].mxu0 }
 0x1a8   :  { %v3459_v30 = vadd.f32 %v3458_v12, %v3457_v6  ;;  %v3522_v15 = vpop.f32.mrb[89].mxu1  ;;  %v3460_v16 = vpop.f32.mrb[90].mxu0 }
 0x1a9   :  { %v3523_v17 = vadd.f32 %v3522_v15, %v3521_v10  ;;  %v3524_v39 = vpop.f32.mrb[90].mxu1  ;;  %v3461_v19 = vpop.f32.mrb[91].mxu0 }
 0x1aa   :  { %v2281_v42 = vadd.f32 %v3459_v30, %v4651_v62  ;;  %v3462_v20 = vadd.f32 %v3461_v19, %v3460_v16  ;;  %v3525_v22 = vpop.f32.mrb[91].mxu1 }
 0x1ab   :  { %v3526_v55 = vadd.f32 %v3525_v22, %v3524_v39 }
 0x1ac   :  { %v4699_v25 = vadd.f32 %v3523_v17, %v2281_v42  ;;  %v2284_v7 = vadd.f32 %v3462_v20, %v4654_v29 }
 0x1ae   :  { %v4702_v46 = vadd.f32 %v3526_v55, %v2284_v7  ;;  %v3463_v26 = vpop.f32.mrb[92].mxu0 }
 0x1af   :  { %v3527_v27 = vpop.f32.mrb[92].mxu1  ;;  %v3464_v51 = vpop.f32.mrb[93].mxu0 }
 0x1b0   :  { %v3465_v47 = vadd.f32 %v3464_v51, %v3463_v26  ;;  %v3528_v33 = vpop.f32.mrb[93].mxu1  ;;  %v3466_v34 = vpop.f32.mrb[94].mxu0 }
 0x1b1   :  { %v3529_v35 = vadd.f32 %v3528_v33, %v3527_v27  ;;  %v3530_v57 = vpop.f32.mrb[94].mxu1  ;;  %v3467_v38 = vpop.f32.mrb[95].mxu0 }
 0x1b2   :  { %v2289_v62 = vadd.f32 %v3465_v47, %v4657_v18  ;;  %v3468_v40 = vadd.f32 %v3467_v38, %v3466_v34  ;;  %v3531_v41 = vpop.f32.mrb[95].mxu1 }
 0x1b3   :  { %v3532_v8 = vadd.f32 %v3531_v41, %v3530_v57 }
 0x1b4   :  { %v4705_v43 = vadd.f32 %v3529_v35, %v2289_v62  ;;  %v2292_v29 = vadd.f32 %v3468_v40, %v4660_v53  ;;  %v4715_v53 = vld [vmem:[%s4794_s2] ss:$0 sm:$0xff] }
 0x1b6   :  { %v4708_v2 = vadd.f32 %v3532_v8, %v2292_v29  ;;  %v3549_v44 = vpop.f32.mrb[96].mxu0 }
 0x1b7   :  { %v3613_v45 = vpop.f32.mrb[96].mxu1  ;;  %v3550_v9 = vpop.f32.mrb[97].mxu0 }
 0x1b8   :  { %v3551_v3 = vadd.f32 %v3550_v9, %v3549_v44  ;;  %v3614_v50 = vpop.f32.mrb[97].mxu1  ;;  %v3552_v52 = vpop.f32.mrb[98].mxu0 }
 0x1b9   :  { %v3615_v56 = vadd.f32 %v3614_v50, %v3613_v45  ;;  %v3616_v13 = vpop.f32.mrb[98].mxu1  ;;  %v3553_v59 = vpop.f32.mrb[99].mxu0 }
 0x1ba   :  { %v2427_v18 = vadd.f32 %v3551_v3, %v4663_v36  ;;  %v3554_v60 = vadd.f32 %v3553_v59, %v3552_v52  ;;  %v3617_v61 = vpop.f32.mrb[99].mxu1 }
 0x1bb   :  { %v3618_v23 = vadd.f32 %v3617_v61, %v3616_v13 }
 0x1bc   :  { %v2524_v63 = vadd.f32 %v3615_v56, %v2427_v18  ;;  %v2430_v24 = vadd.f32 %v3554_v60, %v4666_v5 }
 0x1be   :  { %vm2588_vm0 = vcmp.ge.f32.partialorder %v2524_v63, 0.0  ;;  %v2604_v0 = vmul.f32 0.2, %v2524_v63  ;;  %v2527_v1 = vadd.f32 %v3618_v23, %v2430_v24  ;;  %v3555_v31 = vpop.f32.mrb[100].mxu0 }
 0x1bf   :  { %v3619_v36 = vpop.f32.mrb[100].mxu1  ;;  %v3556_v6 = vpop.f32.mrb[101].mxu0 }
 0x1c0   :  { %v2620_v10 = vsel %vm2588_vm0, %v2524_v63, %v2604_v0  ;;  %vm2589_vm1 = vcmp.ge.f32.partialorder %v2527_v1, 0.0  ;;  %v2605_v12 = vmul.f32 0.2, %v2527_v1  ;;  %v3557_v5 = vadd.f32 %v3556_v6, %v3555_v31  ;;  %v3620_v30 = vpop.f32.mrb[101].mxu1  ;;  %v3558_v15 = vpop.f32.mrb[102].mxu0 }
 0x1c1   :  { %v2642_v16 = vmul.f32 %v4715_v53, %v2620_v10  ;;  %v3621_v17 = vadd.f32 %v3620_v30, %v3619_v36  ;;  %v3622_v39 = vpop.f32.mrb[102].mxu1  ;;  %v3559_v19 = vpop.f32.mrb[103].mxu0 }
 0x1c2   :  { %v2621_v42 = vsel %vm2589_vm1, %v2527_v1, %v2605_v12  ;;  %v2435_v20 = vadd.f32 %v3557_v5, %v4669_v58  ;;  %v3560_v22 = vadd.f32 %v3559_v19, %v3558_v15  ;;  %v3623_v55 = vpop.f32.mrb[103].mxu1 }
 0x1c3   :  { %v2664_v7 = vadd.f32 %v4720_v49, %v2642_v16  ;;  %v2643_v26 = vmul.f32 %v4715_v53, %v2621_v42  ;;  %v3624_v27 = vadd.f32 %v3623_v55, %v3622_v39 }
 0x1c4   :  { %v2532_v51 = vadd.f32 %v3621_v17, %v2435_v20  ;;  %v2438_v47 = vadd.f32 %v3560_v22, %v4672_v21 }
 0x1c5   :  { %v2696_v33 = vmul.f32 0.02, %v2664_v7  ;;  %v2665_v34 = vadd.f32 %v4720_v49, %v2643_v26  ;;  %vm2680_vm2 = vcmp.ge.f32.partialorder %v2664_v7, 0.0 }
 0x1c6   :  { %vm2590_vm3 = vcmp.ge.f32.partialorder %v2532_v51, 0.0  ;;  %v2606_v35 = vmul.f32 0.2, %v2532_v51  ;;  %v2535_v57 = vadd.f32 %v3624_v27, %v2438_v47  ;;  %v3561_v38 = vpop.f32.mrb[104].mxu0 }
 0x1c7   :  { %vm2681_vm4 = vcmp.ge.f32.partialorder %v2665_v34, 0.0  ;;  %v2697_v58 = vmul.f32 0.02, %v2665_v34  ;;  %v3625_v62 = vpop.f32.mrb[104].mxu1  ;;  %v3562_v40 = vpop.f32.mrb[105].mxu0  ;;  %v2712_v9 = vsel %vm2680_vm2, %v2664_v7, %v2696_v33 }
 0x1c8   :  { %v2622_v41 = vsel %vm2590_vm3, %v2532_v51, %v2606_v35  ;;  %vm2591_vm5 = vcmp.ge.f32.partialorder %v2535_v57, 0.0  ;;  %v2607_v8 = vmul.f32 0.2, %v2535_v57  ;;  %v3563_v29 = vadd.f32 %v3562_v40, %v3561_v38  ;;  %v3626_v44 = vpop.f32.mrb[105].mxu1  ;;  %v3564_v45 = vpop.f32.mrb[106].mxu0 }
 0x1c9   :  { %v2713_v21 = vsel %vm2681_vm4, %v2665_v34, %v2697_v58  ;;  %v2644_v3 = vmul.f32 %v4715_v53, %v2622_v41  ;;  %v3627_v50 = vadd.f32 %v3626_v44, %v3625_v62  ;;  %v3628_v52 = vpop.f32.mrb[106].mxu1  ;;  %v3565_v56 = vpop.f32.mrb[107].mxu0 }
 0x1ca   :  { %v3105_v13 = vpack.c.bf16 %v2713_v21, %v2712_v9  ;;  %v2623_v59 = vsel %vm2591_vm5, %v2535_v57, %v2607_v8  ;;  %v2443_v18 = vadd.f32 %v3563_v29, %v4675_v14  ;;  %v3566_v60 = vadd.f32 %v3565_v56, %v3564_v45  ;;  %v3629_v61 = vpop.f32.mrb[107].mxu1 }
 0x1cb   :  { %v2666_v23 = vadd.f32 %v4720_v49, %v2644_v3  ;;  %v2645_v63 = vmul.f32 %v4715_v53, %v2623_v59  ;;  %v3630_v24 = vadd.f32 %v3629_v61, %v3628_v52 }
 0x1cc   :  { %3106 = vst [vmem:[%s4796_s4] sm:$0xff] %v3105_v13   ;;  %v2540_v0 = vadd.f32 %v3627_v50, %v2443_v18  ;;  %v2446_v1 = vadd.f32 %v3566_v60, %v4678_v37 }
 0x1cd   :  { %v2698_v31 = vmul.f32 0.02, %v2666_v23  ;;  %v2667_v36 = vadd.f32 %v4720_v49, %v2645_v63  ;;  %vm2682_vm6 = vcmp.ge.f32.partialorder %v2666_v23, 0.0 }
 0x1ce   :  { %vm2592_vm7 = vcmp.ge.f32.partialorder %v2540_v0, 0.0  ;;  %v2608_v14 = vmul.f32 0.2, %v2540_v0  ;;  %v2543_v6 = vadd.f32 %v3630_v24, %v2446_v1  ;;  %v3567_v10 = vpop.f32.mrb[108].mxu0 }
 0x1cf   :  { %vm2683_vm8 = vcmp.ge.f32.partialorder %v2667_v36, 0.0  ;;  %v2699_v12 = vmul.f32 0.02, %v2667_v36  ;;  %v3631_v5 = vpop.f32.mrb[108].mxu1  ;;  %v3568_v30 = vpop.f32.mrb[109].mxu0  ;;  %v2714_v42 = vsel %vm2682_vm6, %v2666_v23, %v2698_v31 }
 0x1d0   :  { %v2624_v15 = vsel %vm2592_vm7, %v2540_v0, %v2608_v14  ;;  %vm2593_vm9 = vcmp.ge.f32.partialorder %v2543_v6, 0.0  ;;  %v2609_v16 = vmul.f32 0.2, %v2543_v6  ;;  %v3569_v17 = vadd.f32 %v3568_v30, %v3567_v10  ;;  %v3632_v39 = vpop.f32.mrb[109].mxu1  ;;  %v3570_v19 = vpop.f32.mrb[110].mxu0 }
 0x1d1   :  { %v2715_v37 = vsel %vm2683_vm8, %v2667_v36, %v2699_v12  ;;  %v2646_v20 = vmul.f32 %v4715_v53, %v2624_v15  ;;  %v3633_v22 = vadd.f32 %v3632_v39, %v3631_v5  ;;  %v3634_v55 = vpop.f32.mrb[110].mxu1  ;;  %v3571_v7 = vpop.f32.mrb[111].mxu0 }
 0x1d2   :  { %v3110_v26 = vpack.c.bf16 %v2715_v37, %v2714_v42  ;;  %v2625_v27 = vsel %vm2593_vm9, %v2543_v6, %v2609_v16  ;;  %v2451_v51 = vadd.f32 %v3569_v17, %v4681_v32  ;;  %v3572_v47 = vadd.f32 %v3571_v7, %v3570_v19  ;;  %v3635_v33 = vpop.f32.mrb[111].mxu1 }
 0x1d3   :  { %v2668_v34 = vadd.f32 %v4720_v49, %v2646_v20  ;;  %v2647_v35 = vmul.f32 %v4715_v53, %v2625_v27  ;;  %v3636_v57 = vadd.f32 %v3635_v33, %v3634_v55 }
 0x1d4   :  { %3142 = vst [vmem:[%s4796_s4 + $0x8] sm:$0xff] %v3110_v26   ;;  %v2548_v38 = vadd.f32 %v3633_v22, %v2451_v51  ;;  %v2454_v58 = vadd.f32 %v3572_v47, %v4684_v54 }
 0x1d5   :  { %v2700_v62 = vmul.f32 0.02, %v2668_v34  ;;  %v2669_v40 = vadd.f32 %v4720_v49, %v2647_v35  ;;  %vm2684_vm10 = vcmp.ge.f32.partialorder %v2668_v34, 0.0 }
 0x1d6   :  { %vm2594_vm11 = vcmp.ge.f32.partialorder %v2548_v38, 0.0  ;;  %v2610_v32 = vmul.f32 0.2, %v2548_v38  ;;  %v2551_v41 = vadd.f32 %v3636_v57, %v2454_v58  ;;  %v3573_v8 = vpop.f32.mrb[112].mxu0 }
 0x1d7   :  { %vm2685_vm12 = vcmp.ge.f32.partialorder %v2669_v40, 0.0  ;;  %v2701_v29 = vmul.f32 0.02, %v2669_v40  ;;  %v3637_v44 = vpop.f32.mrb[112].mxu1  ;;  %v3574_v45 = vpop.f32.mrb[113].mxu0  ;;  %v2716_v56 = vsel %vm2684_vm10, %v2668_v34, %v2700_v62 }
 0x1d8   :  { %v2626_v9 = vsel %vm2594_vm11, %v2548_v38, %v2610_v32  ;;  %vm2595_vm13 = vcmp.ge.f32.partialorder %v2551_v41, 0.0  ;;  %v2611_v21 = vmul.f32 0.2, %v2551_v41  ;;  %v3575_v3 = vadd.f32 %v3574_v45, %v3573_v8  ;;  %v3638_v50 = vpop.f32.mrb[113].mxu1  ;;  %v3576_v52 = vpop.f32.mrb[114].mxu0 }
 0x1d9   :  { %v2717_v54 = vsel %vm2685_vm12, %v2669_v40, %v2701_v29  ;;  %v2648_v13 = vmul.f32 %v4715_v53, %v2626_v9  ;;  %v3639_v59 = vadd.f32 %v3638_v50, %v3637_v44  ;;  %v3640_v18 = vpop.f32.mrb[114].mxu1  ;;  %v3577_v60 = vpop.f32.mrb[115].mxu0 }
 0x1da   :  { %v3115_v61 = vpack.c.bf16 %v2717_v54, %v2716_v56  ;;  %v2627_v23 = vsel %vm2595_vm13, %v2551_v41, %v2611_v21  ;;  %v2459_v63 = vadd.f32 %v3575_v3, %v4687_v48  ;;  %v3578_v24 = vadd.f32 %v3577_v60, %v3576_v52  ;;  %v3641_v0 = vpop.f32.mrb[115].mxu1 }
 0x1db   :  { %v2670_v1 = vadd.f32 %v4720_v49, %v2648_v13  ;;  %v2649_v31 = vmul.f32 %v4715_v53, %v2627_v23  ;;  %v3642_v36 = vadd.f32 %v3641_v0, %v3640_v18 }
 0x1dc   :  { %3143 = vst [vmem:[%s4796_s4 + $0x10] sm:$0xff] %v3115_v61   ;;  %v2556_v14 = vadd.f32 %v3639_v59, %v2459_v63  ;;  %v2462_v6 = vadd.f32 %v3578_v24, %v4690_v11 }
 0x1dd   :  { %v2702_v10 = vmul.f32 0.02, %v2670_v1  ;;  %v2671_v12 = vadd.f32 %v4720_v49, %v2649_v31  ;;  %vm2686_vm14 = vcmp.ge.f32.partialorder %v2670_v1, 0.0 }
 0x1de   :  { %vm2596_vm15 = vcmp.ge.f32.partialorder %v2556_v14, 0.0  ;;  %v2612_v48 = vmul.f32 0.2, %v2556_v14  ;;  %v2559_v5 = vadd.f32 %v3642_v36, %v2462_v6  ;;  %v3579_v30 = vpop.f32.mrb[116].mxu0 }
 0x1df   :  { %vm2687_vm0 = vcmp.ge.f32.partialorder %v2671_v12, 0.0  ;;  %v2703_v15 = vmul.f32 0.02, %v2671_v12  ;;  %v3643_v16 = vpop.f32.mrb[116].mxu1  ;;  %v3580_v17 = vpop.f32.mrb[117].mxu0  ;;  %v2718_v22 = vsel %vm2686_vm14, %v2670_v1, %v2702_v10 }
 0x1e0   :  { %v2628_v39 = vsel %vm2596_vm15, %v2556_v14, %v2612_v48  ;;  %vm2597_vm1 = vcmp.ge.f32.partialorder %v2559_v5, 0.0  ;;  %v2613_v19 = vmul.f32 0.2, %v2559_v5  ;;  %v3581_v42 = vadd.f32 %v3580_v17, %v3579_v30  ;;  %v3644_v37 = vpop.f32.mrb[117].mxu1  ;;  %v3582_v20 = vpop.f32.mrb[118].mxu0 }
 0x1e1   :  { %v2719_v11 = vsel %vm2687_vm0, %v2671_v12, %v2703_v15  ;;  %v2650_v55 = vmul.f32 %v4715_v53, %v2628_v39  ;;  %v3645_v7 = vadd.f32 %v3644_v37, %v3643_v16  ;;  %v3646_v26 = vpop.f32.mrb[118].mxu1  ;;  %v3583_v27 = vpop.f32.mrb[119].mxu0 }
 0x1e2   :  { %v3120_v51 = vpack.c.bf16 %v2719_v11, %v2718_v22  ;;  %v2629_v47 = vsel %vm2597_vm1, %v2559_v5, %v2613_v19  ;;  %v2467_v33 = vadd.f32 %v3581_v42, %v4693_v4  ;;  %v3584_v34 = vadd.f32 %v3583_v27, %v3582_v20  ;;  %v3647_v35 = vpop.f32.mrb[119].mxu1 }
 0x1e3   :  { %v2672_v57 = vadd.f32 %v4720_v49, %v2650_v55  ;;  %v2651_v38 = vmul.f32 %v4715_v53, %v2629_v47  ;;  %v3648_v58 = vadd.f32 %v3647_v35, %v3646_v26 }
 0x1e4   :  { %3144 = vst [vmem:[%s4796_s4 + $0x18] sm:$0xff] %v3120_v51   ;;  %v2564_v62 = vadd.f32 %v3645_v7, %v2467_v33  ;;  %v2470_v40 = vadd.f32 %v3584_v34, %v4696_v28 }
 0x1e5   :  { %v2704_v32 = vmul.f32 0.02, %v2672_v57  ;;  %v2673_v41 = vadd.f32 %v4720_v49, %v2651_v38  ;;  %vm2688_vm2 = vcmp.ge.f32.partialorder %v2672_v57, 0.0 }
 0x1e6   :  { %vm2598_vm3 = vcmp.ge.f32.partialorder %v2564_v62, 0.0  ;;  %v2614_v4 = vmul.f32 0.2, %v2564_v62  ;;  %v2567_v8 = vadd.f32 %v3648_v58, %v2470_v40  ;;  %v3585_v29 = vpop.f32.mrb[120].mxu0 }
 0x1e7   :  { %vm2689_vm4 = vcmp.ge.f32.partialorder %v2673_v41, 0.0  ;;  %v2705_v44 = vmul.f32 0.02, %v2673_v41  ;;  %v3649_v45 = vpop.f32.mrb[120].mxu1  ;;  %v3586_v9 = vpop.f32.mrb[121].mxu0  ;;  %v2720_v54 = vsel %vm2688_vm2, %v2672_v57, %v2704_v32 }
 0x1e8   :  { %v2630_v21 = vsel %vm2598_vm3, %v2564_v62, %v2614_v4  ;;  %vm2599_vm5 = vcmp.ge.f32.partialorder %v2567_v8, 0.0  ;;  %v2615_v3 = vmul.f32 0.2, %v2567_v8  ;;  %v3587_v50 = vadd.f32 %v3586_v9, %v3585_v29  ;;  %v3650_v52 = vpop.f32.mrb[121].mxu1  ;;  %v3588_v56 = vpop.f32.mrb[122].mxu0 }
 0x1e9   :  { %v2721_v28 = vsel %vm2689_vm4, %v2673_v41, %v2705_v44  ;;  %v2652_v13 = vmul.f32 %v4715_v53, %v2630_v21  ;;  %v3651_v59 = vadd.f32 %v3650_v52, %v3649_v45  ;;  %v3652_v18 = vpop.f32.mrb[122].mxu1  ;;  %v3589_v60 = vpop.f32.mrb[123].mxu0 }
 0x1ea   :  { %v3125_v61 = vpack.c.bf16 %v2721_v28, %v2720_v54  ;;  %v2631_v23 = vsel %vm2599_vm5, %v2567_v8, %v2615_v3  ;;  %v2475_v63 = vadd.f32 %v3587_v50, %v4699_v25  ;;  %v3590_v24 = vadd.f32 %v3589_v60, %v3588_v56  ;;  %v3653_v0 = vpop.f32.mrb[123].mxu1 }
 0x1eb   :  { %v2674_v1 = vadd.f32 %v4720_v49, %v2652_v13  ;;  %v2653_v31 = vmul.f32 %v4715_v53, %v2631_v23  ;;  %v3654_v36 = vadd.f32 %v3653_v0, %v3652_v18 }
 0x1ec   :  { %3145 = vst [vmem:[%s4796_s4 + $0x20] sm:$0xff] %v3125_v61   ;;  %v2572_v14 = vadd.f32 %v3651_v59, %v2475_v63  ;;  %v2478_v6 = vadd.f32 %v3590_v24, %v4702_v46 }
 0x1ed   :  { %v2706_v10 = vmul.f32 0.02, %v2674_v1  ;;  %v2675_v12 = vadd.f32 %v4720_v49, %v2653_v31  ;;  %vm2690_vm6 = vcmp.ge.f32.partialorder %v2674_v1, 0.0 }
 0x1ee   :  { %vm2600_vm7 = vcmp.ge.f32.partialorder %v2572_v14, 0.0  ;;  %v2616_v25 = vmul.f32 0.2, %v2572_v14  ;;  %v2575_v48 = vadd.f32 %v3654_v36, %v2478_v6  ;;  %v3591_v5 = vpop.f32.mrb[124].mxu0 }
 0x1ef   :  { %vm2691_vm8 = vcmp.ge.f32.partialorder %v2675_v12, 0.0  ;;  %v2707_v30 = vmul.f32 0.02, %v2675_v12  ;;  %v3655_v15 = vpop.f32.mrb[124].mxu1  ;;  %v3592_v16 = vpop.f32.mrb[125].mxu0  ;;  %v2722_v20 = vsel %vm2690_vm6, %v2674_v1, %v2706_v10 }
 0x1f0   :  { %v2632_v17 = vsel %vm2600_vm7, %v2572_v14, %v2616_v25  ;;  %vm2601_vm9 = vcmp.ge.f32.partialorder %v2575_v48, 0.0  ;;  %v2617_v39 = vmul.f32 0.2, %v2575_v48  ;;  %v3593_v19 = vadd.f32 %v3592_v16, %v3591_v5  ;;  %v3656_v42 = vpop.f32.mrb[125].mxu1  ;;  %v3594_v37 = vpop.f32.mrb[126].mxu0 }
 0x1f1   :  { %v2723_v46 = vsel %vm2691_vm8, %v2675_v12, %v2707_v30  ;;  %v2654_v22 = vmul.f32 %v4715_v53, %v2632_v17  ;;  %v3657_v11 = vadd.f32 %v3656_v42, %v3655_v15  ;;  %v3658_v55 = vpop.f32.mrb[126].mxu1  ;;  %v3595_v7 = vpop.f32.mrb[127].mxu0 }
 0x1f2   :  { %v3130_v26 = vpack.c.bf16 %v2723_v46, %v2722_v20  ;;  %v2633_v27 = vsel %vm2601_vm9, %v2575_v48, %v2617_v39  ;;  %v2483_v51 = vadd.f32 %v3593_v19, %v4705_v43  ;;  %v3596_v47 = vadd.f32 %v3595_v7, %v3594_v37  ;;  %v3659_v33 = vpop.f32.mrb[127].mxu1 }
 0x1f3   :  { %v2676_v34 = vadd.f32 %v4720_v49, %v2654_v22  ;;  %v2655_v35 = vmul.f32 %v4715_v53, %v2633_v27  ;;  %v3660_v57 = vadd.f32 %v3659_v33, %v3658_v55 }
 0x1f4   :  { %3146 = vst [vmem:[%s4796_s4 + $0x28] sm:$0xff] %v3130_v26   ;;  %v2580_v38 = vadd.f32 %v3657_v11, %v2483_v51  ;;  %v2486_v58 = vadd.f32 %v3596_v47, %v4708_v2 }
 0x1f5   :  { %v2708_v62 = vmul.f32 0.02, %v2676_v34  ;;  %v2677_v40 = vadd.f32 %v4720_v49, %v2655_v35  ;;  %vm2692_vm10 = vcmp.ge.f32.partialorder %v2676_v34, 0.0 }
 0x1f6   :  { %vm2602_vm11 = vcmp.ge.f32.partialorder %v2580_v38, 0.0  ;;  %v2618_v43 = vmul.f32 0.2, %v2580_v38  ;;  %v2583_v32 = vadd.f32 %v3660_v57, %v2486_v58 }
 0x1f7   :  { %vm2693_vm12 = vcmp.ge.f32.partialorder %v2677_v40, 0.0  ;;  %v2709_v41 = vmul.f32 0.02, %v2677_v40  ;;  %v2724_v29 = vsel %vm2692_vm10, %v2676_v34, %v2708_v62 }
 0x1f8   :  { %v2634_v4 = vsel %vm2602_vm11, %v2580_v38, %v2618_v43  ;;  %vm2603_vm13 = vcmp.ge.f32.partialorder %v2583_v32, 0.0  ;;  %v2619_v8 = vmul.f32 0.2, %v2583_v32 }
 0x1f9   :  { %v2725_v44 = vsel %vm2693_vm12, %v2677_v40, %v2709_v41  ;;  %v2656_v45 = vmul.f32 %v4715_v53, %v2634_v4 }
 0x1fa   :  { %v3135_v9 = vpack.c.bf16 %v2725_v44, %v2724_v29  ;;  %v2635_v21 = vsel %vm2603_vm13, %v2583_v32, %v2619_v8 }
 0x1fb   :  { %v2678_v2 = vadd.f32 %v4720_v49, %v2656_v45  ;;  %v2657_v3 = vmul.f32 %v4715_v53, %v2635_v21 }
 0x1fc   :  { %3147 = vst [vmem:[%s4796_s4 + $0x30] sm:$0xff] %v3135_v9  }
 0x1fd   :  { %v2710_v50 = vmul.f32 0.02, %v2678_v2  ;;  %v2679_v52 = vadd.f32 %v4720_v49, %v2657_v3  ;;  %vm2694_vm14 = vcmp.ge.f32.partialorder %v2678_v2, 0.0 }
 0x1ff   :  { %vm2695_vm15 = vcmp.ge.f32.partialorder %v2679_v52, 0.0  ;;  %v2711_v56 = vmul.f32 0.02, %v2679_v52  ;;  %v2726_v54 = vsel %vm2694_vm14, %v2678_v2, %v2710_v50 }
 0x201   :  { %v2727_v28 = vsel %vm2695_vm15, %v2679_v52, %v2711_v56 }
 0x202   :  { %v3140_v13 = vpack.c.bf16 %v2727_v28, %v2726_v54 }
 0x204   :  { %3148 = vst [vmem:[%s4796_s4 + $0x38] sm:$0xff] %v3140_v13  }

// kernel: _lambda_.7
= control target key start
LH: loop header
LB: loop body
LE: loop exit
PB: predicated region body
PF: predicated region fallthrough
CT: control target
= control target key end

     0   :  { %s2746_s1 = inlined_call_operand.vmem [shape: bf16[2048,128], index: 1, kind: input, shape index: {}]   ;;  %s2747_s0 = inlined_call_operand.vmem [shape: bf16[32,2048], index: 0, kind: input, shape index: {}]   ;;  %s2748_s2 = inlined_call_operand.vmem [shape: f32[1,128], index: 2, kind: input, shape index: {}]   ;;  %s2749_s3 = inlined_call_operand.vmem [shape: f32[1,128], index: 3, kind: input, shape index: {}]   ;;  %s2750_s4 = inlined_call_operand.vmem [shape: bf16[32,128], index: 4, kind: output, shape index: {}]  }
   0x1   :  { %v2101_v0 = vld [vmem:[%s2746_s1 + $0x40] sm:$0xff]   ;;  %v2105_v4 = vld [vmem:[%s2746_s1 + $0x48] sm:$0xff]   ;;  %v2109_v8 = vld [vmem:[%s2746_s1 + $0x50] sm:$0xff]  }
   0x2   :  { %v2102_v1 = vld [vmem:[%s2746_s1 + $0xc0] sm:$0xff]   ;;  %1877 = vmatprep.subr.bf16.mxu0 %v2101_v0  ;;  %v2106_v5 = vld [vmem:[%s2746_s1 + $0xc8] sm:$0xff]   ;;  %v2110_v9 = vld [vmem:[%s2746_s1 + $0xd0] sm:$0xff]  }
   0x3   :  { %v2103_v2 = vld [vmem:[%s2746_s1] sm:$0xff]   ;;  %1905 = vmatprep.subr.bf16.mxu1 %v2102_v1  ;;  %v2107_v6 = vld [vmem:[%s2746_s1 + $0x8] sm:$0xff]   ;;  %v2111_v10 = vld [vmem:[%s2746_s1 + $0x10] sm:$0xff]  }
   0x4   :  { %v2104_v3 = vld [vmem:[%s2746_s1 + $0x80] sm:$0xff]   ;;  %1878 = vmatpush3.bf16.msra.mxu0 %v2103_v2  ;;  %v2108_v7 = vld [vmem:[%s2746_s1 + $0x88] sm:$0xff]   ;;  %v2112_v11 = vld [vmem:[%s2746_s1 + $0x90] sm:$0xff]  }
   0x5   :  { %1906 = vmatpush3.bf16.msra.mxu1 %v2104_v3  ;;  %1879 = vmatprep.subr.bf16.mxu0 %v2105_v4  ;;  %v2113_v12 = vld [vmem:[%s2746_s1 + $0x58] sm:$0xff]   ;;  %v2117_v16 = vld [vmem:[%s2746_s1 + $0x60] sm:$0xff]   ;;  %v2121_v20 = vld [vmem:[%s2746_s1 + $0x68] sm:$0xff]  }
   0x6   :  { %1907 = vmatprep.subr.bf16.mxu1 %v2106_v5  ;;  %v2114_v13 = vld [vmem:[%s2746_s1 + $0xd8] sm:$0xff]   ;;  %v2118_v17 = vld [vmem:[%s2746_s1 + $0xe0] sm:$0xff]   ;;  %v2122_v21 = vld [vmem:[%s2746_s1 + $0xe8] sm:$0xff]  }
   0x7   :  { %v2115_v14 = vld [vmem:[%s2746_s1 + $0x18] sm:$0xff]   ;;  %v2119_v18 = vld [vmem:[%s2746_s1 + $0x20] sm:$0xff]   ;;  %v2123_v22 = vld [vmem:[%s2746_s1 + $0x28] sm:$0xff]  }
   0x8   :  { %1880 = vmatpush3.bf16.msra.mxu0 %v2107_v6  ;;  %v2116_v15 = vld [vmem:[%s2746_s1 + $0x98] sm:$0xff]   ;;  %v2120_v19 = vld [vmem:[%s2746_s1 + $0xa0] sm:$0xff]   ;;  %v2124_v23 = vld [vmem:[%s2746_s1 + $0xa8] sm:$0xff]  }
   0x9   :  { %1908 = vmatpush3.bf16.msra.mxu1 %v2108_v7  ;;  %1881 = vmatprep.subr.bf16.mxu0 %v2109_v8  ;;  %v2125_v24 = vld [vmem:[%s2746_s1 + $0x70] sm:$0xff]   ;;  %v2129_v28 = vld [vmem:[%s2746_s1 + $0x78] sm:$0xff]   ;;  %v18_v32 = vld [vmem:[%s2747_s0] sm:$0xff] }
   0xa   :  { %1909 = vmatprep.subr.bf16.mxu1 %v2110_v9  ;;  %v2126_v25 = vld [vmem:[%s2746_s1 + $0xf0] sm:$0xff]   ;;  %v2130_v29 = vld [vmem:[%s2746_s1 + $0xf8] sm:$0xff]   ;;  %v26_v33 = vld [vmem:[%s2747_s0 + $0x40] sm:$0xff] }
   0xb   :  { %v2127_v26 = vld [vmem:[%s2746_s1 + $0x30] sm:$0xff]   ;;  %v2131_v30 = vld [vmem:[%s2746_s1 + $0x38] sm:$0xff]   ;;  %v19_v34 = vld [vmem:[%s2747_s0 + $0x8] sm:$0xff]  ;;  %v1696_v35 = vcombine.low %v18_v32, %v26_v33  ;;  %v1697_v36 = vcombine.high %v18_v32, %v26_v33 }
   0xc   :  { %1882 = vmatpush3.bf16.msra.mxu0 %v2111_v10  ;;  %v2128_v27 = vld [vmem:[%s2746_s1 + $0xb0] sm:$0xff]   ;;  %v2132_v31 = vld [vmem:[%s2746_s1 + $0xb8] sm:$0xff]   ;;  %v27_v37 = vld [vmem:[%s2747_s0 + $0x48] sm:$0xff] }
   0xd   :  { %1910 = vmatpush3.bf16.msra.mxu1 %v2112_v11  ;;  %1883 = vmatprep.subr.bf16.mxu0 %v2113_v12  ;;  %v1698_v38 = vcombine.low %v19_v34, %v27_v37  ;;  %v1699_v39 = vcombine.high %v19_v34, %v27_v37  ;;  %v2133_v40 = vld [vmem:[%s2746_s1 + $0x140] sm:$0xff]   ;;  %v2137_v44 = vld [vmem:[%s2746_s1 + $0x148] sm:$0xff]   ;;  %v2141_v48 = vld [vmem:[%s2746_s1 + $0x150] sm:$0xff]  }
   0xe   :  { %1911 = vmatprep.subr.bf16.mxu1 %v2114_v13  ;;  %1266 = vmatprep.mubr.bf16.mxu0 %v1697_v36  ;;  %v2134_v41 = vld [vmem:[%s2746_s1 + $0x1c0] sm:$0xff]   ;;  %v2138_v45 = vld [vmem:[%s2746_s1 + $0x1c8] sm:$0xff]   ;;  %v2142_v49 = vld [vmem:[%s2746_s1 + $0x1d0] sm:$0xff]  }
   0xf   :  { %1315 = vmatprep.mubr.bf16.mxu1 %v1699_v39  ;;  %v2135_v42 = vld [vmem:[%s2746_s1 + $0x100] sm:$0xff]   ;;  %v2139_v46 = vld [vmem:[%s2746_s1 + $0x108] sm:$0xff]   ;;  %v2143_v50 = vld [vmem:[%s2746_s1 + $0x110] sm:$0xff]  }
  0x10   :  { %1884 = vmatpush3.bf16.msra.mxu0 %v2115_v14  ;;  %v2136_v43 = vld [vmem:[%s2746_s1 + $0x180] sm:$0xff]   ;;  %v2140_v47 = vld [vmem:[%s2746_s1 + $0x188] sm:$0xff]   ;;  %v2144_v51 = vld [vmem:[%s2746_s1 + $0x190] sm:$0xff]  }
  0x11   :  { %1912 = vmatpush3.bf16.msra.mxu1 %v2116_v15  ;;  %1885 = vmatprep.subr.bf16.mxu0 %v2117_v16  ;;  %v2145_v52 = vld [vmem:[%s2746_s1 + $0x158] sm:$0xff]   ;;  %v2149_v56 = vld [vmem:[%s2746_s1 + $0x160] sm:$0xff]   ;;  %v2153_v60 = vld [vmem:[%s2746_s1 + $0x168] sm:$0xff]  }
  0x12   :  { %1913 = vmatprep.subr.bf16.mxu1 %v2118_v17  ;;  %v2146_v53 = vld [vmem:[%s2746_s1 + $0x1d8] sm:$0xff]   ;;  %v2150_v57 = vld [vmem:[%s2746_s1 + $0x1e0] sm:$0xff]   ;;  %v2154_v61 = vld [vmem:[%s2746_s1 + $0x1e8] sm:$0xff]  }
  0x13   :  { %v2147_v54 = vld [vmem:[%s2746_s1 + $0x118] sm:$0xff]   ;;  %v2151_v58 = vld [vmem:[%s2746_s1 + $0x120] sm:$0xff]   ;;  %v35_v1 = vld [vmem:[%s2747_s0 + $0x88] sm:$0xff] }
  0x14   :  { %1886 = vmatpush3.bf16.msra.mxu0 %v2119_v18  ;;  %v2148_v55 = vld [vmem:[%s2746_s1 + $0x198] sm:$0xff]   ;;  %v2152_v59 = vld [vmem:[%s2746_s1 + $0x1a0] sm:$0xff]   ;;  %v43_v2 = vld [vmem:[%s2747_s0 + $0xc8] sm:$0xff] }
  0x15   :  { %1914 = vmatpush3.bf16.msra.mxu1 %v2120_v19  ;;  %1887 = vmatprep.subr.bf16.mxu0 %v2121_v20  ;;  %v34_v62 = vld [vmem:[%s2747_s0 + $0x80] sm:$0xff]  ;;  %v1715_v4 = vcombine.high %v35_v1, %v43_v2  ;;  %v2155_v5 = vld [vmem:[%s2746_s1 + $0x128] sm:$0xff]   ;;  %v1714_v6 = vcombine.low %v35_v1, %v43_v2  ;;  %v2157_v8 = vld [vmem:[%s2746_s1 + $0x170] sm:$0xff]  }
  0x16   :  { %1915 = vmatprep.subr.bf16.mxu1 %v2122_v21  ;;  %v42_v63 = vld [vmem:[%s2747_s0 + $0xc0] sm:$0xff]  ;;  %v2156_v7 = vld [vmem:[%s2746_s1 + $0x1a8] sm:$0xff]   ;;  %v2158_v9 = vld [vmem:[%s2746_s1 + $0x1f0] sm:$0xff]  }
  0x17   :  { %v1713_v0 = vcombine.high %v34_v62, %v42_v63  ;;  %v1712_v3 = vcombine.low %v34_v62, %v42_v63  ;;  %v2159_v10 = vld [vmem:[%s2746_s1 + $0x130] sm:$0xff]   ;;  %v2161_v12 = vld [vmem:[%s2746_s1 + $0x178] sm:$0xff]   ;;  %v30_v1 = vld [vmem:[%s2747_s0 + $0x60] sm:$0xff] }
  0x18   :  { %1888 = vmatpush3.bf16.msra.mxu0 %v2123_v22  ;;  %v2160_v11 = vld [vmem:[%s2746_s1 + $0x1b0] sm:$0xff]   ;;  %v2162_v13 = vld [vmem:[%s2746_s1 + $0x1f8] sm:$0xff]  }
  0x19   :  { %1916 = vmatpush3.bf16.msra.mxu1 %v2124_v23  ;;  %1889 = vmatprep.subr.bf16.mxu0 %v2125_v24  ;;  %v2163_v14 = vld [vmem:[%s2746_s1 + $0x138] sm:$0xff]   ;;  %v20_v16 = vld [vmem:[%s2747_s0 + $0x10] sm:$0xff]  ;;  %v2165_v24 = vld [vmem:[%s2746_s1 + $0x240] sm:$0xff]  }
  0x1a   :  { %1917 = vmatprep.subr.bf16.mxu1 %v2126_v25  ;;  %v2164_v15 = vld [vmem:[%s2746_s1 + $0x1b8] sm:$0xff]   ;;  %v28_v17 = vld [vmem:[%s2747_s0 + $0x50] sm:$0xff]  ;;  %v2166_v25 = vld [vmem:[%s2746_s1 + $0x2c0] sm:$0xff]  }
  0x1b   :  { %v21_v18 = vld [vmem:[%s2747_s0 + $0x18] sm:$0xff]  ;;  %v1700_v20 = vcombine.low %v20_v16, %v28_v17  ;;  %v1701_v21 = vcombine.high %v20_v16, %v28_v17  ;;  %v36_v32 = vld [vmem:[%s2747_s0 + $0x90] sm:$0xff]  ;;  %v38_v16 = vld [vmem:[%s2747_s0 + $0xa0] sm:$0xff] }
  0x1c   :  { %1890 = vmatpush3.bf16.msra.mxu0 %v2127_v26  ;;  %v29_v19 = vld [vmem:[%s2747_s0 + $0x58] sm:$0xff]  ;;  %v2167_v26 = vld [vmem:[%s2746_s1 + $0x200] sm:$0xff]   ;;  %v44_v33 = vld [vmem:[%s2747_s0 + $0xd0] sm:$0xff] }
  0x1d   :  { %1918 = vmatpush3.bf16.msra.mxu1 %v2128_v27  ;;  %1891 = vmatprep.subr.bf16.mxu0 %v2129_v28  ;;  %v1702_v22 = vcombine.low %v21_v18, %v29_v19  ;;  %v1703_v23 = vcombine.high %v21_v18, %v29_v19  ;;  %v2168_v27 = vld [vmem:[%s2746_s1 + $0x280] sm:$0xff]   ;;  %v2169_v28 = vld [vmem:[%s2746_s1 + $0x248] sm:$0xff]   ;;  %v1717_v34 = vcombine.high %v36_v32, %v44_v33  ;;  %v2173_v36 = vld [vmem:[%s2746_s1 + $0x250] sm:$0xff]  }
  0x1e   :  { %1919 = vmatprep.subr.bf16.mxu1 %v2130_v29  ;;  %v2170_v29 = vld [vmem:[%s2746_s1 + $0x2c8] sm:$0xff]   ;;  %v2174_v37 = vld [vmem:[%s2746_s1 + $0x2d0] sm:$0xff]   ;;  %v45_v39 = vld [vmem:[%s2747_s0 + $0xd8] sm:$0xff] }
  0x1f   :  { %v2195_v62 = vld [vmem:[%s2746_s1 + $0x238] sm:$0xff]   ;;  %v46_v17 = vld [vmem:[%s2747_s0 + $0xe0] sm:$0xff] }
  0x20   :  { %1892 = vmatpush3.bf16.msra.mxu0 %v2131_v30  ;;  %v2171_v30 = vld [vmem:[%s2746_s1 + $0x208] sm:$0xff]   ;;  %v2196_v63 = vld [vmem:[%s2746_s1 + $0x2b8] sm:$0xff]   ;;  %v1721_v18 = vcombine.high %v38_v16, %v46_v17  ;;  %v1720_v19 = vcombine.low %v38_v16, %v46_v17 }
  0x21   :  { %1920 = vmatpush3.bf16.msra.mxu1 %v2132_v31  ;;  %1933 = vmatprep.subr.bf16.mxu0 %v2133_v40  ;;  %v2172_v31 = vld [vmem:[%s2746_s1 + $0x288] sm:$0xff]  }
  0x22   :  { %1961 = vmatprep.subr.bf16.mxu1 %v2134_v41  ;;  %v2175_v41 = vld [vmem:[%s2746_s1 + $0x210] sm:$0xff]  }
  0x23   :  { %1267 = vmatmul.mubr.bf16.vlgmr.msra.gmra.mrb[0].mxu0 %v1696_v35  ;;  %v1716_v35 = vcombine.low %v36_v32, %v44_v33  ;;  %v2213_v32 = vld [vmem:[%s2746_s1 + $0x360] sm:$0xff]  }
  0x24   :  { %1316 = vmatmul.mubr.bf16.vlgmr.msra.gmra.mrb[0].mxu1 %v1698_v38  ;;  %1934 = vmatpush3.bf16.msra.mxu0 %v2135_v42  ;;  %v37_v38 = vld [vmem:[%s2747_s0 + $0x98] sm:$0xff]  ;;  %v2214_v33 = vld [vmem:[%s2746_s1 + $0x3e0] sm:$0xff]  }
  0x25   :  { %1962 = vmatpush3.bf16.msra.mxu1 %v2136_v43  ;;  %1935 = vmatprep.subr.bf16.mxu0 %v2137_v44  ;;  %v1719_v40 = vcombine.high %v37_v38, %v45_v39  ;;  %v1718_v42 = vcombine.low %v37_v38, %v45_v39  ;;  %v2176_v43 = vld [vmem:[%s2746_s1 + $0x290] sm:$0xff]   ;;  %v2177_v44 = vld [vmem:[%s2746_s1 + $0x258] sm:$0xff]   ;;  %v2219_v38 = vld [vmem:[%s2746_s1 + $0x328] sm:$0xff]  }
  0x26   :  { %1963 = vmatprep.subr.bf16.mxu1 %v2138_v45  ;;  %1274 = vmatprep.mubr.bf16.mxu0 %v1713_v0  ;;  %v2178_v45 = vld [vmem:[%s2746_s1 + $0x2d8] sm:$0xff]   ;;  %v22_v0 = vld [vmem:[%s2747_s0 + $0x20] sm:$0xff]  ;;  %v2220_v39 = vld [vmem:[%s2746_s1 + $0x3a8] sm:$0xff]  }
  0x27   :  { %1323 = vmatprep.mubr.bf16.mxu1 %v1715_v4  ;;  %v1704_v2 = vcombine.low %v22_v0, %v30_v1  ;;  %v23_v4 = vld [vmem:[%s2747_s0 + $0x28] sm:$0xff] }
  0x28   :  { %1936 = vmatpush3.bf16.msra.mxu0 %v2139_v46  ;;  %v2179_v46 = vld [vmem:[%s2746_s1 + $0x218] sm:$0xff]  }
  0x29   :  { %1964 = vmatpush3.bf16.msra.mxu1 %v2140_v47  ;;  %1937 = vmatprep.subr.bf16.mxu0 %v2141_v48  ;;  %v2180_v47 = vld [vmem:[%s2746_s1 + $0x298] sm:$0xff]   ;;  %v2181_v48 = vld [vmem:[%s2746_s1 + $0x260] sm:$0xff]  }
  0x2a   :  { %1965 = vmatprep.subr.bf16.mxu1 %v2142_v49  ;;  %v2182_v49 = vld [vmem:[%s2746_s1 + $0x2e0] sm:$0xff]  }
  0x2b   :  { %1275 = vmatmul.mubr.bf16.gmra.mrb[4].mxu0 %v1712_v3  ;;  %v1705_v3 = vcombine.high %v22_v0, %v30_v1 }
  0x2c   :  { %1938 = vmatpush3.bf16.msra.mxu0 %v2143_v50  ;;  %1324 = vmatmul.mubr.bf16.gmra.mrb[4].mxu1 %v1714_v6  ;;  %v2183_v50 = vld [vmem:[%s2746_s1 + $0x220] sm:$0xff]  }
  0x2d   :  { %1966 = vmatpush3.bf16.msra.mxu1 %v2144_v51  ;;  %1939 = vmatprep.subr.bf16.mxu0 %v2145_v52  ;;  %v2184_v51 = vld [vmem:[%s2746_s1 + $0x2a0] sm:$0xff]   ;;  %v2185_v52 = vld [vmem:[%s2746_s1 + $0x268] sm:$0xff]  }
  0x2e   :  { %1967 = vmatprep.subr.bf16.mxu1 %v2146_v53  ;;  %1364 = vmatprep.mubr.bf16.mxu0 %v1701_v21  ;;  %v2186_v53 = vld [vmem:[%s2746_s1 + $0x2e8] sm:$0xff]   ;;  %v2206_v21 = vld [vmem:[%s2746_s1 + $0x3d0] sm:$0xff]  }
  0x2f   :  { %1413 = vmatprep.mubr.bf16.mxu1 %v1703_v23  ;;  %v47_v23 = vld [vmem:[%s2747_s0 + $0xe8] sm:$0xff] }
  0x30   :  { %1940 = vmatpush3.bf16.msra.mxu0 %v2147_v54  ;;  %v2187_v54 = vld [vmem:[%s2746_s1 + $0x228] sm:$0xff]  }
  0x31   :  { %1968 = vmatpush3.bf16.msra.mxu1 %v2148_v55  ;;  %1941 = vmatprep.subr.bf16.mxu0 %v2149_v56  ;;  %v2188_v55 = vld [vmem:[%s2746_s1 + $0x2a8] sm:$0xff]   ;;  %v2189_v56 = vld [vmem:[%s2746_s1 + $0x270] sm:$0xff]  }
  0x32   :  { %1969 = vmatprep.subr.bf16.mxu1 %v2150_v57  ;;  %v2190_v57 = vld [vmem:[%s2746_s1 + $0x2f0] sm:$0xff]  }
  0x34   :  { %1942 = vmatpush3.bf16.msra.mxu0 %v2151_v58  ;;  %v2191_v58 = vld [vmem:[%s2746_s1 + $0x230] sm:$0xff]  }
  0x35   :  { %1970 = vmatpush3.bf16.msra.mxu1 %v2152_v59  ;;  %1943 = vmatprep.subr.bf16.mxu0 %v2153_v60  ;;  %v2192_v59 = vld [vmem:[%s2746_s1 + $0x2b0] sm:$0xff]   ;;  %v2193_v60 = vld [vmem:[%s2746_s1 + $0x278] sm:$0xff]  }
  0x36   :  { %1971 = vmatprep.subr.bf16.mxu1 %v2154_v61  ;;  %v2194_v61 = vld [vmem:[%s2746_s1 + $0x2f8] sm:$0xff]  }
  0x38   :  { %1944 = vmatpush3.bf16.msra.mxu0 %v2155_v5  ;;  %v31_v5 = vld [vmem:[%s2747_s0 + $0x68] sm:$0xff] }
  0x39   :  { %1972 = vmatpush3.bf16.msra.mxu1 %v2156_v7  ;;  %1945 = vmatprep.subr.bf16.mxu0 %v2157_v8  ;;  %v1706_v6 = vcombine.low %v23_v4, %v31_v5  ;;  %v1707_v7 = vcombine.high %v23_v4, %v31_v5  ;;  %v2197_v8 = vld [vmem:[%s2746_s1 + $0x340] sm:$0xff]  }
  0x3a   :  { %1973 = vmatprep.subr.bf16.mxu1 %v2158_v9  ;;  %v2198_v9 = vld [vmem:[%s2746_s1 + $0x3c0] sm:$0xff]  }
  0x3c   :  { %1946 = vmatpush3.bf16.msra.mxu0 %v2159_v10  ;;  %v2199_v10 = vld [vmem:[%s2746_s1 + $0x300] sm:$0xff]  }
  0x3d   :  { %1974 = vmatpush3.bf16.msra.mxu1 %v2160_v11  ;;  %1947 = vmatprep.subr.bf16.mxu0 %v2161_v12  ;;  %v2200_v11 = vld [vmem:[%s2746_s1 + $0x380] sm:$0xff]   ;;  %v2201_v12 = vld [vmem:[%s2746_s1 + $0x348] sm:$0xff]  }
  0x3e   :  { %1975 = vmatprep.subr.bf16.mxu1 %v2162_v13  ;;  %v2202_v13 = vld [vmem:[%s2746_s1 + $0x3c8] sm:$0xff]  }
  0x40   :  { %1948 = vmatpush3.bf16.msra.mxu0 %v2163_v14  ;;  %v2203_v14 = vld [vmem:[%s2746_s1 + $0x308] sm:$0xff]  }
  0x41   :  { %1976 = vmatpush3.bf16.msra.mxu1 %v2164_v15  ;;  %1989 = vmatprep.subr.bf16.mxu0 %v2165_v24  ;;  %v2204_v15 = vld [vmem:[%s2746_s1 + $0x388] sm:$0xff]  }
  0x42   :  { %2017 = vmatprep.subr.bf16.mxu1 %v2166_v25  ;;  %v2207_v25 = vld [vmem:[%s2746_s1 + $0x310] sm:$0xff]  }
  0x43   :  { %1365 = vmatmul.mubr.bf16.vlgmr.msra.gmra.mrb[8].mxu0 %v1700_v20  ;;  %v2205_v20 = vld [vmem:[%s2746_s1 + $0x350] sm:$0xff]  }
  0x44   :  { %1414 = vmatmul.mubr.bf16.vlgmr.msra.gmra.mrb[8].mxu1 %v1702_v22  ;;  %1990 = vmatpush3.bf16.msra.mxu0 %v2167_v26  ;;  %v39_v22 = vld [vmem:[%s2747_s0 + $0xa8] sm:$0xff] }
  0x45   :  { %2018 = vmatpush3.bf16.msra.mxu1 %v2168_v27  ;;  %1991 = vmatprep.subr.bf16.mxu0 %v2169_v28  ;;  %v1723_v24 = vcombine.high %v39_v22, %v47_v23  ;;  %v1722_v26 = vcombine.low %v39_v22, %v47_v23  ;;  %v2208_v27 = vld [vmem:[%s2746_s1 + $0x390] sm:$0xff]   ;;  %v2209_v28 = vld [vmem:[%s2746_s1 + $0x358] sm:$0xff]  }
  0x46   :  { %2019 = vmatprep.subr.bf16.mxu1 %v2170_v29  ;;  %1372 = vmatprep.mubr.bf16.mxu0 %v1717_v34  ;;  %v2210_v29 = vld [vmem:[%s2746_s1 + $0x3d8] sm:$0xff]   ;;  %v2215_v34 = vld [vmem:[%s2746_s1 + $0x320] sm:$0xff]  }
  0x47   :  { %1421 = vmatprep.mubr.bf16.mxu1 %v1719_v40  ;;  %v2221_v40 = vld [vmem:[%s2746_s1 + $0x370] sm:$0xff]  }
  0x48   :  { %1992 = vmatpush3.bf16.msra.mxu0 %v2171_v30  ;;  %v2211_v30 = vld [vmem:[%s2746_s1 + $0x318] sm:$0xff]  }
  0x49   :  { %2020 = vmatpush3.bf16.msra.mxu1 %v2172_v31  ;;  %1993 = vmatprep.subr.bf16.mxu0 %v2173_v36  ;;  %v2212_v31 = vld [vmem:[%s2746_s1 + $0x398] sm:$0xff]   ;;  %v2217_v36 = vld [vmem:[%s2746_s1 + $0x368] sm:$0xff]  }
  0x4a   :  { %2021 = vmatprep.subr.bf16.mxu1 %v2174_v37  ;;  %v2218_v37 = vld [vmem:[%s2746_s1 + $0x3e8] sm:$0xff]  }
  0x4b   :  { %1373 = vmatmul.mubr.bf16.gmra.mrb[12].mxu0 %v1716_v35  ;;  %v2216_v35 = vld [vmem:[%s2746_s1 + $0x3a0] sm:$0xff]  }
  0x4c   :  { %1994 = vmatpush3.bf16.msra.mxu0 %v2175_v41  ;;  %1422 = vmatmul.mubr.bf16.gmra.mrb[12].mxu1 %v1718_v42  ;;  %v2222_v41 = vld [vmem:[%s2746_s1 + $0x3f0] sm:$0xff]  }
  0x4d   :  { %2022 = vmatpush3.bf16.msra.mxu1 %v2176_v43  ;;  %1995 = vmatprep.subr.bf16.mxu0 %v2177_v44  ;;  %v2223_v42 = vld [vmem:[%s2746_s1 + $0x330] sm:$0xff]   ;;  %v2225_v44 = vld [vmem:[%s2746_s1 + $0x378] sm:$0xff]  }
  0x4e   :  { %2023 = vmatprep.subr.bf16.mxu1 %v2178_v45  ;;  %1462 = vmatprep.mubr.bf16.mxu0 %v1705_v3  ;;  %v2224_v43 = vld [vmem:[%s2746_s1 + $0x3b0] sm:$0xff]   ;;  %v2226_v45 = vld [vmem:[%s2746_s1 + $0x3f8] sm:$0xff]  }
  0x4f   :  { %1511 = vmatprep.mubr.bf16.mxu1 %v1707_v7 }
  0x50   :  { %1996 = vmatpush3.bf16.msra.mxu0 %v2179_v46  ;;  %v2227_v46 = vld [vmem:[%s2746_s1 + $0x338] sm:$0xff]  }
  0x51   :  { %2024 = vmatpush3.bf16.msra.mxu1 %v2180_v47  ;;  %1997 = vmatprep.subr.bf16.mxu0 %v2181_v48  ;;  %v2228_v47 = vld [vmem:[%s2746_s1 + $0x3b8] sm:$0xff]   ;;  %v24_v48 = vld [vmem:[%s2747_s0 + $0x30] sm:$0xff] }
  0x52   :  { %2025 = vmatprep.subr.bf16.mxu1 %v2182_v49  ;;  %v32_v49 = vld [vmem:[%s2747_s0 + $0x70] sm:$0xff] }
  0x54   :  { %1998 = vmatpush3.bf16.msra.mxu0 %v2183_v50  ;;  %v25_v50 = vld [vmem:[%s2747_s0 + $0x38] sm:$0xff] }
  0x55   :  { %2026 = vmatpush3.bf16.msra.mxu1 %v2184_v51  ;;  %1999 = vmatprep.subr.bf16.mxu0 %v2185_v52  ;;  %v1708_v51 = vcombine.low %v24_v48, %v32_v49  ;;  %v1709_v52 = vcombine.high %v24_v48, %v32_v49 }
  0x56   :  { %2027 = vmatprep.subr.bf16.mxu1 %v2186_v53  ;;  %v33_v53 = vld [vmem:[%s2747_s0 + $0x78] sm:$0xff] }
  0x58   :  { %2000 = vmatpush3.bf16.msra.mxu0 %v2187_v54  ;;  %v40_v54 = vld [vmem:[%s2747_s0 + $0xb0] sm:$0xff] }
  0x59   :  { %2028 = vmatpush3.bf16.msra.mxu1 %v2188_v55  ;;  %2001 = vmatprep.subr.bf16.mxu0 %v2189_v56  ;;  %v48_v55 = vld [vmem:[%s2747_s0 + $0xf0] sm:$0xff]  ;;  %v1710_v56 = vcombine.low %v25_v50, %v33_v53 }
  0x5a   :  { %2029 = vmatprep.subr.bf16.mxu1 %v2190_v57  ;;  %v1711_v57 = vcombine.high %v25_v50, %v33_v53 }
  0x5c   :  { %2002 = vmatpush3.bf16.msra.mxu0 %v2191_v58  ;;  %v1725_v58 = vcombine.high %v40_v54, %v48_v55 }
  0x5d   :  { %2030 = vmatpush3.bf16.msra.mxu1 %v2192_v59  ;;  %2003 = vmatprep.subr.bf16.mxu0 %v2193_v60  ;;  %v41_v59 = vld [vmem:[%s2747_s0 + $0xb8] sm:$0xff] }
  0x5e   :  { %2031 = vmatprep.subr.bf16.mxu1 %v2194_v61  ;;  %v49_v60 = vld [vmem:[%s2747_s0 + $0xf8] sm:$0xff] }
  0x5f   :  { %v1727_v61 = vcombine.high %v41_v59, %v49_v60 }
  0x60   :  { %2004 = vmatpush3.bf16.msra.mxu0 %v2195_v62  ;;  %v1724_v62 = vcombine.low %v40_v54, %v48_v55 }
  0x61   :  { %2032 = vmatpush3.bf16.msra.mxu1 %v2196_v63  ;;  %2045 = vmatprep.subr.bf16.mxu0 %v2197_v8  ;;  %v1726_v63 = vcombine.low %v41_v59, %v49_v60 }
  0x62   :  { %2073 = vmatprep.subr.bf16.mxu1 %v2198_v9 }
  0x63   :  { %1463 = vmatmul.mubr.bf16.vlgmr.msra.gmra.mrb[16].mxu0 %v1704_v2 }
  0x64   :  { %1512 = vmatmul.mubr.bf16.vlgmr.msra.gmra.mrb[16].mxu1 %v1706_v6  ;;  %2046 = vmatpush3.bf16.msra.mxu0 %v2199_v10 }
  0x65   :  { %2074 = vmatpush3.bf16.msra.mxu1 %v2200_v11  ;;  %2047 = vmatprep.subr.bf16.mxu0 %v2201_v12 }
  0x66   :  { %2075 = vmatprep.subr.bf16.mxu1 %v2202_v13  ;;  %1470 = vmatprep.mubr.bf16.mxu0 %v1721_v18 }
  0x67   :  { %1519 = vmatprep.mubr.bf16.mxu1 %v1723_v24 }
  0x68   :  { %2048 = vmatpush3.bf16.msra.mxu0 %v2203_v14 }
  0x69   :  { %2076 = vmatpush3.bf16.msra.mxu1 %v2204_v15  ;;  %2049 = vmatprep.subr.bf16.mxu0 %v2205_v20 }
  0x6a   :  { %2077 = vmatprep.subr.bf16.mxu1 %v2206_v21 }
  0x6b   :  { %1471 = vmatmul.mubr.bf16.gmra.mrb[20].mxu0 %v1720_v19 }
  0x6c   :  { %2050 = vmatpush3.bf16.msra.mxu0 %v2207_v25  ;;  %1520 = vmatmul.mubr.bf16.gmra.mrb[20].mxu1 %v1722_v26 }
  0x6d   :  { %2078 = vmatpush3.bf16.msra.mxu1 %v2208_v27  ;;  %2051 = vmatprep.subr.bf16.mxu0 %v2209_v28 }
  0x6e   :  { %2079 = vmatprep.subr.bf16.mxu1 %v2210_v29  ;;  %1560 = vmatprep.mubr.bf16.mxu0 %v1709_v52 }
  0x6f   :  { %1609 = vmatprep.mubr.bf16.mxu1 %v1711_v57 }
  0x70   :  { %2052 = vmatpush3.bf16.msra.mxu0 %v2211_v30 }
  0x71   :  { %2080 = vmatpush3.bf16.msra.mxu1 %v2212_v31  ;;  %2053 = vmatprep.subr.bf16.mxu0 %v2213_v32 }
  0x72   :  { %2081 = vmatprep.subr.bf16.mxu1 %v2214_v33 }
  0x74   :  { %2054 = vmatpush3.bf16.msra.mxu0 %v2215_v34 }
  0x75   :  { %2082 = vmatpush3.bf16.msra.mxu1 %v2216_v35  ;;  %2055 = vmatprep.subr.bf16.mxu0 %v2217_v36 }
  0x76   :  { %2083 = vmatprep.subr.bf16.mxu1 %v2218_v37 }
  0x78   :  { %2056 = vmatpush3.bf16.msra.mxu0 %v2219_v38 }
  0x79   :  { %2084 = vmatpush3.bf16.msra.mxu1 %v2220_v39  ;;  %2057 = vmatprep.subr.bf16.mxu0 %v2221_v40 }
  0x7a   :  { %2085 = vmatprep.subr.bf16.mxu1 %v2222_v41 }
  0x7c   :  { %2058 = vmatpush3.bf16.msra.mxu0 %v2223_v42 }
  0x7d   :  { %2086 = vmatpush3.bf16.msra.mxu1 %v2224_v43  ;;  %2059 = vmatprep.subr.bf16.mxu0 %v2225_v44 }
  0x7e   :  { %2087 = vmatprep.subr.bf16.mxu1 %v2226_v45 }
  0x80   :  { %2060 = vmatpush3.bf16.msra.mxu0 %v2227_v46 }
  0x81   :  { %2088 = vmatpush3.bf16.msra.mxu1 %v2228_v47 }
  0x83   :  { %1561 = vmatmul.mubr.bf16.vlgmr.msra.gmra.mrb[24].mxu0 %v1708_v51 }
  0x84   :  { %1610 = vmatmul.mubr.bf16.vlgmr.msra.gmra.mrb[24].mxu1 %v1710_v56  ;;  %1568 = vmatprep.mubr.bf16.mxu0 %v1725_v58 }
  0x85   :  { %1617 = vmatprep.mubr.bf16.mxu1 %v1727_v61 }
  0x8b   :  { %1569 = vmatmul.mubr.bf16.gmra.mrb[28].mxu0 %v1724_v62 }
  0x8c   :  { %1618 = vmatmul.mubr.bf16.gmra.mrb[28].mxu1 %v1726_v63 }
  0xf6   :  { %v1893_v0 = vpop.f32.mrb[0].mxu0 }
  0xf7   :  { %v1921_v1 = vpop.f32.mrb[0].mxu1  ;;  %v1894_v2 = vpop.f32.mrb[1].mxu0 }
  0xf8   :  { %v1895_v3 = vadd.f32 %v1894_v2, %v1893_v0  ;;  %v1922_v4 = vpop.f32.mrb[1].mxu1  ;;  %v1896_v5 = vpop.f32.mrb[2].mxu0 }
  0xf9   :  { %v1923_v6 = vadd.f32 %v1922_v4, %v1921_v1  ;;  %v1924_v7 = vpop.f32.mrb[2].mxu1  ;;  %v1897_v8 = vpop.f32.mrb[3].mxu0 }
  0xfa   :  { %v1898_v9 = vadd.f32 %v1897_v8, %v1896_v5  ;;  %v1925_v10 = vpop.f32.mrb[3].mxu1 }
  0xfb   :  { %v1318_v11 = vadd.f32 %v1923_v6, %v1895_v3  ;;  %v1926_v12 = vadd.f32 %v1925_v10, %v1924_v7 }
  0xfd   :  { %v1321_v13 = vadd.f32 %v1926_v12, %v1898_v9 }
  0xfe   :  { %v1899_v14 = vpop.f32.mrb[4].mxu0 }
  0xff   :  { %v1927_v15 = vpop.f32.mrb[4].mxu1  ;;  %v1900_v16 = vpop.f32.mrb[5].mxu0 }
 0x100   :  { %v1901_v17 = vadd.f32 %v1900_v16, %v1899_v14  ;;  %v1928_v18 = vpop.f32.mrb[5].mxu1  ;;  %v1902_v19 = vpop.f32.mrb[6].mxu0 }
 0x101   :  { %v1929_v20 = vadd.f32 %v1928_v18, %v1927_v15  ;;  %v1930_v21 = vpop.f32.mrb[6].mxu1  ;;  %v1903_v22 = vpop.f32.mrb[7].mxu0 }
 0x102   :  { %v1904_v23 = vadd.f32 %v1903_v22, %v1902_v19  ;;  %v1931_v24 = vpop.f32.mrb[7].mxu1 }
 0x103   :  { %v1326_v25 = vadd.f32 %v1929_v20, %v1901_v17  ;;  %v1932_v26 = vadd.f32 %v1931_v24, %v1930_v21 }
 0x105   :  { %v1329_v27 = vadd.f32 %v1932_v26, %v1904_v23 }
 0x116   :  { %v1949_v28 = vpop.f32.mrb[8].mxu0 }
 0x117   :  { %v1977_v29 = vpop.f32.mrb[8].mxu1  ;;  %v1950_v30 = vpop.f32.mrb[9].mxu0 }
 0x118   :  { %v1978_v31 = vpop.f32.mrb[9].mxu1  ;;  %v1951_v32 = vadd.f32 %v1950_v30, %v1949_v28  ;;  %v1952_v34 = vpop.f32.mrb[10].mxu0 }
 0x119   :  { %v1979_v33 = vadd.f32 %v1978_v31, %v1977_v29  ;;  %v1980_v35 = vpop.f32.mrb[10].mxu1  ;;  %v1953_v36 = vpop.f32.mrb[11].mxu0 }
 0x11a   :  { %v1981_v37 = vpop.f32.mrb[11].mxu1  ;;  %v1367_v38 = vadd.f32 %v1951_v32, %v1318_v11  ;;  %v1954_v39 = vadd.f32 %v1953_v36, %v1952_v34 }
 0x11b   :  { %v1982_v40 = vadd.f32 %v1981_v37, %v1980_v35 }
 0x11c   :  { %v1416_v41 = vadd.f32 %v1979_v33, %v1367_v38  ;;  %v1370_v42 = vadd.f32 %v1954_v39, %v1321_v13 }
 0x11e   :  { %v1419_v43 = vadd.f32 %v1982_v40, %v1370_v42  ;;  %v1955_v44 = vpop.f32.mrb[12].mxu0 }
 0x11f   :  { %v1956_v45 = vpop.f32.mrb[13].mxu0  ;;  %v1983_v50 = vpop.f32.mrb[12].mxu1 }
 0x120   :  { %v1957_v46 = vadd.f32 %v1956_v45, %v1955_v44  ;;  %v1958_v47 = vpop.f32.mrb[14].mxu0  ;;  %v1984_v52 = vpop.f32.mrb[13].mxu1 }
 0x121   :  { %v1959_v48 = vpop.f32.mrb[15].mxu0  ;;  %v1985_v54 = vadd.f32 %v1984_v52, %v1983_v50  ;;  %v1986_v55 = vpop.f32.mrb[14].mxu1 }
 0x122   :  { %v1375_v49 = vadd.f32 %v1957_v46, %v1326_v25  ;;  %v1960_v51 = vadd.f32 %v1959_v48, %v1958_v47  ;;  %v1987_v56 = vpop.f32.mrb[15].mxu1  ;;  %v1857_v47 = vld [vmem:[%s2749_s3] ss:$0 sm:$0xff] }
 0x123   :  { %v1988_v58 = vadd.f32 %v1987_v56, %v1986_v55 }
 0x124   :  { %v1378_v53 = vadd.f32 %v1960_v51, %v1329_v27  ;;  %v1424_v57 = vadd.f32 %v1985_v54, %v1375_v49 }
 0x126   :  { %v1427_v59 = vadd.f32 %v1988_v58, %v1378_v53 }
 0x136   :  { %v2005_v60 = vpop.f32.mrb[16].mxu0 }
 0x137   :  { %v2033_v61 = vpop.f32.mrb[16].mxu1  ;;  %v2006_v62 = vpop.f32.mrb[17].mxu0 }
 0x138   :  { %v2007_v63 = vadd.f32 %v2006_v62, %v2005_v60  ;;  %v2034_v0 = vpop.f32.mrb[17].mxu1  ;;  %v2008_v1 = vpop.f32.mrb[18].mxu0 }
 0x139   :  { %v2035_v2 = vadd.f32 %v2034_v0, %v2033_v61  ;;  %v2036_v3 = vpop.f32.mrb[18].mxu1  ;;  %v2009_v4 = vpop.f32.mrb[19].mxu0 }
 0x13a   :  { %v1465_v5 = vadd.f32 %v2007_v63, %v1416_v41  ;;  %v2010_v6 = vadd.f32 %v2009_v4, %v2008_v1  ;;  %v2037_v7 = vpop.f32.mrb[19].mxu1 }
 0x13b   :  { %v2038_v8 = vadd.f32 %v2037_v7, %v2036_v3 }
 0x13c   :  { %v1514_v9 = vadd.f32 %v2035_v2, %v1465_v5  ;;  %v1468_v10 = vadd.f32 %v2010_v6, %v1419_v43  ;;  %v1856_v43 = vld [vmem:[%s2748_s2] ss:$0 sm:$0xff] }
 0x13e   :  { %v1517_v11 = vadd.f32 %v2038_v8, %v1468_v10  ;;  %v2011_v12 = vpop.f32.mrb[20].mxu0 }
 0x13f   :  { %v2012_v13 = vpop.f32.mrb[21].mxu0  ;;  %v2039_v16 = vpop.f32.mrb[20].mxu1 }
 0x140   :  { %v2013_v14 = vadd.f32 %v2012_v13, %v2011_v12  ;;  %v2014_v15 = vpop.f32.mrb[22].mxu0  ;;  %v2040_v20 = vpop.f32.mrb[21].mxu1 }
 0x141   :  { %v2015_v17 = vpop.f32.mrb[23].mxu0  ;;  %v2041_v21 = vadd.f32 %v2040_v20, %v2039_v16  ;;  %v2042_v22 = vpop.f32.mrb[22].mxu1 }
 0x142   :  { %v1473_v18 = vadd.f32 %v2013_v14, %v1424_v57  ;;  %v2016_v19 = vadd.f32 %v2015_v17, %v2014_v15  ;;  %v2043_v24 = vpop.f32.mrb[23].mxu1 }
 0x143   :  { %v2044_v26 = vadd.f32 %v2043_v24, %v2042_v22 }
 0x144   :  { %v1476_v23 = vadd.f32 %v2016_v19, %v1427_v59  ;;  %v1522_v25 = vadd.f32 %v2041_v21, %v1473_v18 }
 0x146   :  { %v1525_v27 = vadd.f32 %v2044_v26, %v1476_v23 }
 0x156   :  { %v2061_v28 = vpop.f32.mrb[24].mxu0 }
 0x157   :  { %v2089_v29 = vpop.f32.mrb[24].mxu1  ;;  %v2062_v30 = vpop.f32.mrb[25].mxu0 }
 0x158   :  { %v2063_v31 = vadd.f32 %v2062_v30, %v2061_v28  ;;  %v2090_v32 = vpop.f32.mrb[25].mxu1  ;;  %v2064_v33 = vpop.f32.mrb[26].mxu0 }
 0x159   :  { %v2091_v34 = vadd.f32 %v2090_v32, %v2089_v29  ;;  %v2092_v35 = vpop.f32.mrb[26].mxu1  ;;  %v2065_v36 = vpop.f32.mrb[27].mxu0 }
 0x15a   :  { %v1563_v37 = vadd.f32 %v2063_v31, %v1514_v9  ;;  %v2066_v38 = vadd.f32 %v2065_v36, %v2064_v33  ;;  %v2093_v39 = vpop.f32.mrb[27].mxu1 }
 0x15b   :  { %v2094_v40 = vadd.f32 %v2093_v39, %v2092_v35 }
 0x15c   :  { %v1612_v41 = vadd.f32 %v2091_v34, %v1563_v37  ;;  %v1566_v42 = vadd.f32 %v2066_v38, %v1517_v11 }
 0x15e   :  { %vm1628_vm0 = vcmp.ge.f32.partialorder %v1612_v41, 0.0  ;;  %v1632_v44 = vmul.f32 0.2, %v1612_v41  ;;  %v1615_v45 = vadd.f32 %v2094_v40, %v1566_v42  ;;  %v2067_v46 = vpop.f32.mrb[28].mxu0 }
 0x15f   :  { %v2095_v48 = vpop.f32.mrb[28].mxu1  ;;  %v2068_v49 = vpop.f32.mrb[29].mxu0 }
 0x160   :  { %v1636_v50 = vsel %vm1628_vm0, %v1612_v41, %v1632_v44  ;;  %vm1629_vm1 = vcmp.ge.f32.partialorder %v1615_v45, 0.0  ;;  %v1633_v51 = vmul.f32 0.2, %v1615_v45  ;;  %v2069_v52 = vadd.f32 %v2068_v49, %v2067_v46  ;;  %v2096_v53 = vpop.f32.mrb[29].mxu1  ;;  %v2070_v54 = vpop.f32.mrb[30].mxu0 }
 0x161   :  { %v1646_v55 = vmul.f32 %v1856_v43, %v1636_v50  ;;  %v2097_v56 = vadd.f32 %v2096_v53, %v2095_v48  ;;  %v2098_v57 = vpop.f32.mrb[30].mxu1  ;;  %v2071_v58 = vpop.f32.mrb[31].mxu0 }
 0x162   :  { %v1637_v59 = vsel %vm1629_vm1, %v1615_v45, %v1633_v51  ;;  %v1571_v60 = vadd.f32 %v2069_v52, %v1522_v25  ;;  %v2072_v61 = vadd.f32 %v2071_v58, %v2070_v54  ;;  %v2099_v62 = vpop.f32.mrb[31].mxu1 }
 0x163   :  { %v1656_v63 = vadd.f32 %v1857_v47, %v1646_v55  ;;  %v1647_v0 = vmul.f32 %v1856_v43, %v1637_v59  ;;  %v2100_v1 = vadd.f32 %v2099_v62, %v2098_v57 }
 0x164   :  { %v1620_v2 = vadd.f32 %v2097_v56, %v1571_v60  ;;  %v1574_v3 = vadd.f32 %v2072_v61, %v1525_v27 }
 0x165   :  { %v1664_v4 = vmul.f32 0.02, %v1656_v63  ;;  %v1657_v5 = vadd.f32 %v1857_v47, %v1647_v0  ;;  %vm1660_vm2 = vcmp.ge.f32.partialorder %v1656_v63, 0.0 }
 0x166   :  { %vm1630_vm3 = vcmp.ge.f32.partialorder %v1620_v2, 0.0  ;;  %v1634_v6 = vmul.f32 0.2, %v1620_v2  ;;  %v1623_v7 = vadd.f32 %v2100_v1, %v1574_v3 }
 0x167   :  { %vm1661_vm4 = vcmp.ge.f32.partialorder %v1657_v5, 0.0  ;;  %v1665_v8 = vmul.f32 0.02, %v1657_v5  ;;  %v1668_v11 = vsel %vm1660_vm2, %v1656_v63, %v1664_v4 }
 0x168   :  { %v1638_v9 = vsel %vm1630_vm3, %v1620_v2, %v1634_v6  ;;  %vm1631_vm5 = vcmp.ge.f32.partialorder %v1623_v7, 0.0  ;;  %v1635_v10 = vmul.f32 0.2, %v1623_v7 }
 0x169   :  { %v1669_v12 = vsel %vm1661_vm4, %v1657_v5, %v1665_v8  ;;  %v1648_v13 = vmul.f32 %v1856_v43, %v1638_v9 }
 0x16a   :  { %v1869_v14 = vpack.c.bf16 %v1669_v12, %v1668_v11  ;;  %v1639_v15 = vsel %vm1631_vm5, %v1623_v7, %v1635_v10 }
 0x16b   :  { %v1658_v16 = vadd.f32 %v1857_v47, %v1648_v13  ;;  %v1649_v17 = vmul.f32 %v1856_v43, %v1639_v15 }
 0x16c   :  { %1870 = vst [vmem:[%s2750_s4] sm:$0xff] %v1869_v14  }
 0x16d   :  { %v1666_v18 = vmul.f32 0.02, %v1658_v16  ;;  %v1659_v19 = vadd.f32 %v1857_v47, %v1649_v17  ;;  %vm1662_vm6 = vcmp.ge.f32.partialorder %v1658_v16, 0.0 }
 0x16f   :  { %vm1663_vm7 = vcmp.ge.f32.partialorder %v1659_v19, 0.0  ;;  %v1667_v20 = vmul.f32 0.02, %v1659_v19  ;;  %v1670_v21 = vsel %vm1662_vm6, %v1658_v16, %v1666_v18 }
 0x171   :  { %v1671_v22 = vsel %vm1663_vm7, %v1659_v19, %v1667_v20 }
 0x172   :  { %v1874_v23 = vpack.c.bf16 %v1671_v22, %v1670_v21 }
 0x174   :  { %1876 = vst [vmem:[%s2750_s4 + $0x8] sm:$0xff] %v1874_v23  }

// kernel: _lambda_.8
= control target key start
LH: loop header
LB: loop body
LE: loop exit
PB: predicated region body
PF: predicated region fallthrough
CT: control target
= control target key end

     0   :  { %s2734_s1 = inlined_call_operand.vmem [shape: bf16[2048,128], index: 1, kind: input, shape index: {}]   ;;  %s2735_s0 = inlined_call_operand.vmem [shape: bf16[32,2048], index: 0, kind: input, shape index: {}]   ;;  %s2736_s2 = inlined_call_operand.vmem [shape: f32[1,128], index: 2, kind: input, shape index: {}]   ;;  %s2737_s3 = inlined_call_operand.vmem [shape: f32[1,128], index: 3, kind: input, shape index: {}]   ;;  %s2738_s4 = inlined_call_operand.vmem [shape: bf16[32,128], index: 4, kind: output, shape index: {}]  }
   0x1   :  { %v2089_v0 = vld [vmem:[%s2734_s1 + $0x40] sm:$0xff]   ;;  %v2093_v4 = vld [vmem:[%s2734_s1 + $0x48] sm:$0xff]   ;;  %v2097_v8 = vld [vmem:[%s2734_s1 + $0x50] sm:$0xff]  }
   0x2   :  { %v2090_v1 = vld [vmem:[%s2734_s1 + $0xc0] sm:$0xff]   ;;  %1865 = vmatprep.subr.bf16.mxu0 %v2089_v0  ;;  %v2094_v5 = vld [vmem:[%s2734_s1 + $0xc8] sm:$0xff]   ;;  %v2098_v9 = vld [vmem:[%s2734_s1 + $0xd0] sm:$0xff]  }
   0x3   :  { %v2091_v2 = vld [vmem:[%s2734_s1] sm:$0xff]   ;;  %1893 = vmatprep.subr.bf16.mxu1 %v2090_v1  ;;  %v2095_v6 = vld [vmem:[%s2734_s1 + $0x8] sm:$0xff]   ;;  %v2099_v10 = vld [vmem:[%s2734_s1 + $0x10] sm:$0xff]  }
   0x4   :  { %v2092_v3 = vld [vmem:[%s2734_s1 + $0x80] sm:$0xff]   ;;  %1866 = vmatpush3.bf16.msra.mxu0 %v2091_v2  ;;  %v2096_v7 = vld [vmem:[%s2734_s1 + $0x88] sm:$0xff]   ;;  %v2100_v11 = vld [vmem:[%s2734_s1 + $0x90] sm:$0xff]  }
   0x5   :  { %1894 = vmatpush3.bf16.msra.mxu1 %v2092_v3  ;;  %1867 = vmatprep.subr.bf16.mxu0 %v2093_v4  ;;  %v2101_v12 = vld [vmem:[%s2734_s1 + $0x58] sm:$0xff]   ;;  %v2105_v16 = vld [vmem:[%s2734_s1 + $0x60] sm:$0xff]   ;;  %v2109_v20 = vld [vmem:[%s2734_s1 + $0x68] sm:$0xff]  }
   0x6   :  { %1895 = vmatprep.subr.bf16.mxu1 %v2094_v5  ;;  %v2102_v13 = vld [vmem:[%s2734_s1 + $0xd8] sm:$0xff]   ;;  %v2106_v17 = vld [vmem:[%s2734_s1 + $0xe0] sm:$0xff]   ;;  %v2110_v21 = vld [vmem:[%s2734_s1 + $0xe8] sm:$0xff]  }
   0x7   :  { %v2103_v14 = vld [vmem:[%s2734_s1 + $0x18] sm:$0xff]   ;;  %v2107_v18 = vld [vmem:[%s2734_s1 + $0x20] sm:$0xff]   ;;  %v2111_v22 = vld [vmem:[%s2734_s1 + $0x28] sm:$0xff]  }
   0x8   :  { %1868 = vmatpush3.bf16.msra.mxu0 %v2095_v6  ;;  %v2104_v15 = vld [vmem:[%s2734_s1 + $0x98] sm:$0xff]   ;;  %v2108_v19 = vld [vmem:[%s2734_s1 + $0xa0] sm:$0xff]   ;;  %v2112_v23 = vld [vmem:[%s2734_s1 + $0xa8] sm:$0xff]  }
   0x9   :  { %1896 = vmatpush3.bf16.msra.mxu1 %v2096_v7  ;;  %1869 = vmatprep.subr.bf16.mxu0 %v2097_v8  ;;  %v2113_v24 = vld [vmem:[%s2734_s1 + $0x70] sm:$0xff]   ;;  %v2117_v28 = vld [vmem:[%s2734_s1 + $0x78] sm:$0xff]   ;;  %v18_v32 = vld [vmem:[%s2735_s0] sm:$0xff] }
   0xa   :  { %1897 = vmatprep.subr.bf16.mxu1 %v2098_v9  ;;  %v2114_v25 = vld [vmem:[%s2734_s1 + $0xf0] sm:$0xff]   ;;  %v2118_v29 = vld [vmem:[%s2734_s1 + $0xf8] sm:$0xff]   ;;  %v26_v33 = vld [vmem:[%s2735_s0 + $0x40] sm:$0xff] }
   0xb   :  { %v2115_v26 = vld [vmem:[%s2734_s1 + $0x30] sm:$0xff]   ;;  %v2119_v30 = vld [vmem:[%s2734_s1 + $0x38] sm:$0xff]   ;;  %v19_v34 = vld [vmem:[%s2735_s0 + $0x8] sm:$0xff]  ;;  %v1684_v35 = vcombine.low %v18_v32, %v26_v33  ;;  %v1685_v36 = vcombine.high %v18_v32, %v26_v33 }
   0xc   :  { %1870 = vmatpush3.bf16.msra.mxu0 %v2099_v10  ;;  %v2116_v27 = vld [vmem:[%s2734_s1 + $0xb0] sm:$0xff]   ;;  %v2120_v31 = vld [vmem:[%s2734_s1 + $0xb8] sm:$0xff]   ;;  %v27_v37 = vld [vmem:[%s2735_s0 + $0x48] sm:$0xff] }
   0xd   :  { %1898 = vmatpush3.bf16.msra.mxu1 %v2100_v11  ;;  %1871 = vmatprep.subr.bf16.mxu0 %v2101_v12  ;;  %v1686_v38 = vcombine.low %v19_v34, %v27_v37  ;;  %v1687_v39 = vcombine.high %v19_v34, %v27_v37  ;;  %v2121_v40 = vld [vmem:[%s2734_s1 + $0x140] sm:$0xff]   ;;  %v2125_v44 = vld [vmem:[%s2734_s1 + $0x148] sm:$0xff]   ;;  %v2129_v48 = vld [vmem:[%s2734_s1 + $0x150] sm:$0xff]  }
   0xe   :  { %1899 = vmatprep.subr.bf16.mxu1 %v2102_v13  ;;  %1266 = vmatprep.mubr.bf16.mxu0 %v1685_v36  ;;  %v2122_v41 = vld [vmem:[%s2734_s1 + $0x1c0] sm:$0xff]   ;;  %v2126_v45 = vld [vmem:[%s2734_s1 + $0x1c8] sm:$0xff]   ;;  %v2130_v49 = vld [vmem:[%s2734_s1 + $0x1d0] sm:$0xff]  }
   0xf   :  { %1315 = vmatprep.mubr.bf16.mxu1 %v1687_v39  ;;  %v2123_v42 = vld [vmem:[%s2734_s1 + $0x100] sm:$0xff]   ;;  %v2127_v46 = vld [vmem:[%s2734_s1 + $0x108] sm:$0xff]   ;;  %v2131_v50 = vld [vmem:[%s2734_s1 + $0x110] sm:$0xff]  }
  0x10   :  { %1872 = vmatpush3.bf16.msra.mxu0 %v2103_v14  ;;  %v2124_v43 = vld [vmem:[%s2734_s1 + $0x180] sm:$0xff]   ;;  %v2128_v47 = vld [vmem:[%s2734_s1 + $0x188] sm:$0xff]   ;;  %v2132_v51 = vld [vmem:[%s2734_s1 + $0x190] sm:$0xff]  }
  0x11   :  { %1900 = vmatpush3.bf16.msra.mxu1 %v2104_v15  ;;  %1873 = vmatprep.subr.bf16.mxu0 %v2105_v16  ;;  %v2133_v52 = vld [vmem:[%s2734_s1 + $0x158] sm:$0xff]   ;;  %v2137_v56 = vld [vmem:[%s2734_s1 + $0x160] sm:$0xff]   ;;  %v2141_v60 = vld [vmem:[%s2734_s1 + $0x168] sm:$0xff]  }
  0x12   :  { %1901 = vmatprep.subr.bf16.mxu1 %v2106_v17  ;;  %v2134_v53 = vld [vmem:[%s2734_s1 + $0x1d8] sm:$0xff]   ;;  %v2138_v57 = vld [vmem:[%s2734_s1 + $0x1e0] sm:$0xff]   ;;  %v2142_v61 = vld [vmem:[%s2734_s1 + $0x1e8] sm:$0xff]  }
  0x13   :  { %v2135_v54 = vld [vmem:[%s2734_s1 + $0x118] sm:$0xff]   ;;  %v2139_v58 = vld [vmem:[%s2734_s1 + $0x120] sm:$0xff]   ;;  %v35_v1 = vld [vmem:[%s2735_s0 + $0x88] sm:$0xff] }
  0x14   :  { %1874 = vmatpush3.bf16.msra.mxu0 %v2107_v18  ;;  %v2136_v55 = vld [vmem:[%s2734_s1 + $0x198] sm:$0xff]   ;;  %v2140_v59 = vld [vmem:[%s2734_s1 + $0x1a0] sm:$0xff]   ;;  %v43_v2 = vld [vmem:[%s2735_s0 + $0xc8] sm:$0xff] }
  0x15   :  { %1902 = vmatpush3.bf16.msra.mxu1 %v2108_v19  ;;  %1875 = vmatprep.subr.bf16.mxu0 %v2109_v20  ;;  %v34_v62 = vld [vmem:[%s2735_s0 + $0x80] sm:$0xff]  ;;  %v1703_v4 = vcombine.high %v35_v1, %v43_v2  ;;  %v2143_v5 = vld [vmem:[%s2734_s1 + $0x128] sm:$0xff]   ;;  %v1702_v6 = vcombine.low %v35_v1, %v43_v2  ;;  %v2145_v8 = vld [vmem:[%s2734_s1 + $0x170] sm:$0xff]  }
  0x16   :  { %1903 = vmatprep.subr.bf16.mxu1 %v2110_v21  ;;  %v42_v63 = vld [vmem:[%s2735_s0 + $0xc0] sm:$0xff]  ;;  %v2144_v7 = vld [vmem:[%s2734_s1 + $0x1a8] sm:$0xff]   ;;  %v2146_v9 = vld [vmem:[%s2734_s1 + $0x1f0] sm:$0xff]  }
  0x17   :  { %v1701_v0 = vcombine.high %v34_v62, %v42_v63  ;;  %v1700_v3 = vcombine.low %v34_v62, %v42_v63  ;;  %v2147_v10 = vld [vmem:[%s2734_s1 + $0x130] sm:$0xff]   ;;  %v2149_v12 = vld [vmem:[%s2734_s1 + $0x178] sm:$0xff]   ;;  %v30_v1 = vld [vmem:[%s2735_s0 + $0x60] sm:$0xff] }
  0x18   :  { %1876 = vmatpush3.bf16.msra.mxu0 %v2111_v22  ;;  %v2148_v11 = vld [vmem:[%s2734_s1 + $0x1b0] sm:$0xff]   ;;  %v2150_v13 = vld [vmem:[%s2734_s1 + $0x1f8] sm:$0xff]  }
  0x19   :  { %1904 = vmatpush3.bf16.msra.mxu1 %v2112_v23  ;;  %1877 = vmatprep.subr.bf16.mxu0 %v2113_v24  ;;  %v2151_v14 = vld [vmem:[%s2734_s1 + $0x138] sm:$0xff]   ;;  %v20_v16 = vld [vmem:[%s2735_s0 + $0x10] sm:$0xff]  ;;  %v2153_v24 = vld [vmem:[%s2734_s1 + $0x240] sm:$0xff]  }
  0x1a   :  { %1905 = vmatprep.subr.bf16.mxu1 %v2114_v25  ;;  %v2152_v15 = vld [vmem:[%s2734_s1 + $0x1b8] sm:$0xff]   ;;  %v28_v17 = vld [vmem:[%s2735_s0 + $0x50] sm:$0xff]  ;;  %v2154_v25 = vld [vmem:[%s2734_s1 + $0x2c0] sm:$0xff]  }
  0x1b   :  { %v21_v18 = vld [vmem:[%s2735_s0 + $0x18] sm:$0xff]  ;;  %v1688_v20 = vcombine.low %v20_v16, %v28_v17  ;;  %v1689_v21 = vcombine.high %v20_v16, %v28_v17  ;;  %v36_v32 = vld [vmem:[%s2735_s0 + $0x90] sm:$0xff]  ;;  %v38_v16 = vld [vmem:[%s2735_s0 + $0xa0] sm:$0xff] }
  0x1c   :  { %1878 = vmatpush3.bf16.msra.mxu0 %v2115_v26  ;;  %v29_v19 = vld [vmem:[%s2735_s0 + $0x58] sm:$0xff]  ;;  %v2155_v26 = vld [vmem:[%s2734_s1 + $0x200] sm:$0xff]   ;;  %v44_v33 = vld [vmem:[%s2735_s0 + $0xd0] sm:$0xff] }
  0x1d   :  { %1906 = vmatpush3.bf16.msra.mxu1 %v2116_v27  ;;  %1879 = vmatprep.subr.bf16.mxu0 %v2117_v28  ;;  %v1690_v22 = vcombine.low %v21_v18, %v29_v19  ;;  %v1691_v23 = vcombine.high %v21_v18, %v29_v19  ;;  %v2156_v27 = vld [vmem:[%s2734_s1 + $0x280] sm:$0xff]   ;;  %v2157_v28 = vld [vmem:[%s2734_s1 + $0x248] sm:$0xff]   ;;  %v1705_v34 = vcombine.high %v36_v32, %v44_v33  ;;  %v2161_v36 = vld [vmem:[%s2734_s1 + $0x250] sm:$0xff]  }
  0x1e   :  { %1907 = vmatprep.subr.bf16.mxu1 %v2118_v29  ;;  %v2158_v29 = vld [vmem:[%s2734_s1 + $0x2c8] sm:$0xff]   ;;  %v2162_v37 = vld [vmem:[%s2734_s1 + $0x2d0] sm:$0xff]   ;;  %v45_v39 = vld [vmem:[%s2735_s0 + $0xd8] sm:$0xff] }
  0x1f   :  { %v2183_v62 = vld [vmem:[%s2734_s1 + $0x238] sm:$0xff]   ;;  %v46_v17 = vld [vmem:[%s2735_s0 + $0xe0] sm:$0xff] }
  0x20   :  { %1880 = vmatpush3.bf16.msra.mxu0 %v2119_v30  ;;  %v2159_v30 = vld [vmem:[%s2734_s1 + $0x208] sm:$0xff]   ;;  %v2184_v63 = vld [vmem:[%s2734_s1 + $0x2b8] sm:$0xff]   ;;  %v1709_v18 = vcombine.high %v38_v16, %v46_v17  ;;  %v1708_v19 = vcombine.low %v38_v16, %v46_v17 }
  0x21   :  { %1908 = vmatpush3.bf16.msra.mxu1 %v2120_v31  ;;  %1921 = vmatprep.subr.bf16.mxu0 %v2121_v40  ;;  %v2160_v31 = vld [vmem:[%s2734_s1 + $0x288] sm:$0xff]  }
  0x22   :  { %1949 = vmatprep.subr.bf16.mxu1 %v2122_v41  ;;  %v2163_v41 = vld [vmem:[%s2734_s1 + $0x210] sm:$0xff]  }
  0x23   :  { %1267 = vmatmul.mubr.bf16.vlgmr.msra.gmra.mrb[0].mxu0 %v1684_v35  ;;  %v1704_v35 = vcombine.low %v36_v32, %v44_v33  ;;  %v2201_v32 = vld [vmem:[%s2734_s1 + $0x360] sm:$0xff]  }
  0x24   :  { %1316 = vmatmul.mubr.bf16.vlgmr.msra.gmra.mrb[0].mxu1 %v1686_v38  ;;  %1922 = vmatpush3.bf16.msra.mxu0 %v2123_v42  ;;  %v37_v38 = vld [vmem:[%s2735_s0 + $0x98] sm:$0xff]  ;;  %v2202_v33 = vld [vmem:[%s2734_s1 + $0x3e0] sm:$0xff]  }
  0x25   :  { %1950 = vmatpush3.bf16.msra.mxu1 %v2124_v43  ;;  %1923 = vmatprep.subr.bf16.mxu0 %v2125_v44  ;;  %v1707_v40 = vcombine.high %v37_v38, %v45_v39  ;;  %v1706_v42 = vcombine.low %v37_v38, %v45_v39  ;;  %v2164_v43 = vld [vmem:[%s2734_s1 + $0x290] sm:$0xff]   ;;  %v2165_v44 = vld [vmem:[%s2734_s1 + $0x258] sm:$0xff]   ;;  %v2207_v38 = vld [vmem:[%s2734_s1 + $0x328] sm:$0xff]  }
  0x26   :  { %1951 = vmatprep.subr.bf16.mxu1 %v2126_v45  ;;  %1274 = vmatprep.mubr.bf16.mxu0 %v1701_v0  ;;  %v2166_v45 = vld [vmem:[%s2734_s1 + $0x2d8] sm:$0xff]   ;;  %v22_v0 = vld [vmem:[%s2735_s0 + $0x20] sm:$0xff]  ;;  %v2208_v39 = vld [vmem:[%s2734_s1 + $0x3a8] sm:$0xff]  }
  0x27   :  { %1323 = vmatprep.mubr.bf16.mxu1 %v1703_v4  ;;  %v1692_v2 = vcombine.low %v22_v0, %v30_v1  ;;  %v23_v4 = vld [vmem:[%s2735_s0 + $0x28] sm:$0xff] }
  0x28   :  { %1924 = vmatpush3.bf16.msra.mxu0 %v2127_v46  ;;  %v2167_v46 = vld [vmem:[%s2734_s1 + $0x218] sm:$0xff]  }
  0x29   :  { %1952 = vmatpush3.bf16.msra.mxu1 %v2128_v47  ;;  %1925 = vmatprep.subr.bf16.mxu0 %v2129_v48  ;;  %v2168_v47 = vld [vmem:[%s2734_s1 + $0x298] sm:$0xff]   ;;  %v2169_v48 = vld [vmem:[%s2734_s1 + $0x260] sm:$0xff]  }
  0x2a   :  { %1953 = vmatprep.subr.bf16.mxu1 %v2130_v49  ;;  %v2170_v49 = vld [vmem:[%s2734_s1 + $0x2e0] sm:$0xff]  }
  0x2b   :  { %1275 = vmatmul.mubr.bf16.gmra.mrb[4].mxu0 %v1700_v3  ;;  %v1693_v3 = vcombine.high %v22_v0, %v30_v1 }
  0x2c   :  { %1926 = vmatpush3.bf16.msra.mxu0 %v2131_v50  ;;  %1324 = vmatmul.mubr.bf16.gmra.mrb[4].mxu1 %v1702_v6  ;;  %v2171_v50 = vld [vmem:[%s2734_s1 + $0x220] sm:$0xff]  }
  0x2d   :  { %1954 = vmatpush3.bf16.msra.mxu1 %v2132_v51  ;;  %1927 = vmatprep.subr.bf16.mxu0 %v2133_v52  ;;  %v2172_v51 = vld [vmem:[%s2734_s1 + $0x2a0] sm:$0xff]   ;;  %v2173_v52 = vld [vmem:[%s2734_s1 + $0x268] sm:$0xff]  }
  0x2e   :  { %1955 = vmatprep.subr.bf16.mxu1 %v2134_v53  ;;  %1364 = vmatprep.mubr.bf16.mxu0 %v1689_v21  ;;  %v2174_v53 = vld [vmem:[%s2734_s1 + $0x2e8] sm:$0xff]   ;;  %v2194_v21 = vld [vmem:[%s2734_s1 + $0x3d0] sm:$0xff]  }
  0x2f   :  { %1413 = vmatprep.mubr.bf16.mxu1 %v1691_v23  ;;  %v47_v23 = vld [vmem:[%s2735_s0 + $0xe8] sm:$0xff] }
  0x30   :  { %1928 = vmatpush3.bf16.msra.mxu0 %v2135_v54  ;;  %v2175_v54 = vld [vmem:[%s2734_s1 + $0x228] sm:$0xff]  }
  0x31   :  { %1956 = vmatpush3.bf16.msra.mxu1 %v2136_v55  ;;  %1929 = vmatprep.subr.bf16.mxu0 %v2137_v56  ;;  %v2176_v55 = vld [vmem:[%s2734_s1 + $0x2a8] sm:$0xff]   ;;  %v2177_v56 = vld [vmem:[%s2734_s1 + $0x270] sm:$0xff]  }
  0x32   :  { %1957 = vmatprep.subr.bf16.mxu1 %v2138_v57  ;;  %v2178_v57 = vld [vmem:[%s2734_s1 + $0x2f0] sm:$0xff]  }
  0x34   :  { %1930 = vmatpush3.bf16.msra.mxu0 %v2139_v58  ;;  %v2179_v58 = vld [vmem:[%s2734_s1 + $0x230] sm:$0xff]  }
  0x35   :  { %1958 = vmatpush3.bf16.msra.mxu1 %v2140_v59  ;;  %1931 = vmatprep.subr.bf16.mxu0 %v2141_v60  ;;  %v2180_v59 = vld [vmem:[%s2734_s1 + $0x2b0] sm:$0xff]   ;;  %v2181_v60 = vld [vmem:[%s2734_s1 + $0x278] sm:$0xff]  }
  0x36   :  { %1959 = vmatprep.subr.bf16.mxu1 %v2142_v61  ;;  %v2182_v61 = vld [vmem:[%s2734_s1 + $0x2f8] sm:$0xff]  }
  0x38   :  { %1932 = vmatpush3.bf16.msra.mxu0 %v2143_v5  ;;  %v31_v5 = vld [vmem:[%s2735_s0 + $0x68] sm:$0xff] }
  0x39   :  { %1960 = vmatpush3.bf16.msra.mxu1 %v2144_v7  ;;  %1933 = vmatprep.subr.bf16.mxu0 %v2145_v8  ;;  %v1694_v6 = vcombine.low %v23_v4, %v31_v5  ;;  %v1695_v7 = vcombine.high %v23_v4, %v31_v5  ;;  %v2185_v8 = vld [vmem:[%s2734_s1 + $0x340] sm:$0xff]  }
  0x3a   :  { %1961 = vmatprep.subr.bf16.mxu1 %v2146_v9  ;;  %v2186_v9 = vld [vmem:[%s2734_s1 + $0x3c0] sm:$0xff]  }
  0x3c   :  { %1934 = vmatpush3.bf16.msra.mxu0 %v2147_v10  ;;  %v2187_v10 = vld [vmem:[%s2734_s1 + $0x300] sm:$0xff]  }
  0x3d   :  { %1962 = vmatpush3.bf16.msra.mxu1 %v2148_v11  ;;  %1935 = vmatprep.subr.bf16.mxu0 %v2149_v12  ;;  %v2188_v11 = vld [vmem:[%s2734_s1 + $0x380] sm:$0xff]   ;;  %v2189_v12 = vld [vmem:[%s2734_s1 + $0x348] sm:$0xff]  }
  0x3e   :  { %1963 = vmatprep.subr.bf16.mxu1 %v2150_v13  ;;  %v2190_v13 = vld [vmem:[%s2734_s1 + $0x3c8] sm:$0xff]  }
  0x40   :  { %1936 = vmatpush3.bf16.msra.mxu0 %v2151_v14  ;;  %v2191_v14 = vld [vmem:[%s2734_s1 + $0x308] sm:$0xff]  }
  0x41   :  { %1964 = vmatpush3.bf16.msra.mxu1 %v2152_v15  ;;  %1977 = vmatprep.subr.bf16.mxu0 %v2153_v24  ;;  %v2192_v15 = vld [vmem:[%s2734_s1 + $0x388] sm:$0xff]  }
  0x42   :  { %2005 = vmatprep.subr.bf16.mxu1 %v2154_v25  ;;  %v2195_v25 = vld [vmem:[%s2734_s1 + $0x310] sm:$0xff]  }
  0x43   :  { %1365 = vmatmul.mubr.bf16.vlgmr.msra.gmra.mrb[8].mxu0 %v1688_v20  ;;  %v2193_v20 = vld [vmem:[%s2734_s1 + $0x350] sm:$0xff]  }
  0x44   :  { %1414 = vmatmul.mubr.bf16.vlgmr.msra.gmra.mrb[8].mxu1 %v1690_v22  ;;  %1978 = vmatpush3.bf16.msra.mxu0 %v2155_v26  ;;  %v39_v22 = vld [vmem:[%s2735_s0 + $0xa8] sm:$0xff] }
  0x45   :  { %2006 = vmatpush3.bf16.msra.mxu1 %v2156_v27  ;;  %1979 = vmatprep.subr.bf16.mxu0 %v2157_v28  ;;  %v1711_v24 = vcombine.high %v39_v22, %v47_v23  ;;  %v1710_v26 = vcombine.low %v39_v22, %v47_v23  ;;  %v2196_v27 = vld [vmem:[%s2734_s1 + $0x390] sm:$0xff]   ;;  %v2197_v28 = vld [vmem:[%s2734_s1 + $0x358] sm:$0xff]  }
  0x46   :  { %2007 = vmatprep.subr.bf16.mxu1 %v2158_v29  ;;  %1372 = vmatprep.mubr.bf16.mxu0 %v1705_v34  ;;  %v2198_v29 = vld [vmem:[%s2734_s1 + $0x3d8] sm:$0xff]   ;;  %v2203_v34 = vld [vmem:[%s2734_s1 + $0x320] sm:$0xff]  }
  0x47   :  { %1421 = vmatprep.mubr.bf16.mxu1 %v1707_v40  ;;  %v2209_v40 = vld [vmem:[%s2734_s1 + $0x370] sm:$0xff]  }
  0x48   :  { %1980 = vmatpush3.bf16.msra.mxu0 %v2159_v30  ;;  %v2199_v30 = vld [vmem:[%s2734_s1 + $0x318] sm:$0xff]  }
  0x49   :  { %2008 = vmatpush3.bf16.msra.mxu1 %v2160_v31  ;;  %1981 = vmatprep.subr.bf16.mxu0 %v2161_v36  ;;  %v2200_v31 = vld [vmem:[%s2734_s1 + $0x398] sm:$0xff]   ;;  %v2205_v36 = vld [vmem:[%s2734_s1 + $0x368] sm:$0xff]  }
  0x4a   :  { %2009 = vmatprep.subr.bf16.mxu1 %v2162_v37  ;;  %v2206_v37 = vld [vmem:[%s2734_s1 + $0x3e8] sm:$0xff]  }
  0x4b   :  { %1373 = vmatmul.mubr.bf16.gmra.mrb[12].mxu0 %v1704_v35  ;;  %v2204_v35 = vld [vmem:[%s2734_s1 + $0x3a0] sm:$0xff]  }
  0x4c   :  { %1982 = vmatpush3.bf16.msra.mxu0 %v2163_v41  ;;  %1422 = vmatmul.mubr.bf16.gmra.mrb[12].mxu1 %v1706_v42  ;;  %v2210_v41 = vld [vmem:[%s2734_s1 + $0x3f0] sm:$0xff]  }
  0x4d   :  { %2010 = vmatpush3.bf16.msra.mxu1 %v2164_v43  ;;  %1983 = vmatprep.subr.bf16.mxu0 %v2165_v44  ;;  %v2211_v42 = vld [vmem:[%s2734_s1 + $0x330] sm:$0xff]   ;;  %v2213_v44 = vld [vmem:[%s2734_s1 + $0x378] sm:$0xff]  }
  0x4e   :  { %2011 = vmatprep.subr.bf16.mxu1 %v2166_v45  ;;  %1462 = vmatprep.mubr.bf16.mxu0 %v1693_v3  ;;  %v2212_v43 = vld [vmem:[%s2734_s1 + $0x3b0] sm:$0xff]   ;;  %v2214_v45 = vld [vmem:[%s2734_s1 + $0x3f8] sm:$0xff]  }
  0x4f   :  { %1511 = vmatprep.mubr.bf16.mxu1 %v1695_v7 }
  0x50   :  { %1984 = vmatpush3.bf16.msra.mxu0 %v2167_v46  ;;  %v2215_v46 = vld [vmem:[%s2734_s1 + $0x338] sm:$0xff]  }
  0x51   :  { %2012 = vmatpush3.bf16.msra.mxu1 %v2168_v47  ;;  %1985 = vmatprep.subr.bf16.mxu0 %v2169_v48  ;;  %v2216_v47 = vld [vmem:[%s2734_s1 + $0x3b8] sm:$0xff]   ;;  %v24_v48 = vld [vmem:[%s2735_s0 + $0x30] sm:$0xff] }
  0x52   :  { %2013 = vmatprep.subr.bf16.mxu1 %v2170_v49  ;;  %v32_v49 = vld [vmem:[%s2735_s0 + $0x70] sm:$0xff] }
  0x54   :  { %1986 = vmatpush3.bf16.msra.mxu0 %v2171_v50  ;;  %v25_v50 = vld [vmem:[%s2735_s0 + $0x38] sm:$0xff] }
  0x55   :  { %2014 = vmatpush3.bf16.msra.mxu1 %v2172_v51  ;;  %1987 = vmatprep.subr.bf16.mxu0 %v2173_v52  ;;  %v1696_v51 = vcombine.low %v24_v48, %v32_v49  ;;  %v1697_v52 = vcombine.high %v24_v48, %v32_v49 }
  0x56   :  { %2015 = vmatprep.subr.bf16.mxu1 %v2174_v53  ;;  %v33_v53 = vld [vmem:[%s2735_s0 + $0x78] sm:$0xff] }
  0x58   :  { %1988 = vmatpush3.bf16.msra.mxu0 %v2175_v54  ;;  %v40_v54 = vld [vmem:[%s2735_s0 + $0xb0] sm:$0xff] }
  0x59   :  { %2016 = vmatpush3.bf16.msra.mxu1 %v2176_v55  ;;  %1989 = vmatprep.subr.bf16.mxu0 %v2177_v56  ;;  %v48_v55 = vld [vmem:[%s2735_s0 + $0xf0] sm:$0xff]  ;;  %v1698_v56 = vcombine.low %v25_v50, %v33_v53 }
  0x5a   :  { %2017 = vmatprep.subr.bf16.mxu1 %v2178_v57  ;;  %v1699_v57 = vcombine.high %v25_v50, %v33_v53 }
  0x5c   :  { %1990 = vmatpush3.bf16.msra.mxu0 %v2179_v58  ;;  %v1713_v58 = vcombine.high %v40_v54, %v48_v55 }
  0x5d   :  { %2018 = vmatpush3.bf16.msra.mxu1 %v2180_v59  ;;  %1991 = vmatprep.subr.bf16.mxu0 %v2181_v60  ;;  %v41_v59 = vld [vmem:[%s2735_s0 + $0xb8] sm:$0xff] }
  0x5e   :  { %2019 = vmatprep.subr.bf16.mxu1 %v2182_v61  ;;  %v49_v60 = vld [vmem:[%s2735_s0 + $0xf8] sm:$0xff] }
  0x5f   :  { %v1715_v61 = vcombine.high %v41_v59, %v49_v60 }
  0x60   :  { %1992 = vmatpush3.bf16.msra.mxu0 %v2183_v62  ;;  %v1712_v62 = vcombine.low %v40_v54, %v48_v55 }
  0x61   :  { %2020 = vmatpush3.bf16.msra.mxu1 %v2184_v63  ;;  %2033 = vmatprep.subr.bf16.mxu0 %v2185_v8  ;;  %v1714_v63 = vcombine.low %v41_v59, %v49_v60 }
  0x62   :  { %2061 = vmatprep.subr.bf16.mxu1 %v2186_v9 }
  0x63   :  { %1463 = vmatmul.mubr.bf16.vlgmr.msra.gmra.mrb[16].mxu0 %v1692_v2 }
  0x64   :  { %1512 = vmatmul.mubr.bf16.vlgmr.msra.gmra.mrb[16].mxu1 %v1694_v6  ;;  %2034 = vmatpush3.bf16.msra.mxu0 %v2187_v10 }
  0x65   :  { %2062 = vmatpush3.bf16.msra.mxu1 %v2188_v11  ;;  %2035 = vmatprep.subr.bf16.mxu0 %v2189_v12 }
  0x66   :  { %2063 = vmatprep.subr.bf16.mxu1 %v2190_v13  ;;  %1470 = vmatprep.mubr.bf16.mxu0 %v1709_v18 }
  0x67   :  { %1519 = vmatprep.mubr.bf16.mxu1 %v1711_v24 }
  0x68   :  { %2036 = vmatpush3.bf16.msra.mxu0 %v2191_v14 }
  0x69   :  { %2064 = vmatpush3.bf16.msra.mxu1 %v2192_v15  ;;  %2037 = vmatprep.subr.bf16.mxu0 %v2193_v20 }
  0x6a   :  { %2065 = vmatprep.subr.bf16.mxu1 %v2194_v21 }
  0x6b   :  { %1471 = vmatmul.mubr.bf16.gmra.mrb[20].mxu0 %v1708_v19 }
  0x6c   :  { %2038 = vmatpush3.bf16.msra.mxu0 %v2195_v25  ;;  %1520 = vmatmul.mubr.bf16.gmra.mrb[20].mxu1 %v1710_v26 }
  0x6d   :  { %2066 = vmatpush3.bf16.msra.mxu1 %v2196_v27  ;;  %2039 = vmatprep.subr.bf16.mxu0 %v2197_v28 }
  0x6e   :  { %2067 = vmatprep.subr.bf16.mxu1 %v2198_v29  ;;  %1560 = vmatprep.mubr.bf16.mxu0 %v1697_v52 }
  0x6f   :  { %1609 = vmatprep.mubr.bf16.mxu1 %v1699_v57 }
  0x70   :  { %2040 = vmatpush3.bf16.msra.mxu0 %v2199_v30 }
  0x71   :  { %2068 = vmatpush3.bf16.msra.mxu1 %v2200_v31  ;;  %2041 = vmatprep.subr.bf16.mxu0 %v2201_v32 }
  0x72   :  { %2069 = vmatprep.subr.bf16.mxu1 %v2202_v33 }
  0x74   :  { %2042 = vmatpush3.bf16.msra.mxu0 %v2203_v34 }
  0x75   :  { %2070 = vmatpush3.bf16.msra.mxu1 %v2204_v35  ;;  %2043 = vmatprep.subr.bf16.mxu0 %v2205_v36 }
  0x76   :  { %2071 = vmatprep.subr.bf16.mxu1 %v2206_v37 }
  0x78   :  { %2044 = vmatpush3.bf16.msra.mxu0 %v2207_v38 }
  0x79   :  { %2072 = vmatpush3.bf16.msra.mxu1 %v2208_v39  ;;  %2045 = vmatprep.subr.bf16.mxu0 %v2209_v40 }
  0x7a   :  { %2073 = vmatprep.subr.bf16.mxu1 %v2210_v41 }
  0x7c   :  { %2046 = vmatpush3.bf16.msra.mxu0 %v2211_v42 }
  0x7d   :  { %2074 = vmatpush3.bf16.msra.mxu1 %v2212_v43  ;;  %2047 = vmatprep.subr.bf16.mxu0 %v2213_v44 }
  0x7e   :  { %2075 = vmatprep.subr.bf16.mxu1 %v2214_v45 }
  0x80   :  { %2048 = vmatpush3.bf16.msra.mxu0 %v2215_v46 }
  0x81   :  { %2076 = vmatpush3.bf16.msra.mxu1 %v2216_v47 }
  0x83   :  { %1561 = vmatmul.mubr.bf16.vlgmr.msra.gmra.mrb[24].mxu0 %v1696_v51 }
  0x84   :  { %1610 = vmatmul.mubr.bf16.vlgmr.msra.gmra.mrb[24].mxu1 %v1698_v56  ;;  %1568 = vmatprep.mubr.bf16.mxu0 %v1713_v58 }
  0x85   :  { %1617 = vmatprep.mubr.bf16.mxu1 %v1715_v61 }
  0x8b   :  { %1569 = vmatmul.mubr.bf16.gmra.mrb[28].mxu0 %v1712_v62 }
  0x8c   :  { %1618 = vmatmul.mubr.bf16.gmra.mrb[28].mxu1 %v1714_v63 }
  0xf6   :  { %v1881_v0 = vpop.f32.mrb[0].mxu0 }
  0xf7   :  { %v1909_v1 = vpop.f32.mrb[0].mxu1  ;;  %v1882_v2 = vpop.f32.mrb[1].mxu0 }
  0xf8   :  { %v1883_v3 = vadd.f32 %v1882_v2, %v1881_v0  ;;  %v1910_v4 = vpop.f32.mrb[1].mxu1  ;;  %v1884_v5 = vpop.f32.mrb[2].mxu0 }
  0xf9   :  { %v1911_v6 = vadd.f32 %v1910_v4, %v1909_v1  ;;  %v1912_v7 = vpop.f32.mrb[2].mxu1  ;;  %v1885_v8 = vpop.f32.mrb[3].mxu0 }
  0xfa   :  { %v1886_v9 = vadd.f32 %v1885_v8, %v1884_v5  ;;  %v1913_v10 = vpop.f32.mrb[3].mxu1 }
  0xfb   :  { %v1318_v11 = vadd.f32 %v1911_v6, %v1883_v3  ;;  %v1914_v12 = vadd.f32 %v1913_v10, %v1912_v7 }
  0xfd   :  { %v1321_v13 = vadd.f32 %v1914_v12, %v1886_v9 }
  0xfe   :  { %v1887_v14 = vpop.f32.mrb[4].mxu0 }
  0xff   :  { %v1915_v15 = vpop.f32.mrb[4].mxu1  ;;  %v1888_v16 = vpop.f32.mrb[5].mxu0 }
 0x100   :  { %v1889_v17 = vadd.f32 %v1888_v16, %v1887_v14  ;;  %v1916_v18 = vpop.f32.mrb[5].mxu1  ;;  %v1890_v19 = vpop.f32.mrb[6].mxu0 }
 0x101   :  { %v1917_v20 = vadd.f32 %v1916_v18, %v1915_v15  ;;  %v1918_v21 = vpop.f32.mrb[6].mxu1  ;;  %v1891_v22 = vpop.f32.mrb[7].mxu0 }
 0x102   :  { %v1892_v23 = vadd.f32 %v1891_v22, %v1890_v19  ;;  %v1919_v24 = vpop.f32.mrb[7].mxu1 }
 0x103   :  { %v1326_v25 = vadd.f32 %v1917_v20, %v1889_v17  ;;  %v1920_v26 = vadd.f32 %v1919_v24, %v1918_v21 }
 0x105   :  { %v1329_v27 = vadd.f32 %v1920_v26, %v1892_v23 }
 0x116   :  { %v1937_v28 = vpop.f32.mrb[8].mxu0 }
 0x117   :  { %v1965_v29 = vpop.f32.mrb[8].mxu1  ;;  %v1938_v30 = vpop.f32.mrb[9].mxu0 }
 0x118   :  { %v1966_v31 = vpop.f32.mrb[9].mxu1  ;;  %v1939_v32 = vadd.f32 %v1938_v30, %v1937_v28  ;;  %v1940_v34 = vpop.f32.mrb[10].mxu0 }
 0x119   :  { %v1967_v33 = vadd.f32 %v1966_v31, %v1965_v29  ;;  %v1968_v35 = vpop.f32.mrb[10].mxu1  ;;  %v1941_v36 = vpop.f32.mrb[11].mxu0 }
 0x11a   :  { %v1969_v37 = vpop.f32.mrb[11].mxu1  ;;  %v1367_v38 = vadd.f32 %v1939_v32, %v1318_v11  ;;  %v1942_v39 = vadd.f32 %v1941_v36, %v1940_v34 }
 0x11b   :  { %v1970_v40 = vadd.f32 %v1969_v37, %v1968_v35 }
 0x11c   :  { %v1416_v41 = vadd.f32 %v1967_v33, %v1367_v38  ;;  %v1370_v42 = vadd.f32 %v1942_v39, %v1321_v13 }
 0x11e   :  { %v1419_v43 = vadd.f32 %v1970_v40, %v1370_v42  ;;  %v1943_v44 = vpop.f32.mrb[12].mxu0  ;;  %v1844_v40 = vld [vmem:[%s2736_s2] ss:$0 sm:$0xff] }
 0x11f   :  { %v1944_v45 = vpop.f32.mrb[13].mxu0  ;;  %v1971_v50 = vpop.f32.mrb[12].mxu1 }
 0x120   :  { %v1945_v46 = vadd.f32 %v1944_v45, %v1943_v44  ;;  %v1946_v47 = vpop.f32.mrb[14].mxu0  ;;  %v1972_v52 = vpop.f32.mrb[13].mxu1  ;;  %v1845_v44 = vld [vmem:[%s2737_s3] ss:$0 sm:$0xff] }
 0x121   :  { %v1947_v48 = vpop.f32.mrb[15].mxu0  ;;  %v1973_v54 = vadd.f32 %v1972_v52, %v1971_v50  ;;  %v1974_v55 = vpop.f32.mrb[14].mxu1 }
 0x122   :  { %v1375_v49 = vadd.f32 %v1945_v46, %v1326_v25  ;;  %v1948_v51 = vadd.f32 %v1947_v48, %v1946_v47  ;;  %v1975_v56 = vpop.f32.mrb[15].mxu1 }
 0x123   :  { %v1976_v58 = vadd.f32 %v1975_v56, %v1974_v55 }
 0x124   :  { %v1378_v53 = vadd.f32 %v1948_v51, %v1329_v27  ;;  %v1424_v57 = vadd.f32 %v1973_v54, %v1375_v49 }
 0x126   :  { %v1427_v59 = vadd.f32 %v1976_v58, %v1378_v53 }
 0x136   :  { %v1993_v60 = vpop.f32.mrb[16].mxu0 }
 0x137   :  { %v2021_v61 = vpop.f32.mrb[16].mxu1  ;;  %v1994_v62 = vpop.f32.mrb[17].mxu0 }
 0x138   :  { %v1995_v63 = vadd.f32 %v1994_v62, %v1993_v60  ;;  %v2022_v0 = vpop.f32.mrb[17].mxu1  ;;  %v1996_v1 = vpop.f32.mrb[18].mxu0 }
 0x139   :  { %v2023_v2 = vadd.f32 %v2022_v0, %v2021_v61  ;;  %v2024_v3 = vpop.f32.mrb[18].mxu1  ;;  %v1997_v4 = vpop.f32.mrb[19].mxu0 }
 0x13a   :  { %v1465_v5 = vadd.f32 %v1995_v63, %v1416_v41  ;;  %v1998_v6 = vadd.f32 %v1997_v4, %v1996_v1  ;;  %v2025_v7 = vpop.f32.mrb[19].mxu1 }
 0x13b   :  { %v2026_v8 = vadd.f32 %v2025_v7, %v2024_v3 }
 0x13c   :  { %v1514_v9 = vadd.f32 %v2023_v2, %v1465_v5  ;;  %v1468_v10 = vadd.f32 %v1998_v6, %v1419_v43 }
 0x13e   :  { %v1517_v11 = vadd.f32 %v2026_v8, %v1468_v10  ;;  %v1999_v12 = vpop.f32.mrb[20].mxu0 }
 0x13f   :  { %v2000_v13 = vpop.f32.mrb[21].mxu0  ;;  %v2027_v16 = vpop.f32.mrb[20].mxu1 }
 0x140   :  { %v2001_v14 = vadd.f32 %v2000_v13, %v1999_v12  ;;  %v2002_v15 = vpop.f32.mrb[22].mxu0  ;;  %v2028_v20 = vpop.f32.mrb[21].mxu1 }
 0x141   :  { %v2003_v17 = vpop.f32.mrb[23].mxu0  ;;  %v2029_v21 = vadd.f32 %v2028_v20, %v2027_v16  ;;  %v2030_v22 = vpop.f32.mrb[22].mxu1 }
 0x142   :  { %v1473_v18 = vadd.f32 %v2001_v14, %v1424_v57  ;;  %v2004_v19 = vadd.f32 %v2003_v17, %v2002_v15  ;;  %v2031_v24 = vpop.f32.mrb[23].mxu1 }
 0x143   :  { %v2032_v26 = vadd.f32 %v2031_v24, %v2030_v22 }
 0x144   :  { %v1476_v23 = vadd.f32 %v2004_v19, %v1427_v59  ;;  %v1522_v25 = vadd.f32 %v2029_v21, %v1473_v18 }
 0x146   :  { %v1525_v27 = vadd.f32 %v2032_v26, %v1476_v23 }
 0x156   :  { %v2049_v28 = vpop.f32.mrb[24].mxu0 }
 0x157   :  { %v2077_v29 = vpop.f32.mrb[24].mxu1  ;;  %v2050_v30 = vpop.f32.mrb[25].mxu0 }
 0x158   :  { %v2051_v31 = vadd.f32 %v2050_v30, %v2049_v28  ;;  %v2078_v32 = vpop.f32.mrb[25].mxu1  ;;  %v2052_v33 = vpop.f32.mrb[26].mxu0 }
 0x159   :  { %v2079_v34 = vadd.f32 %v2078_v32, %v2077_v29  ;;  %v2080_v35 = vpop.f32.mrb[26].mxu1  ;;  %v2053_v36 = vpop.f32.mrb[27].mxu0 }
 0x15a   :  { %v1563_v37 = vadd.f32 %v2051_v31, %v1514_v9  ;;  %v2054_v38 = vadd.f32 %v2053_v36, %v2052_v33  ;;  %v2081_v39 = vpop.f32.mrb[27].mxu1 }
 0x15b   :  { %v2082_v41 = vadd.f32 %v2081_v39, %v2080_v35 }
 0x15c   :  { %v1612_v42 = vadd.f32 %v2079_v34, %v1563_v37  ;;  %v1566_v43 = vadd.f32 %v2054_v38, %v1517_v11 }
 0x15e   :  { %v1634_v45 = vmul.f32 %v1844_v40, %v1612_v42  ;;  %v1615_v46 = vadd.f32 %v2082_v41, %v1566_v43  ;;  %v2055_v47 = vpop.f32.mrb[28].mxu0 }
 0x15f   :  { %v2083_v48 = vpop.f32.mrb[28].mxu1  ;;  %v2056_v49 = vpop.f32.mrb[29].mxu0 }
 0x160   :  { %v1644_v50 = vadd.f32 %v1845_v44, %v1634_v45  ;;  %v1635_v51 = vmul.f32 %v1844_v40, %v1615_v46  ;;  %v2057_v52 = vadd.f32 %v2056_v49, %v2055_v47  ;;  %v2084_v53 = vpop.f32.mrb[29].mxu1  ;;  %v2058_v54 = vpop.f32.mrb[30].mxu0 }
 0x161   :  { %v2085_v55 = vadd.f32 %v2084_v53, %v2083_v48  ;;  %v2086_v56 = vpop.f32.mrb[30].mxu1  ;;  %v2059_v57 = vpop.f32.mrb[31].mxu0 }
 0x162   :  { %v1652_v58 = vmul.f32 0.2, %v1644_v50  ;;  %v1645_v59 = vadd.f32 %v1845_v44, %v1635_v51  ;;  %v1571_v60 = vadd.f32 %v2057_v52, %v1522_v25  ;;  %v2087_v61 = vpop.f32.mrb[31].mxu1  ;;  %vm1648_vm0 = vcmp.ge.f32.partialorder %v1644_v50, 0.0 }
 0x163   :  { %v2060_v62 = vadd.f32 %v2059_v57, %v2058_v54  ;;  %v2088_v63 = vadd.f32 %v2087_v61, %v2086_v56 }
 0x164   :  { %vm1649_vm1 = vcmp.ge.f32.partialorder %v1645_v59, 0.0  ;;  %v1653_v0 = vmul.f32 0.2, %v1645_v59  ;;  %v1620_v1 = vadd.f32 %v2085_v55, %v1571_v60  ;;  %v1656_v3 = vsel %vm1648_vm0, %v1644_v50, %v1652_v58 }
 0x165   :  { %v1574_v2 = vadd.f32 %v2060_v62, %v1525_v27 }
 0x166   :  { %v1657_v4 = vsel %vm1649_vm1, %v1645_v59, %v1653_v0  ;;  %v1636_v5 = vmul.f32 %v1844_v40, %v1620_v1 }
 0x167   :  { %v1857_v6 = vpack.c.bf16 %v1657_v4, %v1656_v3  ;;  %v1623_v7 = vadd.f32 %v2088_v63, %v1574_v2 }
 0x168   :  { %v1646_v8 = vadd.f32 %v1845_v44, %v1636_v5 }
 0x169   :  { %1858 = vst [vmem:[%s2738_s4] sm:$0xff] %v1857_v6   ;;  %v1637_v9 = vmul.f32 %v1844_v40, %v1623_v7 }
 0x16a   :  { %v1654_v10 = vmul.f32 0.2, %v1646_v8  ;;  %vm1650_vm2 = vcmp.ge.f32.partialorder %v1646_v8, 0.0 }
 0x16b   :  { %v1647_v11 = vadd.f32 %v1845_v44, %v1637_v9 }
 0x16c   :  { %v1658_v13 = vsel %vm1650_vm2, %v1646_v8, %v1654_v10 }
 0x16d   :  { %vm1651_vm3 = vcmp.ge.f32.partialorder %v1647_v11, 0.0  ;;  %v1655_v12 = vmul.f32 0.2, %v1647_v11 }
 0x16f   :  { %v1659_v14 = vsel %vm1651_vm3, %v1647_v11, %v1655_v12 }
 0x170   :  { %v1862_v15 = vpack.c.bf16 %v1659_v14, %v1658_v13 }
 0x172   :  { %1864 = vst [vmem:[%s2738_s4 + $0x8] sm:$0xff] %v1862_v15  }

// kernel: _lambda_.9
= control target key start
LH: loop header
LB: loop body
LE: loop exit
PB: predicated region body
PF: predicated region fallthrough
CT: control target
= control target key end

     0   :  { %s2395_s1 = inlined_call_operand.vmem [shape: bf16[2048,128], index: 1, kind: input, shape index: {}]   ;;  %s2396_s2 = inlined_call_operand.vmem [shape: f32[1,128], index: 2, kind: input, shape index: {}]   ;;  %s2397_s3 = inlined_call_operand.vmem [shape: f32[1,128], index: 3, kind: input, shape index: {}]   ;;  %s2398_s0 = inlined_call_operand.vmem [shape: bf16[16,2048], index: 0, kind: input, shape index: {}]   ;;  %s2399_s4 = inlined_call_operand.vmem [shape: f32[16,128], index: 4, kind: output, shape index: {}]  }
   0x1   :  { %v1800_v0 = vld [vmem:[%s2395_s1 + $0x40] sm:$0xff]   ;;  %v1804_v4 = vld [vmem:[%s2395_s1 + $0x48] sm:$0xff]   ;;  %v1808_v8 = vld [vmem:[%s2395_s1 + $0x50] sm:$0xff]  }
   0x2   :  { %v1801_v1 = vld [vmem:[%s2395_s1 + $0xc0] sm:$0xff]   ;;  %1624 = vmatprep.subr.bf16.mxu0 %v1800_v0  ;;  %v1805_v5 = vld [vmem:[%s2395_s1 + $0xc8] sm:$0xff]   ;;  %v1809_v9 = vld [vmem:[%s2395_s1 + $0xd0] sm:$0xff]  }
   0x3   :  { %v1802_v2 = vld [vmem:[%s2395_s1] sm:$0xff]   ;;  %1646 = vmatprep.subr.bf16.mxu1 %v1801_v1  ;;  %v1806_v6 = vld [vmem:[%s2395_s1 + $0x8] sm:$0xff]   ;;  %v1810_v10 = vld [vmem:[%s2395_s1 + $0x10] sm:$0xff]  }
   0x4   :  { %v1803_v3 = vld [vmem:[%s2395_s1 + $0x80] sm:$0xff]   ;;  %1625 = vmatpush3.bf16.msra.mxu0 %v1802_v2  ;;  %v1807_v7 = vld [vmem:[%s2395_s1 + $0x88] sm:$0xff]   ;;  %v1811_v11 = vld [vmem:[%s2395_s1 + $0x90] sm:$0xff]  }
   0x5   :  { %1647 = vmatpush3.bf16.msra.mxu1 %v1803_v3  ;;  %1626 = vmatprep.subr.bf16.mxu0 %v1804_v4  ;;  %v1812_v12 = vld [vmem:[%s2395_s1 + $0x58] sm:$0xff]   ;;  %v1816_v16 = vld [vmem:[%s2395_s1 + $0x60] sm:$0xff]   ;;  %v1820_v20 = vld [vmem:[%s2395_s1 + $0x68] sm:$0xff]  }
   0x6   :  { %1648 = vmatprep.subr.bf16.mxu1 %v1805_v5  ;;  %v1813_v13 = vld [vmem:[%s2395_s1 + $0xd8] sm:$0xff]   ;;  %v1817_v17 = vld [vmem:[%s2395_s1 + $0xe0] sm:$0xff]   ;;  %v1821_v21 = vld [vmem:[%s2395_s1 + $0xe8] sm:$0xff]  }
   0x7   :  { %v1814_v14 = vld [vmem:[%s2395_s1 + $0x18] sm:$0xff]   ;;  %v1818_v18 = vld [vmem:[%s2395_s1 + $0x20] sm:$0xff]   ;;  %v1822_v22 = vld [vmem:[%s2395_s1 + $0x28] sm:$0xff]  }
   0x8   :  { %1627 = vmatpush3.bf16.msra.mxu0 %v1806_v6  ;;  %v1815_v15 = vld [vmem:[%s2395_s1 + $0x98] sm:$0xff]   ;;  %v1819_v19 = vld [vmem:[%s2395_s1 + $0xa0] sm:$0xff]   ;;  %v1823_v23 = vld [vmem:[%s2395_s1 + $0xa8] sm:$0xff]  }
   0x9   :  { %1649 = vmatpush3.bf16.msra.mxu1 %v1807_v7  ;;  %1628 = vmatprep.subr.bf16.mxu0 %v1808_v8  ;;  %v1824_v24 = vld [vmem:[%s2395_s1 + $0x70] sm:$0xff]   ;;  %v1828_v28 = vld [vmem:[%s2395_s1 + $0x78] sm:$0xff]   ;;  %v18_v32 = vld [vmem:[%s2398_s0] sm:$0xff] }
   0xa   :  { %1650 = vmatprep.subr.bf16.mxu1 %v1809_v9  ;;  %v1825_v25 = vld [vmem:[%s2395_s1 + $0xf0] sm:$0xff]   ;;  %v1829_v29 = vld [vmem:[%s2395_s1 + $0xf8] sm:$0xff]   ;;  %v26_v33 = vld [vmem:[%s2398_s0 + $0x40] sm:$0xff] }
   0xb   :  { %v1826_v26 = vld [vmem:[%s2395_s1 + $0x30] sm:$0xff]   ;;  %v1830_v30 = vld [vmem:[%s2395_s1 + $0x38] sm:$0xff]   ;;  %v19_v34 = vld [vmem:[%s2398_s0 + $0x8] sm:$0xff]  ;;  %v1480_v35 = vcombine.low %v18_v32, %v26_v33  ;;  %v1481_v36 = vcombine.high %v18_v32, %v26_v33 }
   0xc   :  { %1629 = vmatpush3.bf16.msra.mxu0 %v1810_v10  ;;  %v1827_v27 = vld [vmem:[%s2395_s1 + $0xb0] sm:$0xff]   ;;  %v1831_v31 = vld [vmem:[%s2395_s1 + $0xb8] sm:$0xff]   ;;  %v27_v37 = vld [vmem:[%s2398_s0 + $0x48] sm:$0xff] }
   0xd   :  { %1651 = vmatpush3.bf16.msra.mxu1 %v1811_v11  ;;  %1630 = vmatprep.subr.bf16.mxu0 %v1812_v12  ;;  %v1482_v38 = vcombine.low %v19_v34, %v27_v37  ;;  %v1483_v39 = vcombine.high %v19_v34, %v27_v37  ;;  %v1832_v40 = vld [vmem:[%s2395_s1 + $0x140] sm:$0xff]   ;;  %v1836_v44 = vld [vmem:[%s2395_s1 + $0x148] sm:$0xff]   ;;  %v1840_v48 = vld [vmem:[%s2395_s1 + $0x150] sm:$0xff]  }
   0xe   :  { %1652 = vmatprep.subr.bf16.mxu1 %v1813_v13  ;;  %1170 = vmatprep.mubr.bf16.mxu0 %v1481_v36  ;;  %v1833_v41 = vld [vmem:[%s2395_s1 + $0x1c0] sm:$0xff]   ;;  %v1837_v45 = vld [vmem:[%s2395_s1 + $0x1c8] sm:$0xff]   ;;  %v1841_v49 = vld [vmem:[%s2395_s1 + $0x1d0] sm:$0xff]  }
   0xf   :  { %1211 = vmatprep.mubr.bf16.mxu1 %v1483_v39  ;;  %v1834_v42 = vld [vmem:[%s2395_s1 + $0x100] sm:$0xff]   ;;  %v1838_v46 = vld [vmem:[%s2395_s1 + $0x108] sm:$0xff]   ;;  %v1842_v50 = vld [vmem:[%s2395_s1 + $0x110] sm:$0xff]  }
  0x10   :  { %1631 = vmatpush3.bf16.msra.mxu0 %v1814_v14  ;;  %v1835_v43 = vld [vmem:[%s2395_s1 + $0x180] sm:$0xff]   ;;  %v1839_v47 = vld [vmem:[%s2395_s1 + $0x188] sm:$0xff]   ;;  %v1843_v51 = vld [vmem:[%s2395_s1 + $0x190] sm:$0xff]  }
  0x11   :  { %1653 = vmatpush3.bf16.msra.mxu1 %v1815_v15  ;;  %1632 = vmatprep.subr.bf16.mxu0 %v1816_v16  ;;  %v1844_v52 = vld [vmem:[%s2395_s1 + $0x158] sm:$0xff]   ;;  %v1848_v56 = vld [vmem:[%s2395_s1 + $0x160] sm:$0xff]   ;;  %v1852_v60 = vld [vmem:[%s2395_s1 + $0x168] sm:$0xff]  }
  0x12   :  { %1654 = vmatprep.subr.bf16.mxu1 %v1817_v17  ;;  %v1845_v53 = vld [vmem:[%s2395_s1 + $0x1d8] sm:$0xff]   ;;  %v1849_v57 = vld [vmem:[%s2395_s1 + $0x1e0] sm:$0xff]   ;;  %v1853_v61 = vld [vmem:[%s2395_s1 + $0x1e8] sm:$0xff]  }
  0x13   :  { %v1846_v54 = vld [vmem:[%s2395_s1 + $0x118] sm:$0xff]   ;;  %v1850_v58 = vld [vmem:[%s2395_s1 + $0x120] sm:$0xff]   ;;  %v1854_v62 = vld [vmem:[%s2395_s1 + $0x128] sm:$0xff]  }
  0x14   :  { %1633 = vmatpush3.bf16.msra.mxu0 %v1818_v18  ;;  %v1847_v55 = vld [vmem:[%s2395_s1 + $0x198] sm:$0xff]   ;;  %v1851_v59 = vld [vmem:[%s2395_s1 + $0x1a0] sm:$0xff]   ;;  %v1855_v63 = vld [vmem:[%s2395_s1 + $0x1a8] sm:$0xff]  }
  0x15   :  { %1655 = vmatpush3.bf16.msra.mxu1 %v1819_v19  ;;  %1634 = vmatprep.subr.bf16.mxu0 %v1820_v20  ;;  %v1856_v0 = vld [vmem:[%s2395_s1 + $0x170] sm:$0xff]   ;;  %v1860_v4 = vld [vmem:[%s2395_s1 + $0x178] sm:$0xff]   ;;  %v1864_v16 = vld [vmem:[%s2395_s1 + $0x240] sm:$0xff]  }
  0x16   :  { %1656 = vmatprep.subr.bf16.mxu1 %v1821_v21  ;;  %v1857_v1 = vld [vmem:[%s2395_s1 + $0x1f0] sm:$0xff]   ;;  %v1861_v5 = vld [vmem:[%s2395_s1 + $0x1f8] sm:$0xff]   ;;  %v1865_v17 = vld [vmem:[%s2395_s1 + $0x2c0] sm:$0xff]  }
  0x17   :  { %v1858_v2 = vld [vmem:[%s2395_s1 + $0x130] sm:$0xff]   ;;  %v1862_v6 = vld [vmem:[%s2395_s1 + $0x138] sm:$0xff]   ;;  %v1866_v18 = vld [vmem:[%s2395_s1 + $0x200] sm:$0xff]  }
  0x18   :  { %1635 = vmatpush3.bf16.msra.mxu0 %v1822_v22  ;;  %v1859_v3 = vld [vmem:[%s2395_s1 + $0x1b0] sm:$0xff]   ;;  %v1863_v7 = vld [vmem:[%s2395_s1 + $0x1b8] sm:$0xff]   ;;  %v1867_v19 = vld [vmem:[%s2395_s1 + $0x280] sm:$0xff]  }
  0x19   :  { %1657 = vmatpush3.bf16.msra.mxu1 %v1823_v23  ;;  %1636 = vmatprep.subr.bf16.mxu0 %v1824_v24  ;;  %v20_v8 = vld [vmem:[%s2398_s0 + $0x10] sm:$0xff]  ;;  %v21_v12 = vld [vmem:[%s2398_s0 + $0x18] sm:$0xff]  ;;  %v1868_v20 = vld [vmem:[%s2395_s1 + $0x248] sm:$0xff]  }
  0x1a   :  { %1658 = vmatprep.subr.bf16.mxu1 %v1825_v25  ;;  %v28_v9 = vld [vmem:[%s2398_s0 + $0x50] sm:$0xff]  ;;  %v29_v13 = vld [vmem:[%s2398_s0 + $0x58] sm:$0xff]  ;;  %v1869_v21 = vld [vmem:[%s2395_s1 + $0x2c8] sm:$0xff]  }
  0x1b   :  { %v1484_v10 = vcombine.low %v20_v8, %v28_v9  ;;  %v1485_v11 = vcombine.high %v20_v8, %v28_v9  ;;  %v1486_v14 = vcombine.low %v21_v12, %v29_v13  ;;  %v1487_v15 = vcombine.high %v21_v12, %v29_v13  ;;  %v1870_v22 = vld [vmem:[%s2395_s1 + $0x208] sm:$0xff]   ;;  %v1872_v24 = vld [vmem:[%s2395_s1 + $0x250] sm:$0xff]   ;;  %v1880_v32 = vld [vmem:[%s2395_s1 + $0x260] sm:$0xff]  }
  0x1c   :  { %1637 = vmatpush3.bf16.msra.mxu0 %v1826_v26  ;;  %v1871_v23 = vld [vmem:[%s2395_s1 + $0x288] sm:$0xff]   ;;  %v1873_v25 = vld [vmem:[%s2395_s1 + $0x2d0] sm:$0xff]   ;;  %v1881_v33 = vld [vmem:[%s2395_s1 + $0x2e0] sm:$0xff]  }
  0x1d   :  { %1659 = vmatpush3.bf16.msra.mxu1 %v1827_v27  ;;  %1638 = vmatprep.subr.bf16.mxu0 %v1828_v28  ;;  %v1874_v26 = vld [vmem:[%s2395_s1 + $0x210] sm:$0xff]   ;;  %v1876_v28 = vld [vmem:[%s2395_s1 + $0x258] sm:$0xff]   ;;  %v1882_v34 = vld [vmem:[%s2395_s1 + $0x220] sm:$0xff]  }
  0x1e   :  { %1660 = vmatprep.subr.bf16.mxu1 %v1829_v29  ;;  %v1875_v27 = vld [vmem:[%s2395_s1 + $0x290] sm:$0xff]   ;;  %v1877_v29 = vld [vmem:[%s2395_s1 + $0x2d8] sm:$0xff]   ;;  %v1884_v36 = vld [vmem:[%s2395_s1 + $0x268] sm:$0xff]  }
  0x1f   :  { %v1885_v37 = vld [vmem:[%s2395_s1 + $0x2e8] sm:$0xff]   ;;  %v1912_v8 = vld [vmem:[%s2395_s1 + $0x360] sm:$0xff]  }
  0x20   :  { %1639 = vmatpush3.bf16.msra.mxu0 %v1830_v30  ;;  %v1878_v30 = vld [vmem:[%s2395_s1 + $0x218] sm:$0xff]   ;;  %v1887_v39 = vld [vmem:[%s2395_s1 + $0x2a8] sm:$0xff]   ;;  %v1913_v9 = vld [vmem:[%s2395_s1 + $0x3e0] sm:$0xff]  }
  0x21   :  { %1661 = vmatpush3.bf16.msra.mxu1 %v1831_v31  ;;  %1668 = vmatprep.subr.bf16.mxu0 %v1832_v40  ;;  %v1879_v31 = vld [vmem:[%s2395_s1 + $0x298] sm:$0xff]   ;;  %v1888_v40 = vld [vmem:[%s2395_s1 + $0x270] sm:$0xff]   ;;  %v1916_v12 = vld [vmem:[%s2395_s1 + $0x368] sm:$0xff]  }
  0x22   :  { %1690 = vmatprep.subr.bf16.mxu1 %v1833_v41  ;;  %v1889_v41 = vld [vmem:[%s2395_s1 + $0x2f0] sm:$0xff]   ;;  %v1917_v13 = vld [vmem:[%s2395_s1 + $0x3e8] sm:$0xff]  }
  0x23   :  { %1171 = vmatmul.mubr.bf16.vlgmr.msra.gmra.mrb[0].mxu0 %v1480_v35  ;;  %v1883_v35 = vld [vmem:[%s2395_s1 + $0x2a0] sm:$0xff]  }
  0x24   :  { %1212 = vmatmul.mubr.bf16.vlgmr.msra.gmra.mrb[0].mxu1 %v1482_v38  ;;  %1669 = vmatpush3.bf16.msra.mxu0 %v1834_v42  ;;  %v1886_v38 = vld [vmem:[%s2395_s1 + $0x228] sm:$0xff]   ;;  %v1890_v42 = vld [vmem:[%s2395_s1 + $0x230] sm:$0xff]  }
  0x25   :  { %1691 = vmatpush3.bf16.msra.mxu1 %v1835_v43  ;;  %1670 = vmatprep.subr.bf16.mxu0 %v1836_v44  ;;  %v1891_v43 = vld [vmem:[%s2395_s1 + $0x2b0] sm:$0xff]   ;;  %v1892_v44 = vld [vmem:[%s2395_s1 + $0x278] sm:$0xff]  }
  0x26   :  { %1692 = vmatprep.subr.bf16.mxu1 %v1837_v45  ;;  %1252 = vmatprep.mubr.bf16.mxu0 %v1485_v11  ;;  %v1893_v45 = vld [vmem:[%s2395_s1 + $0x2f8] sm:$0xff]   ;;  %v1915_v11 = vld [vmem:[%s2395_s1 + $0x3a0] sm:$0xff]  }
  0x27   :  { %1293 = vmatprep.mubr.bf16.mxu1 %v1487_v15  ;;  %v1919_v15 = vld [vmem:[%s2395_s1 + $0x3a8] sm:$0xff]  }
  0x28   :  { %1671 = vmatpush3.bf16.msra.mxu0 %v1838_v46  ;;  %v1894_v46 = vld [vmem:[%s2395_s1 + $0x238] sm:$0xff]  }
  0x29   :  { %1693 = vmatpush3.bf16.msra.mxu1 %v1839_v47  ;;  %1672 = vmatprep.subr.bf16.mxu0 %v1840_v48  ;;  %v1895_v47 = vld [vmem:[%s2395_s1 + $0x2b8] sm:$0xff]   ;;  %v22_v48 = vld [vmem:[%s2398_s0 + $0x20] sm:$0xff] }
  0x2a   :  { %1694 = vmatprep.subr.bf16.mxu1 %v1841_v49  ;;  %v30_v49 = vld [vmem:[%s2398_s0 + $0x60] sm:$0xff] }
  0x2c   :  { %1673 = vmatpush3.bf16.msra.mxu0 %v1842_v50  ;;  %v23_v50 = vld [vmem:[%s2398_s0 + $0x28] sm:$0xff] }
  0x2d   :  { %1695 = vmatpush3.bf16.msra.mxu1 %v1843_v51  ;;  %1674 = vmatprep.subr.bf16.mxu0 %v1844_v52  ;;  %v31_v51 = vld [vmem:[%s2398_s0 + $0x68] sm:$0xff]  ;;  %v1488_v52 = vcombine.low %v22_v48, %v30_v49 }
  0x2e   :  { %1696 = vmatprep.subr.bf16.mxu1 %v1845_v53  ;;  %v1489_v53 = vcombine.high %v22_v48, %v30_v49 }
  0x30   :  { %1675 = vmatpush3.bf16.msra.mxu0 %v1846_v54  ;;  %v1490_v54 = vcombine.low %v23_v50, %v31_v51 }
  0x31   :  { %1697 = vmatpush3.bf16.msra.mxu1 %v1847_v55  ;;  %1676 = vmatprep.subr.bf16.mxu0 %v1848_v56  ;;  %v1491_v55 = vcombine.high %v23_v50, %v31_v51  ;;  %v1896_v56 = vld [vmem:[%s2395_s1 + $0x340] sm:$0xff]  }
  0x32   :  { %1698 = vmatprep.subr.bf16.mxu1 %v1849_v57  ;;  %v1897_v57 = vld [vmem:[%s2395_s1 + $0x3c0] sm:$0xff]  }
  0x34   :  { %1677 = vmatpush3.bf16.msra.mxu0 %v1850_v58  ;;  %v1898_v58 = vld [vmem:[%s2395_s1 + $0x300] sm:$0xff]  }
  0x35   :  { %1699 = vmatpush3.bf16.msra.mxu1 %v1851_v59  ;;  %1678 = vmatprep.subr.bf16.mxu0 %v1852_v60  ;;  %v1899_v59 = vld [vmem:[%s2395_s1 + $0x380] sm:$0xff]   ;;  %v1900_v60 = vld [vmem:[%s2395_s1 + $0x348] sm:$0xff]  }
  0x36   :  { %1700 = vmatprep.subr.bf16.mxu1 %v1853_v61  ;;  %v1901_v61 = vld [vmem:[%s2395_s1 + $0x3c8] sm:$0xff]  }
  0x38   :  { %1679 = vmatpush3.bf16.msra.mxu0 %v1854_v62  ;;  %v1902_v62 = vld [vmem:[%s2395_s1 + $0x308] sm:$0xff]  }
  0x39   :  { %1701 = vmatpush3.bf16.msra.mxu1 %v1855_v63  ;;  %1680 = vmatprep.subr.bf16.mxu0 %v1856_v0  ;;  %v1903_v63 = vld [vmem:[%s2395_s1 + $0x388] sm:$0xff]   ;;  %v1904_v0 = vld [vmem:[%s2395_s1 + $0x350] sm:$0xff]  }
  0x3a   :  { %1702 = vmatprep.subr.bf16.mxu1 %v1857_v1  ;;  %v1905_v1 = vld [vmem:[%s2395_s1 + $0x3d0] sm:$0xff]  }
  0x3c   :  { %1681 = vmatpush3.bf16.msra.mxu0 %v1858_v2  ;;  %v1906_v2 = vld [vmem:[%s2395_s1 + $0x310] sm:$0xff]  }
  0x3d   :  { %1703 = vmatpush3.bf16.msra.mxu1 %v1859_v3  ;;  %1682 = vmatprep.subr.bf16.mxu0 %v1860_v4  ;;  %v1907_v3 = vld [vmem:[%s2395_s1 + $0x390] sm:$0xff]   ;;  %v1908_v4 = vld [vmem:[%s2395_s1 + $0x358] sm:$0xff]  }
  0x3e   :  { %1704 = vmatprep.subr.bf16.mxu1 %v1861_v5  ;;  %v1909_v5 = vld [vmem:[%s2395_s1 + $0x3d8] sm:$0xff]  }
  0x40   :  { %1683 = vmatpush3.bf16.msra.mxu0 %v1862_v6  ;;  %v1910_v6 = vld [vmem:[%s2395_s1 + $0x318] sm:$0xff]  }
  0x41   :  { %1705 = vmatpush3.bf16.msra.mxu1 %v1863_v7  ;;  %1712 = vmatprep.subr.bf16.mxu0 %v1864_v16  ;;  %v1911_v7 = vld [vmem:[%s2395_s1 + $0x398] sm:$0xff]   ;;  %v1920_v16 = vld [vmem:[%s2395_s1 + $0x370] sm:$0xff]  }
  0x42   :  { %1734 = vmatprep.subr.bf16.mxu1 %v1865_v17  ;;  %v1921_v17 = vld [vmem:[%s2395_s1 + $0x3f0] sm:$0xff]  }
  0x43   :  { %1253 = vmatmul.mubr.bf16.vlgmr.msra.gmra.mrb[4].mxu0 %v1484_v10  ;;  %v1914_v10 = vld [vmem:[%s2395_s1 + $0x320] sm:$0xff]  }
  0x44   :  { %1294 = vmatmul.mubr.bf16.vlgmr.msra.gmra.mrb[4].mxu1 %v1486_v14  ;;  %1713 = vmatpush3.bf16.msra.mxu0 %v1866_v18  ;;  %v1918_v14 = vld [vmem:[%s2395_s1 + $0x328] sm:$0xff]   ;;  %v1922_v18 = vld [vmem:[%s2395_s1 + $0x330] sm:$0xff]  }
  0x45   :  { %1735 = vmatpush3.bf16.msra.mxu1 %v1867_v19  ;;  %1714 = vmatprep.subr.bf16.mxu0 %v1868_v20  ;;  %v1923_v19 = vld [vmem:[%s2395_s1 + $0x3b0] sm:$0xff]   ;;  %v1924_v20 = vld [vmem:[%s2395_s1 + $0x378] sm:$0xff]  }
  0x46   :  { %1736 = vmatprep.subr.bf16.mxu1 %v1869_v21  ;;  %1334 = vmatprep.mubr.bf16.mxu0 %v1489_v53  ;;  %v1925_v21 = vld [vmem:[%s2395_s1 + $0x3f8] sm:$0xff]  }
  0x47   :  { %1375 = vmatprep.mubr.bf16.mxu1 %v1491_v55 }
  0x48   :  { %1715 = vmatpush3.bf16.msra.mxu0 %v1870_v22  ;;  %v1926_v22 = vld [vmem:[%s2395_s1 + $0x338] sm:$0xff]  }
  0x49   :  { %1737 = vmatpush3.bf16.msra.mxu1 %v1871_v23  ;;  %1716 = vmatprep.subr.bf16.mxu0 %v1872_v24  ;;  %v1927_v23 = vld [vmem:[%s2395_s1 + $0x3b8] sm:$0xff]   ;;  %v24_v24 = vld [vmem:[%s2398_s0 + $0x30] sm:$0xff] }
  0x4a   :  { %1738 = vmatprep.subr.bf16.mxu1 %v1873_v25  ;;  %v32_v25 = vld [vmem:[%s2398_s0 + $0x70] sm:$0xff] }
  0x4c   :  { %1717 = vmatpush3.bf16.msra.mxu0 %v1874_v26  ;;  %v25_v26 = vld [vmem:[%s2398_s0 + $0x38] sm:$0xff] }
  0x4d   :  { %1739 = vmatpush3.bf16.msra.mxu1 %v1875_v27  ;;  %1718 = vmatprep.subr.bf16.mxu0 %v1876_v28  ;;  %v1492_v27 = vcombine.low %v24_v24, %v32_v25  ;;  %v1493_v28 = vcombine.high %v24_v24, %v32_v25 }
  0x4e   :  { %1740 = vmatprep.subr.bf16.mxu1 %v1877_v29  ;;  %v33_v29 = vld [vmem:[%s2398_s0 + $0x78] sm:$0xff] }
  0x50   :  { %1719 = vmatpush3.bf16.msra.mxu0 %v1878_v30  ;;  %v1494_v30 = vcombine.low %v25_v26, %v33_v29 }
  0x51   :  { %1741 = vmatpush3.bf16.msra.mxu1 %v1879_v31  ;;  %1720 = vmatprep.subr.bf16.mxu0 %v1880_v32  ;;  %v1495_v31 = vcombine.high %v25_v26, %v33_v29 }
  0x52   :  { %1742 = vmatprep.subr.bf16.mxu1 %v1881_v33 }
  0x54   :  { %1721 = vmatpush3.bf16.msra.mxu0 %v1882_v34 }
  0x55   :  { %1743 = vmatpush3.bf16.msra.mxu1 %v1883_v35  ;;  %1722 = vmatprep.subr.bf16.mxu0 %v1884_v36 }
  0x56   :  { %1744 = vmatprep.subr.bf16.mxu1 %v1885_v37 }
  0x58   :  { %1723 = vmatpush3.bf16.msra.mxu0 %v1886_v38 }
  0x59   :  { %1745 = vmatpush3.bf16.msra.mxu1 %v1887_v39  ;;  %1724 = vmatprep.subr.bf16.mxu0 %v1888_v40 }
  0x5a   :  { %1746 = vmatprep.subr.bf16.mxu1 %v1889_v41 }
  0x5c   :  { %1725 = vmatpush3.bf16.msra.mxu0 %v1890_v42 }
  0x5d   :  { %1747 = vmatpush3.bf16.msra.mxu1 %v1891_v43  ;;  %1726 = vmatprep.subr.bf16.mxu0 %v1892_v44 }
  0x5e   :  { %1748 = vmatprep.subr.bf16.mxu1 %v1893_v45 }
  0x60   :  { %1727 = vmatpush3.bf16.msra.mxu0 %v1894_v46 }
  0x61   :  { %1749 = vmatpush3.bf16.msra.mxu1 %v1895_v47  ;;  %1756 = vmatprep.subr.bf16.mxu0 %v1896_v56 }
  0x62   :  { %1778 = vmatprep.subr.bf16.mxu1 %v1897_v57 }
  0x63   :  { %1335 = vmatmul.mubr.bf16.vlgmr.msra.gmra.mrb[8].mxu0 %v1488_v52 }
  0x64   :  { %1376 = vmatmul.mubr.bf16.vlgmr.msra.gmra.mrb[8].mxu1 %v1490_v54  ;;  %1757 = vmatpush3.bf16.msra.mxu0 %v1898_v58 }
  0x65   :  { %1779 = vmatpush3.bf16.msra.mxu1 %v1899_v59  ;;  %1758 = vmatprep.subr.bf16.mxu0 %v1900_v60 }
  0x66   :  { %1780 = vmatprep.subr.bf16.mxu1 %v1901_v61  ;;  %1416 = vmatprep.mubr.bf16.mxu0 %v1493_v28 }
  0x67   :  { %1457 = vmatprep.mubr.bf16.mxu1 %v1495_v31 }
  0x68   :  { %1759 = vmatpush3.bf16.msra.mxu0 %v1902_v62 }
  0x69   :  { %1781 = vmatpush3.bf16.msra.mxu1 %v1903_v63  ;;  %1760 = vmatprep.subr.bf16.mxu0 %v1904_v0 }
  0x6a   :  { %1782 = vmatprep.subr.bf16.mxu1 %v1905_v1 }
  0x6c   :  { %1761 = vmatpush3.bf16.msra.mxu0 %v1906_v2 }
  0x6d   :  { %1783 = vmatpush3.bf16.msra.mxu1 %v1907_v3  ;;  %1762 = vmatprep.subr.bf16.mxu0 %v1908_v4 }
  0x6e   :  { %1784 = vmatprep.subr.bf16.mxu1 %v1909_v5 }
  0x70   :  { %1763 = vmatpush3.bf16.msra.mxu0 %v1910_v6 }
  0x71   :  { %1785 = vmatpush3.bf16.msra.mxu1 %v1911_v7  ;;  %1764 = vmatprep.subr.bf16.mxu0 %v1912_v8 }
  0x72   :  { %1786 = vmatprep.subr.bf16.mxu1 %v1913_v9 }
  0x74   :  { %1765 = vmatpush3.bf16.msra.mxu0 %v1914_v10 }
  0x75   :  { %1787 = vmatpush3.bf16.msra.mxu1 %v1915_v11  ;;  %1766 = vmatprep.subr.bf16.mxu0 %v1916_v12 }
  0x76   :  { %1788 = vmatprep.subr.bf16.mxu1 %v1917_v13 }
  0x78   :  { %1767 = vmatpush3.bf16.msra.mxu0 %v1918_v14 }
  0x79   :  { %1789 = vmatpush3.bf16.msra.mxu1 %v1919_v15  ;;  %1768 = vmatprep.subr.bf16.mxu0 %v1920_v16 }
  0x7a   :  { %1790 = vmatprep.subr.bf16.mxu1 %v1921_v17 }
  0x7c   :  { %1769 = vmatpush3.bf16.msra.mxu0 %v1922_v18 }
  0x7d   :  { %1791 = vmatpush3.bf16.msra.mxu1 %v1923_v19  ;;  %1770 = vmatprep.subr.bf16.mxu0 %v1924_v20 }
  0x7e   :  { %1792 = vmatprep.subr.bf16.mxu1 %v1925_v21 }
  0x80   :  { %1771 = vmatpush3.bf16.msra.mxu0 %v1926_v22 }
  0x81   :  { %1793 = vmatpush3.bf16.msra.mxu1 %v1927_v23 }
  0x83   :  { %1417 = vmatmul.mubr.bf16.vlgmr.msra.gmra.mrb[12].mxu0 %v1492_v27 }
  0x84   :  { %1458 = vmatmul.mubr.bf16.vlgmr.msra.gmra.mrb[12].mxu1 %v1494_v30 }
  0xf6   :  { %v1640_v32 = vpop.f32.mrb[0].mxu0 }
  0xf7   :  { %v1662_v33 = vpop.f32.mrb[0].mxu1  ;;  %v1641_v34 = vpop.f32.mrb[1].mxu0 }
  0xf8   :  { %v1642_v35 = vadd.f32 %v1641_v34, %v1640_v32  ;;  %v1663_v36 = vpop.f32.mrb[1].mxu1  ;;  %v1643_v37 = vpop.f32.mrb[2].mxu0 }
  0xf9   :  { %v1664_v38 = vadd.f32 %v1663_v36, %v1662_v33  ;;  %v1665_v39 = vpop.f32.mrb[2].mxu1  ;;  %v1644_v40 = vpop.f32.mrb[3].mxu0 }
  0xfa   :  { %v1645_v41 = vadd.f32 %v1644_v40, %v1643_v37  ;;  %v1666_v42 = vpop.f32.mrb[3].mxu1 }
  0xfb   :  { %v1214_v43 = vadd.f32 %v1664_v38, %v1642_v35  ;;  %v1667_v44 = vadd.f32 %v1666_v42, %v1665_v39 }
  0xfd   :  { %v1217_v45 = vadd.f32 %v1667_v44, %v1645_v41 }
 0x116   :  { %v1684_v46 = vpop.f32.mrb[4].mxu0 }
 0x117   :  { %v1706_v47 = vpop.f32.mrb[4].mxu1  ;;  %v1685_v48 = vpop.f32.mrb[5].mxu0 }
 0x118   :  { %v1686_v49 = vadd.f32 %v1685_v48, %v1684_v46  ;;  %v1707_v50 = vpop.f32.mrb[5].mxu1  ;;  %v1687_v51 = vpop.f32.mrb[6].mxu0 }
 0x119   :  { %v1708_v52 = vadd.f32 %v1707_v50, %v1706_v47  ;;  %v1709_v53 = vpop.f32.mrb[6].mxu1  ;;  %v1688_v54 = vpop.f32.mrb[7].mxu0 }
 0x11a   :  { %v1255_v55 = vadd.f32 %v1686_v49, %v1214_v43  ;;  %v1689_v56 = vadd.f32 %v1688_v54, %v1687_v51  ;;  %v1710_v57 = vpop.f32.mrb[7].mxu1 }
 0x11b   :  { %v1711_v58 = vadd.f32 %v1710_v57, %v1709_v53 }
 0x11c   :  { %v1296_v59 = vadd.f32 %v1708_v52, %v1255_v55  ;;  %v1258_v60 = vadd.f32 %v1689_v56, %v1217_v45 }
 0x11e   :  { %v1299_v61 = vadd.f32 %v1711_v58, %v1258_v60 }
 0x136   :  { %v1728_v62 = vpop.f32.mrb[8].mxu0 }
 0x137   :  { %v1750_v63 = vpop.f32.mrb[8].mxu1  ;;  %v1729_v0 = vpop.f32.mrb[9].mxu0 }
 0x138   :  { %v1751_v1 = vpop.f32.mrb[9].mxu1  ;;  %v1730_v2 = vadd.f32 %v1729_v0, %v1728_v62  ;;  %v1731_v4 = vpop.f32.mrb[10].mxu0 }
 0x139   :  { %v1752_v3 = vadd.f32 %v1751_v1, %v1750_v63  ;;  %v1753_v5 = vpop.f32.mrb[10].mxu1  ;;  %v1732_v6 = vpop.f32.mrb[11].mxu0 }
 0x13a   :  { %v1754_v7 = vpop.f32.mrb[11].mxu1  ;;  %v1337_v8 = vadd.f32 %v1730_v2, %v1296_v59  ;;  %v1733_v9 = vadd.f32 %v1732_v6, %v1731_v4 }
 0x13b   :  { %v1755_v10 = vadd.f32 %v1754_v7, %v1753_v5 }
 0x13c   :  { %v1378_v11 = vadd.f32 %v1752_v3, %v1337_v8  ;;  %v1340_v12 = vadd.f32 %v1733_v9, %v1299_v61 }
 0x13e   :  { %v1381_v13 = vadd.f32 %v1755_v10, %v1340_v12 }
 0x156   :  { %v1772_v14 = vpop.f32.mrb[12].mxu0 }
 0x157   :  { %v1794_v15 = vpop.f32.mrb[12].mxu1  ;;  %v1773_v16 = vpop.f32.mrb[13].mxu0 }
 0x158   :  { %v1774_v17 = vadd.f32 %v1773_v16, %v1772_v14  ;;  %v1795_v18 = vpop.f32.mrb[13].mxu1  ;;  %v1775_v19 = vpop.f32.mrb[14].mxu0 }
 0x159   :  { %v1796_v20 = vadd.f32 %v1795_v18, %v1794_v15  ;;  %v1797_v21 = vpop.f32.mrb[14].mxu1  ;;  %v1776_v22 = vpop.f32.mrb[15].mxu0 }
 0x15a   :  { %v1419_v23 = vadd.f32 %v1774_v17, %v1378_v11  ;;  %v1777_v24 = vadd.f32 %v1776_v22, %v1775_v19  ;;  %v1798_v25 = vpop.f32.mrb[15].mxu1 }
 0x15b   :  { %v1799_v26 = vadd.f32 %v1798_v25, %v1797_v21 }
 0x15c   :  { %v1460_v27 = vadd.f32 %v1796_v20, %v1419_v23  ;;  %v1422_v28 = vadd.f32 %v1777_v24, %v1381_v13 }
 0x15e   :  { %v1466_v29 = vmul.f32 0.5, %v1460_v27  ;;  %v1463_v30 = vadd.f32 %v1799_v26, %v1422_v28 }
 0x160   :  { %1928 = vtanh.f32 %v1466_v29  ;;  %v1467_v31 = vmul.f32 0.5, %v1463_v30 }
 0x162   :  { %1930 = vtanh.f32 %v1467_v31 }
 0x16a   :  { %v1929_v32 = vpop.eup %1928 }
 0x16b   :  { %v1470_v33 = vadd.f32 1.0, %v1929_v32 }
 0x16c   :  { %v1931_v34 = vpop.eup %1930 }
 0x16d   :  { %v1472_v35 = vmul.f32 0.5, %v1470_v33  ;;  %v1471_v36 = vadd.f32 1.0, %v1931_v34 }
 0x16f   :  { %1474 = vst [vmem:[%s2399_s4] sm:$0xff] %v1472_v35  ;;  %v1473_v37 = vmul.f32 0.5, %v1471_v36 }
 0x171   :  { %1475 = vst [vmem:[%s2399_s4 + $0x8] sm:$0xff] %v1473_v37 }

</bundles_post_ra>
